<compile_context>
chip_gen: v7x
topology: tpu7x:2x2x1
jax: 0.10.0
libtpu: 0.0.40
codegen_flags: <defaults>
</compile_context>

<pallas_src>
import functools

import numpy as np

import jax
import jax.numpy as jnp
from jax import lax
from jax.experimental import pallas as pl
from jax.experimental.pallas import tpu as pltpu


_TAPS = [(kd, kh, kw) for kd in range(3) for kh in range(3) for kw in range(3)]


def _round_up(x, m):
    return ((x + m - 1) // m) * m


# ----------------------------- Pallas kernel ------------------------------ #

def _build_cols(col_ref, src, ch, offsets):
    """Transposed im2col into a VMEM scratch.

    col[t*ch:(t+1)*ch, q] = src[:, q + offsets[t]] for every column q that can
    be a valid output corner.  Each tap is a lane-roll of `src` (the circular
    wrap only corrupts columns strictly above the largest valid corner, which
    are discarded by the wrapper), and taps are grouped so every store fills
    whole 8-sublane tiles whenever 8 % ch == 0 (unmasked vst).
    """
    width = col_ref.shape[1]
    group = (8 // ch) if (ch < 8 and 8 % ch == 0) else 1
    t = 0
    while t < len(offsets):
        g = min(group, len(offsets) - t)
        parts = [src if offsets[t + j] == 0
                 else jnp.roll(src, -offsets[t + j], axis=1)
                 for j in range(g)]
        blk = parts[0] if g == 1 else jnp.concatenate(parts, axis=0)
        col_ref[t * ch:(t + g) * ch, :] = blk[:, :width]
        t += g


def _fused_inconv3d_kernel(x_ref, coord_ref, w1_ref, b1_ref, w2_ref, b2_ref,
                           o_ref, col1_ref, col2_ref, *,
                           neg_slope, Wp, Hp, Dp, wid):
    """Both conv layers for one batch element, entirely in VMEM.

    Flat-index convention: a (Dp, Hp, Wp) padded volume is flattened along
    lanes; tap (kd, kh, kw) is the contiguous lane window starting at
    kd*Hp*Wp + kh*Wp + kw, and the true output at (d, h, w) lives at flat
    column d*Hp*Wp + h*Wp + w (corner-aligned).
    """
    plane, row = Hp * Wp, Wp
    offs = [kd * plane + kh * row + kw for (kd, kh, kw) in _TAPS]
    c_in = x_ref.shape[1]
    mid_ch = w1_ref.shape[0]

    def lrelu(v):
        return jnp.where(v > 0, v, neg_slope * v)

    wp_i = coord_ref[0:1, :]
    hp_i = coord_ref[1:2, :]
    dp_i = coord_ref[2:3, :]

    def pad_axis(v, shift, idx, hi):
        # Convert a corner-aligned flat volume into its replication-padded
        # version along one axis: dest (.., xp, ..) <- src clamp(xp - 1).
        gen = jnp.roll(v, shift, axis=1)       # interior: source = dest - shift
        far = jnp.roll(v, 2 * shift, axis=1)   # high edge: clamp -> shift twice
        v = jnp.where(idx == 0, v, gen)        # low edge: clamp -> no shift
        return jnp.where(idx == hi, far, v)

    def rep_pad(v):
        v = pad_axis(v, 1, wp_i, Wp - 1)
        v = pad_axis(v, row, hp_i, Hp - 1)
        return pad_axis(v, plane, dp_i, Dp - 1)

    # ------------------------------ layer 1 ------------------------------ #
    # In-kernel replication pad of the corner-aligned input, then roll-based
    # transposed im2col and one K-dense GEMM.
    xpad = rep_pad(x_ref[0][:, :wid])                     # (c_in, wid)
    _build_cols(col1_ref, xpad, c_in, offs)
    y1 = jnp.dot(w1_ref[...], col1_ref[...], preferred_element_type=jnp.float32)
    y1 = lrelu(y1 + b1_ref[...])                          # (mid, wid), corner-aligned

    # ------------------------------ layer 2 ------------------------------ #
    y1p = rep_pad(y1)                                     # VMEM-resident pad
    _build_cols(col2_ref, y1p, mid_ch, offs)
    y2 = jnp.dot(w2_ref[...], col2_ref[...], preferred_element_type=jnp.float32)
    o_ref[0] = lrelu(y2 + b2_ref[...]).astype(o_ref.dtype)  # lane-dense (C_out, qo)


# ------------------------------- JAX wrapper ------------------------------- #

def inconv3d_forward(x_ncdhw, params, a):
    """Inconv3d.forward.  Input/output are NCDHW (PyTorch layout)."""
    n, c_in, d, h, w = x_ncdhw.shape
    w1, b1, w2, b2 = params["w1"], params["b1"], params["w2"], params["b2"]
    mid_ch, out_ch = w1.shape[0], w2.shape[0]

    dpad, hpad, wpad = d + 2, h + 2, w + 2
    plane, row = hpad * wpad, wpad
    lp = dpad * plane                       # flat length of the padded volume
    qo = _round_up(d * plane, 128)          # layer-2 / output columns (lane dense)
    wid = _round_up(lp, 128)                # layer-1 / intermediate columns
    d_ext = -(-wid // plane)                # input planes incl. zero tail
    lin = d_ext * plane

    # Corner-aligned zero-padded layout (ONE pad HLO; the replication pad is
    # done in-kernel): x_flat[n, c, dd*plane + hh*row + ww] == x[n, c, dd, hh, ww].
    x_flat = jnp.pad(
        x_ncdhw, ((0, 0), (0, 0), (0, d_ext - d), (0, 2), (0, 2))
    ).reshape(n, c_in, lin)

    # Weights (out, in, kd, kh, kw) -> tap-major (out, 27*in); exact K, no pad.
    w1_col = jnp.transpose(w1, (0, 2, 3, 4, 1)).reshape(mid_ch, 27 * c_in)
    w2_col = jnp.transpose(w2, (0, 2, 3, 4, 1)).reshape(out_ch, 27 * mid_ch)
    b1_col = b1.reshape(mid_ch, 1)
    b2_col = b2.reshape(out_ch, 1)

    # (wp, hp, dp) coordinate of each flat column (static constant; avoids
    # in-kernel integer div/mod on vectors).
    qs = np.arange(wid)
    coords = jnp.asarray(
        np.stack([qs % wpad, (qs // wpad) % hpad, qs // plane]).astype(np.int32))

    kernel = functools.partial(
        _fused_inconv3d_kernel, neg_slope=float(a),
        Wp=wpad, Hp=hpad, Dp=dpad, wid=wid)

    # Constant operands (weights/bias/coords) keep a fixed block index, so the
    # pipeline reuses the same VMEM copy every step.
    out_flat = pl.pallas_call(
        kernel,
        out_shape=jax.ShapeDtypeStruct((n, out_ch, qo), jnp.float32),
        grid_spec=pltpu.PrefetchScalarGridSpec(
            num_scalar_prefetch=0,
            grid=(n,),
            in_specs=[
                pl.BlockSpec((1, c_in, lin), lambda i: (i, 0, 0)),     # flat input
                pl.BlockSpec((3, wid), lambda i: (0, 0)),              # (wp,hp,dp)
                pl.BlockSpec((mid_ch, 27 * c_in), lambda i: (0, 0)),   # w1 tap-major
                pl.BlockSpec((mid_ch, 1), lambda i: (0, 0)),           # b1
                pl.BlockSpec((out_ch, 27 * mid_ch), lambda i: (0, 0)),  # w2 tap-major
                pl.BlockSpec((out_ch, 1), lambda i: (0, 0)),           # b2
            ],
            out_specs=pl.BlockSpec((1, out_ch, qo), lambda i: (i, 0, 0)),
            scratch_shapes=[
                pltpu.VMEM((27 * c_in, wid), jnp.float32),   # layer-1 im2col
                pltpu.VMEM((27 * mid_ch, qo), jnp.float32),  # layer-2 im2col
            ]),
        compiler_params=pltpu.CompilerParams(
            dimension_semantics=("parallel",),
            vmem_limit_bytes=32 * 1024 * 1024),
    )(x_flat, coords, w1_col, b1_col, w2_col, b2_col)

    # Valid outputs live at flat column d*plane + h*row + w (corner-aligned);
    # the result is already NCDHW -- no final transpose needed.
    out = out_flat[:, :, :d * plane].reshape(n, out_ch, d, hpad, wpad)
    return out[:, :, :, :h, :w]


# --------------------------- reference (checking) -------------------------- #

def _ref_layer(x, w_oidhw, b, a):
    xp = jnp.pad(x, ((0, 0), (0, 0), (1, 1), (1, 1), (1, 1)), mode="edge")
    y = lax.conv_general_dilated(
        xp, w_oidhw, window_strides=(1, 1, 1), padding="VALID",
        dimension_numbers=("NCDHW", "OIDHW", "NCDHW"))
    y = y + b.reshape(1, -1, 1, 1, 1)
    return jnp.where(y > 0, y, a * y)


def _ref_forward(x, params, a):
    y = _ref_layer(x, params["w1"], params["b1"], a)
    return _ref_layer(y, params["w2"], params["b2"], a)


# --------------------------------- main ------------------------------------ #

if __name__ == "__main__":
    # Module config: Inconv3d(in_ch=4, mid_ch=8, out_ch=8, a=0.1)
    in_ch, mid_ch, out_ch = 4, 8, 8
    a = 0.1
    N, D, H, W = 2, 8, 8, 8

    key = jax.random.PRNGKey(0)
    kx, kw1, kb1, kw2, kb2 = jax.random.split(key, 5)

    # Synthetic parameters in PyTorch Conv3d layout: (out_ch, in_ch, kD, kH, kW).
    params = {
        "w1": jax.random.normal(kw1, (mid_ch, in_ch, 3, 3, 3), jnp.float32) * 0.1,
        "b1": jax.random.normal(kb1, (mid_ch,), jnp.float32) * 0.1,
        "w2": jax.random.normal(kw2, (out_ch, mid_ch, 3, 3, 3), jnp.float32) * 0.1,
        "b2": jax.random.normal(kb2, (out_ch,), jnp.float32) * 0.1,
    }
    x = jax.random.normal(kx, (N, in_ch, D, H, W), jnp.float32)   # NCDHW like PyTorch

    fwd = jax.jit(inconv3d_forward, static_argnums=2)
    out = jax.block_until_ready(fwd(x, params, a))
    ref = jax.block_until_ready(_ref_forward(x, params, a))

    assert out.shape == (N, out_ch, D, H, W)
    assert jnp.allclose(out, ref, atol=1e-3, rtol=1e-3), \
        float(jnp.max(jnp.abs(out - ref)))

    print("KERNEL_OK")
</pallas_src>

<mosaic_0001>
module attributes {stable_mosaic.version = 11 : i64} {
  func.func @_fused_inconv3d_kernel(%arg0: i32, %arg1: memref<1x4x1100xf32, #tpu.memory_space<vmem>>, %arg2: memref<3x1024xi32, #tpu.memory_space<vmem>>, %arg3: memref<8x108xf32, #tpu.memory_space<vmem>>, %arg4: memref<8x1xf32, #tpu.memory_space<vmem>>, %arg5: memref<8x216xf32, #tpu.memory_space<vmem>>, %arg6: memref<8x1xf32, #tpu.memory_space<vmem>>, %arg7: memref<1x8x896xf32, #tpu.memory_space<vmem>>, %arg8: memref<108x1024xf32, #tpu.memory_space<vmem>>, %arg9: memref<216x896xf32, #tpu.memory_space<vmem>>) attributes {dimension_semantics = [#tpu.dimension_semantics<parallel>], iteration_bounds = array<i64: 2>, scalar_prefetch = 0 : i64, scratch_operands = 2 : i64, tpu.core_type = #tpu.core_type<tc>, window_params = [{transform_indices = @transform_0, window_bounds = array<i64: 1, 4, 1100>}, {pipeline_mode = #tpu.pipeline_mode<synchronous>, transform_indices = @transform_1, window_bounds = array<i64: 3, 1024>}, {pipeline_mode = #tpu.pipeline_mode<synchronous>, transform_indices = @transform_2, window_bounds = array<i64: 8, 108>}, {pipeline_mode = #tpu.pipeline_mode<synchronous>, transform_indices = @transform_3, window_bounds = array<i64: 8, 1>}, {pipeline_mode = #tpu.pipeline_mode<synchronous>, transform_indices = @transform_4, window_bounds = array<i64: 8, 216>}, {pipeline_mode = #tpu.pipeline_mode<synchronous>, transform_indices = @transform_5, window_bounds = array<i64: 8, 1>}, {transform_indices = @transform_6, window_bounds = array<i64: 1, 8, 896>}]} {
    %c0 = arith.constant 0 : index
    %c0_0 = arith.constant 0 : index
    %0 = vector.load %arg2[%c0, %c0_0] : memref<3x1024xi32, #tpu.memory_space<vmem>>, vector<1x1024xi32>
    %c1 = arith.constant 1 : index
    %c0_1 = arith.constant 0 : index
    %1 = vector.load %arg2[%c1, %c0_1] : memref<3x1024xi32, #tpu.memory_space<vmem>>, vector<1x1024xi32>
    %c2 = arith.constant 2 : index
    %c0_2 = arith.constant 0 : index
    %2 = vector.load %arg2[%c2, %c0_2] : memref<3x1024xi32, #tpu.memory_space<vmem>>, vector<1x1024xi32>
    %c0_3 = arith.constant 0 : index
    %c0_4 = arith.constant 0 : index
    %c0_5 = arith.constant 0 : index
    %3 = vector.load %arg1[%c0_3, %c0_4, %c0_5] : memref<1x4x1100xf32, #tpu.memory_space<vmem>>, vector<1x4x1100xf32>
    %4 = vector.shape_cast %3 : vector<1x4x1100xf32> to vector<4x1100xf32>
    %5 = vector.extract_strided_slice %4 {offsets = [0, 0], sizes = [4, 1024], strides = [1, 1]} : vector<4x1100xf32> to vector<4x1024xf32>
    %6 = vector.extract_strided_slice %5 {offsets = [0, 1023], sizes = [4, 1], strides = [1, 1]} : vector<4x1024xf32> to vector<4x1xf32>
    %7 = vector.extract_strided_slice %5 {offsets = [0, 0], sizes = [4, 1023], strides = [1, 1]} : vector<4x1024xf32> to vector<4x1023xf32>
    %8 = tpu.concatenate %6, %7 in 1 : vector<4x1xf32>, vector<4x1023xf32> -> vector<4x1024xf32>
    %9 = vector.extract_strided_slice %5 {offsets = [0, 1022], sizes = [4, 2], strides = [1, 1]} : vector<4x1024xf32> to vector<4x2xf32>
    %10 = vector.extract_strided_slice %5 {offsets = [0, 0], sizes = [4, 1022], strides = [1, 1]} : vector<4x1024xf32> to vector<4x1022xf32>
    %11 = tpu.concatenate %9, %10 in 1 : vector<4x2xf32>, vector<4x1022xf32> -> vector<4x1024xf32>
    %c0_i32 = arith.constant 0 : i32
    %12 = vector.broadcast %c0_i32 : i32 to vector<1x1024xi32>
    %13 = arith.cmpi eq, %0, %12 : vector<1x1024xi32>
    %14 = vector.shape_cast %13 : vector<1x1024xi1> to vector<1x1024xi1>
    %15 = vector.broadcast %14 : vector<1x1024xi1> to vector<4x1024xi1>
    %16 = arith.select %15, %5, %8 : vector<4x1024xi1>, vector<4x1024xf32>
    %c9_i32 = arith.constant 9 : i32
    %17 = vector.broadcast %c9_i32 : i32 to vector<1x1024xi32>
    %18 = arith.cmpi eq, %0, %17 : vector<1x1024xi32>
    %19 = vector.shape_cast %18 : vector<1x1024xi1> to vector<1x1024xi1>
    %20 = vector.broadcast %19 : vector<1x1024xi1> to vector<4x1024xi1>
    %21 = arith.select %20, %11, %16 : vector<4x1024xi1>, vector<4x1024xf32>
    %22 = vector.extract_strided_slice %21 {offsets = [0, 1014], sizes = [4, 10], strides = [1, 1]} : vector<4x1024xf32> to vector<4x10xf32>
    %23 = vector.extract_strided_slice %21 {offsets = [0, 0], sizes = [4, 1014], strides = [1, 1]} : vector<4x1024xf32> to vector<4x1014xf32>
    %24 = tpu.concatenate %22, %23 in 1 : vector<4x10xf32>, vector<4x1014xf32> -> vector<4x1024xf32>
    %25 = vector.extract_strided_slice %21 {offsets = [0, 1004], sizes = [4, 20], strides = [1, 1]} : vector<4x1024xf32> to vector<4x20xf32>
    %26 = vector.extract_strided_slice %21 {offsets = [0, 0], sizes = [4, 1004], strides = [1, 1]} : vector<4x1024xf32> to vector<4x1004xf32>
    %27 = tpu.concatenate %25, %26 in 1 : vector<4x20xf32>, vector<4x1004xf32> -> vector<4x1024xf32>
    %c0_i32_6 = arith.constant 0 : i32
    %28 = vector.broadcast %c0_i32_6 : i32 to vector<1x1024xi32>
    %29 = arith.cmpi eq, %1, %28 : vector<1x1024xi32>
    %30 = vector.shape_cast %29 : vector<1x1024xi1> to vector<1x1024xi1>
    %31 = vector.broadcast %30 : vector<1x1024xi1> to vector<4x1024xi1>
    %32 = arith.select %31, %21, %24 : vector<4x1024xi1>, vector<4x1024xf32>
    %c9_i32_7 = arith.constant 9 : i32
    %33 = vector.broadcast %c9_i32_7 : i32 to vector<1x1024xi32>
    %34 = arith.cmpi eq, %1, %33 : vector<1x1024xi32>
    %35 = vector.shape_cast %34 : vector<1x1024xi1> to vector<1x1024xi1>
    %36 = vector.broadcast %35 : vector<1x1024xi1> to vector<4x1024xi1>
    %37 = arith.select %36, %27, %32 : vector<4x1024xi1>, vector<4x1024xf32>
    %38 = vector.extract_strided_slice %37 {offsets = [0, 924], sizes = [4, 100], strides = [1, 1]} : vector<4x1024xf32> to vector<4x100xf32>
    %39 = vector.extract_strided_slice %37 {offsets = [0, 0], sizes = [4, 924], strides = [1, 1]} : vector<4x1024xf32> to vector<4x924xf32>
    %40 = tpu.concatenate %38, %39 in 1 : vector<4x100xf32>, vector<4x924xf32> -> vector<4x1024xf32>
    %41 = vector.extract_strided_slice %37 {offsets = [0, 824], sizes = [4, 200], strides = [1, 1]} : vector<4x1024xf32> to vector<4x200xf32>
    %42 = vector.extract_strided_slice %37 {offsets = [0, 0], sizes = [4, 824], strides = [1, 1]} : vector<4x1024xf32> to vector<4x824xf32>
    %43 = tpu.concatenate %41, %42 in 1 : vector<4x200xf32>, vector<4x824xf32> -> vector<4x1024xf32>
    %c0_i32_8 = arith.constant 0 : i32
    %44 = vector.broadcast %c0_i32_8 : i32 to vector<1x1024xi32>
    %45 = arith.cmpi eq, %2, %44 : vector<1x1024xi32>
    %46 = vector.shape_cast %45 : vector<1x1024xi1> to vector<1x1024xi1>
    %47 = vector.broadcast %46 : vector<1x1024xi1> to vector<4x1024xi1>
    %48 = arith.select %47, %37, %40 : vector<4x1024xi1>, vector<4x1024xf32>
    %c9_i32_9 = arith.constant 9 : i32
    %49 = vector.broadcast %c9_i32_9 : i32 to vector<1x1024xi32>
    %50 = arith.cmpi eq, %2, %49 : vector<1x1024xi32>
    %51 = vector.shape_cast %50 : vector<1x1024xi1> to vector<1x1024xi1>
    %52 = vector.broadcast %51 : vector<1x1024xi1> to vector<4x1024xi1>
    %53 = arith.select %52, %43, %48 : vector<4x1024xi1>, vector<4x1024xf32>
    %54 = vector.extract_strided_slice %53 {offsets = [0, 1], sizes = [4, 1023], strides = [1, 1]} : vector<4x1024xf32> to vector<4x1023xf32>
    %55 = vector.extract_strided_slice %53 {offsets = [0, 0], sizes = [4, 1], strides = [1, 1]} : vector<4x1024xf32> to vector<4x1xf32>
    %56 = tpu.concatenate %54, %55 in 1 : vector<4x1023xf32>, vector<4x1xf32> -> vector<4x1024xf32>
    %57 = tpu.concatenate %53, %56 in 0 : vector<4x1024xf32>, vector<4x1024xf32> -> vector<8x1024xf32>
    %c0_10 = arith.constant 0 : index
    %c0_11 = arith.constant 0 : index
    %58 = vector.load %arg8[%c0_10, %c0_11] : memref<108x1024xf32, #tpu.memory_space<vmem>>, vector<8x1024xf32>
    tpu.vector_store %arg8[%c0_10, %c0_11], %57 {strides = array<i32>} : memref<108x1024xf32, #tpu.memory_space<vmem>>, vector<8x1024xf32>,
    %59 = vector.extract_strided_slice %53 {offsets = [0, 2], sizes = [4, 1022], strides = [1, 1]} : vector<4x1024xf32> to vector<4x1022xf32>
    %60 = vector.extract_strided_slice %53 {offsets = [0, 0], sizes = [4, 2], strides = [1, 1]} : vector<4x1024xf32> to vector<4x2xf32>
    %61 = tpu.concatenate %59, %60 in 1 : vector<4x1022xf32>, vector<4x2xf32> -> vector<4x1024xf32>
    %62 = vector.extract_strided_slice %53 {offsets = [0, 10], sizes = [4, 1014], strides = [1, 1]} : vector<4x1024xf32> to vector<4x1014xf32>
    %63 = vector.extract_strided_slice %53 {offsets = [0, 0], sizes = [4, 10], strides = [1, 1]} : vector<4x1024xf32> to vector<4x10xf32>
    %64 = tpu.concatenate %62, %63 in 1 : vector<4x1014xf32>, vector<4x10xf32> -> vector<4x1024xf32>
    %65 = tpu.concatenate %61, %64 in 0 : vector<4x1024xf32>, vector<4x1024xf32> -> vector<8x1024xf32>
    %c8 = arith.constant 8 : index
    %c0_12 = arith.constant 0 : index
    %66 = vector.load %arg8[%c8, %c0_12] : memref<108x1024xf32, #tpu.memory_space<vmem>>, vector<8x1024xf32>
    tpu.vector_store %arg8[%c8, %c0_12], %65 {strides = array<i32>} : memref<108x1024xf32, #tpu.memory_space<vmem>>, vector<8x1024xf32>,
    %67 = vector.extract_strided_slice %53 {offsets = [0, 11], sizes = [4, 1013], strides = [1, 1]} : vector<4x1024xf32> to vector<4x1013xf32>
    %68 = vector.extract_strided_slice %53 {offsets = [0, 0], sizes = [4, 11], strides = [1, 1]} : vector<4x1024xf32> to vector<4x11xf32>
    %69 = tpu.concatenate %67, %68 in 1 : vector<4x1013xf32>, vector<4x11xf32> -> vector<4x1024xf32>
    %70 = vector.extract_strided_slice %53 {offsets = [0, 12], sizes = [4, 1012], strides = [1, 1]} : vector<4x1024xf32> to vector<4x1012xf32>
    %71 = vector.extract_strided_slice %53 {offsets = [0, 0], sizes = [4, 12], strides = [1, 1]} : vector<4x1024xf32> to vector<4x12xf32>
    %72 = tpu.concatenate %70, %71 in 1 : vector<4x1012xf32>, vector<4x12xf32> -> vector<4x1024xf32>
    %73 = tpu.concatenate %69, %72 in 0 : vector<4x1024xf32>, vector<4x1024xf32> -> vector<8x1024xf32>
    %c16 = arith.constant 16 : index
    %c0_13 = arith.constant 0 : index
    %74 = vector.load %arg8[%c16, %c0_13] : memref<108x1024xf32, #tpu.memory_space<vmem>>, vector<8x1024xf32>
    tpu.vector_store %arg8[%c16, %c0_13], %73 {strides = array<i32>} : memref<108x1024xf32, #tpu.memory_space<vmem>>, vector<8x1024xf32>,
    %75 = vector.extract_strided_slice %53 {offsets = [0, 20], sizes = [4, 1004], strides = [1, 1]} : vector<4x1024xf32> to vector<4x1004xf32>
    %76 = vector.extract_strided_slice %53 {offsets = [0, 0], sizes = [4, 20], strides = [1, 1]} : vector<4x1024xf32> to vector<4x20xf32>
    %77 = tpu.concatenate %75, %76 in 1 : vector<4x1004xf32>, vector<4x20xf32> -> vector<4x1024xf32>
    %78 = vector.extract_strided_slice %53 {offsets = [0, 21], sizes = [4, 1003], strides = [1, 1]} : vector<4x1024xf32> to vector<4x1003xf32>
    %79 = vector.extract_strided_slice %53 {offsets = [0, 0], sizes = [4, 21], strides = [1, 1]} : vector<4x1024xf32> to vector<4x21xf32>
    %80 = tpu.concatenate %78, %79 in 1 : vector<4x1003xf32>, vector<4x21xf32> -> vector<4x1024xf32>
    %81 = tpu.concatenate %77, %80 in 0 : vector<4x1024xf32>, vector<4x1024xf32> -> vector<8x1024xf32>
    %c24 = arith.constant 24 : index
    %c0_14 = arith.constant 0 : index
    %82 = vector.load %arg8[%c24, %c0_14] : memref<108x1024xf32, #tpu.memory_space<vmem>>, vector<8x1024xf32>
    tpu.vector_store %arg8[%c24, %c0_14], %81 {strides = array<i32>} : memref<108x1024xf32, #tpu.memory_space<vmem>>, vector<8x1024xf32>,
    %83 = vector.extract_strided_slice %53 {offsets = [0, 22], sizes = [4, 1002], strides = [1, 1]} : vector<4x1024xf32> to vector<4x1002xf32>
    %84 = vector.extract_strided_slice %53 {offsets = [0, 0], sizes = [4, 22], strides = [1, 1]} : vector<4x1024xf32> to vector<4x22xf32>
    %85 = tpu.concatenate %83, %84 in 1 : vector<4x1002xf32>, vector<4x22xf32> -> vector<4x1024xf32>
    %86 = vector.extract_strided_slice %53 {offsets = [0, 100], sizes = [4, 924], strides = [1, 1]} : vector<4x1024xf32> to vector<4x924xf32>
    %87 = vector.extract_strided_slice %53 {offsets = [0, 0], sizes = [4, 100], strides = [1, 1]} : vector<4x1024xf32> to vector<4x100xf32>
    %88 = tpu.concatenate %86, %87 in 1 : vector<4x924xf32>, vector<4x100xf32> -> vector<4x1024xf32>
    %89 = tpu.concatenate %85, %88 in 0 : vector<4x1024xf32>, vector<4x1024xf32> -> vector<8x1024xf32>
    %c32 = arith.constant 32 : index
    %c0_15 = arith.constant 0 : index
    %90 = vector.load %arg8[%c32, %c0_15] : memref<108x1024xf32, #tpu.memory_space<vmem>>, vector<8x1024xf32>
    tpu.vector_store %arg8[%c32, %c0_15], %89 {strides = array<i32>} : memref<108x1024xf32, #tpu.memory_space<vmem>>, vector<8x1024xf32>,
    %91 = vector.extract_strided_slice %53 {offsets = [0, 101], sizes = [4, 923], strides = [1, 1]} : vector<4x1024xf32> to vector<4x923xf32>
    %92 = vector.extract_strided_slice %53 {offsets = [0, 0], sizes = [4, 101], strides = [1, 1]} : vector<4x1024xf32> to vector<4x101xf32>
    %93 = tpu.concatenate %91, %92 in 1 : vector<4x923xf32>, vector<4x101xf32> -> vector<4x1024xf32>
    %94 = vector.extract_strided_slice %53 {offsets = [0, 102], sizes = [4, 922], strides = [1, 1]} : vector<4x1024xf32> to vector<4x922xf32>
    %95 = vector.extract_strided_slice %53 {offsets = [0, 0], sizes = [4, 102], strides = [1, 1]} : vector<4x1024xf32> to vector<4x102xf32>
    %96 = tpu.concatenate %94, %95 in 1 : vector<4x922xf32>, vector<4x102xf32> -> vector<4x1024xf32>
    %97 = tpu.concatenate %93, %96 in 0 : vector<4x1024xf32>, vector<4x1024xf32> -> vector<8x1024xf32>
    %c40 = arith.constant 40 : index
    %c0_16 = arith.constant 0 : index
    %98 = vector.load %arg8[%c40, %c0_16] : memref<108x1024xf32, #tpu.memory_space<vmem>>, vector<8x1024xf32>
    tpu.vector_store %arg8[%c40, %c0_16], %97 {strides = array<i32>} : memref<108x1024xf32, #tpu.memory_space<vmem>>, vector<8x1024xf32>,
    %99 = vector.extract_strided_slice %53 {offsets = [0, 110], sizes = [4, 914], strides = [1, 1]} : vector<4x1024xf32> to vector<4x914xf32>
    %100 = vector.extract_strided_slice %53 {offsets = [0, 0], sizes = [4, 110], strides = [1, 1]} : vector<4x1024xf32> to vector<4x110xf32>
    %101 = tpu.concatenate %99, %100 in 1 : vector<4x914xf32>, vector<4x110xf32> -> vector<4x1024xf32>
    %102 = vector.extract_strided_slice %53 {offsets = [0, 111], sizes = [4, 913], strides = [1, 1]} : vector<4x1024xf32> to vector<4x913xf32>
    %103 = vector.extract_strided_slice %53 {offsets = [0, 0], sizes = [4, 111], strides = [1, 1]} : vector<4x1024xf32> to vector<4x111xf32>
    %104 = tpu.concatenate %102, %103 in 1 : vector<4x913xf32>, vector<4x111xf32> -> vector<4x1024xf32>
    %105 = tpu.concatenate %101, %104 in 0 : vector<4x1024xf32>, vector<4x1024xf32> -> vector<8x1024xf32>
    %c48 = arith.constant 48 : index
    %c0_17 = arith.constant 0 : index
    %106 = vector.load %arg8[%c48, %c0_17] : memref<108x1024xf32, #tpu.memory_space<vmem>>, vector<8x1024xf32>
    tpu.vector_store %arg8[%c48, %c0_17], %105 {strides = array<i32>} : memref<108x1024xf32, #tpu.memory_space<vmem>>, vector<8x1024xf32>,
    %107 = vector.extract_strided_slice %53 {offsets = [0, 112], sizes = [4, 912], strides = [1, 1]} : vector<4x1024xf32> to vector<4x912xf32>
    %108 = vector.extract_strided_slice %53 {offsets = [0, 0], sizes = [4, 112], strides = [1, 1]} : vector<4x1024xf32> to vector<4x112xf32>
    %109 = tpu.concatenate %107, %108 in 1 : vector<4x912xf32>, vector<4x112xf32> -> vector<4x1024xf32>
    %110 = vector.extract_strided_slice %53 {offsets = [0, 120], sizes = [4, 904], strides = [1, 1]} : vector<4x1024xf32> to vector<4x904xf32>
    %111 = vector.extract_strided_slice %53 {offsets = [0, 0], sizes = [4, 120], strides = [1, 1]} : vector<4x1024xf32> to vector<4x120xf32>
    %112 = tpu.concatenate %110, %111 in 1 : vector<4x904xf32>, vector<4x120xf32> -> vector<4x1024xf32>
    %113 = tpu.concatenate %109, %112 in 0 : vector<4x1024xf32>, vector<4x1024xf32> -> vector<8x1024xf32>
    %c56 = arith.constant 56 : index
    %c0_18 = arith.constant 0 : index
    %114 = vector.load %arg8[%c56, %c0_18] : memref<108x1024xf32, #tpu.memory_space<vmem>>, vector<8x1024xf32>
    tpu.vector_store %arg8[%c56, %c0_18], %113 {strides = array<i32>} : memref<108x1024xf32, #tpu.memory_space<vmem>>, vector<8x1024xf32>,
    %115 = vector.extract_strided_slice %53 {offsets = [0, 121], sizes = [4, 903], strides = [1, 1]} : vector<4x1024xf32> to vector<4x903xf32>
    %116 = vector.extract_strided_slice %53 {offsets = [0, 0], sizes = [4, 121], strides = [1, 1]} : vector<4x1024xf32> to vector<4x121xf32>
    %117 = tpu.concatenate %115, %116 in 1 : vector<4x903xf32>, vector<4x121xf32> -> vector<4x1024xf32>
    %118 = vector.extract_strided_slice %53 {offsets = [0, 122], sizes = [4, 902], strides = [1, 1]} : vector<4x1024xf32> to vector<4x902xf32>
    %119 = vector.extract_strided_slice %53 {offsets = [0, 0], sizes = [4, 122], strides = [1, 1]} : vector<4x1024xf32> to vector<4x122xf32>
    %120 = tpu.concatenate %118, %119 in 1 : vector<4x902xf32>, vector<4x122xf32> -> vector<4x1024xf32>
    %121 = tpu.concatenate %117, %120 in 0 : vector<4x1024xf32>, vector<4x1024xf32> -> vector<8x1024xf32>
    %c64 = arith.constant 64 : index
    %c0_19 = arith.constant 0 : index
    %122 = vector.load %arg8[%c64, %c0_19] : memref<108x1024xf32, #tpu.memory_space<vmem>>, vector<8x1024xf32>
    tpu.vector_store %arg8[%c64, %c0_19], %121 {strides = array<i32>} : memref<108x1024xf32, #tpu.memory_space<vmem>>, vector<8x1024xf32>,
    %123 = vector.extract_strided_slice %53 {offsets = [0, 200], sizes = [4, 824], strides = [1, 1]} : vector<4x1024xf32> to vector<4x824xf32>
    %124 = vector.extract_strided_slice %53 {offsets = [0, 0], sizes = [4, 200], strides = [1, 1]} : vector<4x1024xf32> to vector<4x200xf32>
    %125 = tpu.concatenate %123, %124 in 1 : vector<4x824xf32>, vector<4x200xf32> -> vector<4x1024xf32>
    %126 = vector.extract_strided_slice %53 {offsets = [0, 201], sizes = [4, 823], strides = [1, 1]} : vector<4x1024xf32> to vector<4x823xf32>
    %127 = vector.extract_strided_slice %53 {offsets = [0, 0], sizes = [4, 201], strides = [1, 1]} : vector<4x1024xf32> to vector<4x201xf32>
    %128 = tpu.concatenate %126, %127 in 1 : vector<4x823xf32>, vector<4x201xf32> -> vector<4x1024xf32>
    %129 = tpu.concatenate %125, %128 in 0 : vector<4x1024xf32>, vector<4x1024xf32> -> vector<8x1024xf32>
    %c72 = arith.constant 72 : index
    %c0_20 = arith.constant 0 : index
    %130 = vector.load %arg8[%c72, %c0_20] : memref<108x1024xf32, #tpu.memory_space<vmem>>, vector<8x1024xf32>
    tpu.vector_store %arg8[%c72, %c0_20], %129 {strides = array<i32>} : memref<108x1024xf32, #tpu.memory_space<vmem>>, vector<8x1024xf32>,
    %131 = vector.extract_strided_slice %53 {offsets = [0, 202], sizes = [4, 822], strides = [1, 1]} : vector<4x1024xf32> to vector<4x822xf32>
    %132 = vector.extract_strided_slice %53 {offsets = [0, 0], sizes = [4, 202], strides = [1, 1]} : vector<4x1024xf32> to vector<4x202xf32>
    %133 = tpu.concatenate %131, %132 in 1 : vector<4x822xf32>, vector<4x202xf32> -> vector<4x1024xf32>
    %134 = vector.extract_strided_slice %53 {offsets = [0, 210], sizes = [4, 814], strides = [1, 1]} : vector<4x1024xf32> to vector<4x814xf32>
    %135 = vector.extract_strided_slice %53 {offsets = [0, 0], sizes = [4, 210], strides = [1, 1]} : vector<4x1024xf32> to vector<4x210xf32>
    %136 = tpu.concatenate %134, %135 in 1 : vector<4x814xf32>, vector<4x210xf32> -> vector<4x1024xf32>
    %137 = tpu.concatenate %133, %136 in 0 : vector<4x1024xf32>, vector<4x1024xf32> -> vector<8x1024xf32>
    %c80 = arith.constant 80 : index
    %c0_21 = arith.constant 0 : index
    %138 = vector.load %arg8[%c80, %c0_21] : memref<108x1024xf32, #tpu.memory_space<vmem>>, vector<8x1024xf32>
    tpu.vector_store %arg8[%c80, %c0_21], %137 {strides = array<i32>} : memref<108x1024xf32, #tpu.memory_space<vmem>>, vector<8x1024xf32>,
    %139 = vector.extract_strided_slice %53 {offsets = [0, 211], sizes = [4, 813], strides = [1, 1]} : vector<4x1024xf32> to vector<4x813xf32>
    %140 = vector.extract_strided_slice %53 {offsets = [0, 0], sizes = [4, 211], strides = [1, 1]} : vector<4x1024xf32> to vector<4x211xf32>
    %141 = tpu.concatenate %139, %140 in 1 : vector<4x813xf32>, vector<4x211xf32> -> vector<4x1024xf32>
    %142 = vector.extract_strided_slice %53 {offsets = [0, 212], sizes = [4, 812], strides = [1, 1]} : vector<4x1024xf32> to vector<4x812xf32>
    %143 = vector.extract_strided_slice %53 {offsets = [0, 0], sizes = [4, 212], strides = [1, 1]} : vector<4x1024xf32> to vector<4x212xf32>
    %144 = tpu.concatenate %142, %143 in 1 : vector<4x812xf32>, vector<4x212xf32> -> vector<4x1024xf32>
    %145 = tpu.concatenate %141, %144 in 0 : vector<4x1024xf32>, vector<4x1024xf32> -> vector<8x1024xf32>
    %c88 = arith.constant 88 : index
    %c0_22 = arith.constant 0 : index
    %146 = vector.load %arg8[%c88, %c0_22] : memref<108x1024xf32, #tpu.memory_space<vmem>>, vector<8x1024xf32>
    tpu.vector_store %arg8[%c88, %c0_22], %145 {strides = array<i32>} : memref<108x1024xf32, #tpu.memory_space<vmem>>, vector<8x1024xf32>,
    %147 = vector.extract_strided_slice %53 {offsets = [0, 220], sizes = [4, 804], strides = [1, 1]} : vector<4x1024xf32> to vector<4x804xf32>
    %148 = vector.extract_strided_slice %53 {offsets = [0, 0], sizes = [4, 220], strides = [1, 1]} : vector<4x1024xf32> to vector<4x220xf32>
    %149 = tpu.concatenate %147, %148 in 1 : vector<4x804xf32>, vector<4x220xf32> -> vector<4x1024xf32>
    %150 = vector.extract_strided_slice %53 {offsets = [0, 221], sizes = [4, 803], strides = [1, 1]} : vector<4x1024xf32> to vector<4x803xf32>
    %151 = vector.extract_strided_slice %53 {offsets = [0, 0], sizes = [4, 221], strides = [1, 1]} : vector<4x1024xf32> to vector<4x221xf32>
    %152 = tpu.concatenate %150, %151 in 1 : vector<4x803xf32>, vector<4x221xf32> -> vector<4x1024xf32>
    %153 = tpu.concatenate %149, %152 in 0 : vector<4x1024xf32>, vector<4x1024xf32> -> vector<8x1024xf32>
    %c96 = arith.constant 96 : index
    %c0_23 = arith.constant 0 : index
    %154 = vector.load %arg8[%c96, %c0_23] : memref<108x1024xf32, #tpu.memory_space<vmem>>, vector<8x1024xf32>
    tpu.vector_store %arg8[%c96, %c0_23], %153 {strides = array<i32>} : memref<108x1024xf32, #tpu.memory_space<vmem>>, vector<8x1024xf32>,
    %155 = vector.extract_strided_slice %53 {offsets = [0, 222], sizes = [4, 802], strides = [1, 1]} : vector<4x1024xf32> to vector<4x802xf32>
    %156 = vector.extract_strided_slice %53 {offsets = [0, 0], sizes = [4, 222], strides = [1, 1]} : vector<4x1024xf32> to vector<4x222xf32>
    %157 = tpu.concatenate %155, %156 in 1 : vector<4x802xf32>, vector<4x222xf32> -> vector<4x1024xf32>
    %c104 = arith.constant 104 : index
    %c0_24 = arith.constant 0 : index
    %158 = vector.load %arg8[%c104, %c0_24] : memref<108x1024xf32, #tpu.memory_space<vmem>>, vector<4x1024xf32>
    tpu.vector_store %arg8[%c104, %c0_24], %157 {strides = array<i32>} : memref<108x1024xf32, #tpu.memory_space<vmem>>, vector<4x1024xf32>,
    %c0_25 = arith.constant 0 : index
    %c0_26 = arith.constant 0 : index
    %159 = vector.load %arg3[%c0_25, %c0_26] : memref<8x108xf32, #tpu.memory_space<vmem>>, vector<8x108xf32>
    %c0_27 = arith.constant 0 : index
    %c0_28 = arith.constant 0 : index
    %160 = vector.load %arg8[%c0_27, %c0_28] : memref<108x1024xf32, #tpu.memory_space<vmem>>, vector<108x1024xf32>
    %cst = arith.constant dense<0.000000e+00> : vector<8x1024xf32>
    %161 = tpu.matmul %159, %160, %cst {dimension_numbers = #tpu.dot_dimension_numbers<[1], [0], [0], [1], [0, 0, 1, 1], [], []>} : vector<8x108xf32>, vector<108x1024xf32>, vector<8x1024xf32> -> vector<8x1024xf32>
    %c0_29 = arith.constant 0 : index
    %c0_30 = arith.constant 0 : index
    %162 = vector.load %arg4[%c0_29, %c0_30] : memref<8x1xf32, #tpu.memory_space<vmem>>, vector<8x1xf32>
    %163 = vector.broadcast %162 : vector<8x1xf32> to vector<8x1024xf32>
    %164 = arith.addf %161, %163 : vector<8x1024xf32>
    %cst_31 = arith.constant 0.000000e+00 : f32
    %165 = vector.broadcast %cst_31 : f32 to vector<8x1024xf32>
    %166 = arith.cmpf ogt, %164, %165 : vector<8x1024xf32>
    %cst_32 = arith.constant 1.000000e-01 : f32
    %167 = vector.broadcast %cst_32 : f32 to vector<8x1024xf32>
    %168 = arith.mulf %167, %164 : vector<8x1024xf32>
    %169 = arith.select %166, %164, %168 : vector<8x1024xi1>, vector<8x1024xf32>
    %170 = vector.extract_strided_slice %169 {offsets = [0, 1023], sizes = [8, 1], strides = [1, 1]} : vector<8x1024xf32> to vector<8x1xf32>
    %171 = vector.extract_strided_slice %169 {offsets = [0, 0], sizes = [8, 1023], strides = [1, 1]} : vector<8x1024xf32> to vector<8x1023xf32>
    %172 = tpu.concatenate %170, %171 in 1 : vector<8x1xf32>, vector<8x1023xf32> -> vector<8x1024xf32>
    %173 = vector.extract_strided_slice %169 {offsets = [0, 1022], sizes = [8, 2], strides = [1, 1]} : vector<8x1024xf32> to vector<8x2xf32>
    %174 = vector.extract_strided_slice %169 {offsets = [0, 0], sizes = [8, 1022], strides = [1, 1]} : vector<8x1024xf32> to vector<8x1022xf32>
    %175 = tpu.concatenate %173, %174 in 1 : vector<8x2xf32>, vector<8x1022xf32> -> vector<8x1024xf32>
    %c0_i32_33 = arith.constant 0 : i32
    %176 = vector.broadcast %c0_i32_33 : i32 to vector<1x1024xi32>
    %177 = arith.cmpi eq, %0, %176 : vector<1x1024xi32>
    %178 = vector.shape_cast %177 : vector<1x1024xi1> to vector<1x1024xi1>
    %179 = vector.broadcast %178 : vector<1x1024xi1> to vector<8x1024xi1>
    %180 = arith.select %179, %169, %172 : vector<8x1024xi1>, vector<8x1024xf32>
    %c9_i32_34 = arith.constant 9 : i32
    %181 = vector.broadcast %c9_i32_34 : i32 to vector<1x1024xi32>
    %182 = arith.cmpi eq, %0, %181 : vector<1x1024xi32>
    %183 = vector.shape_cast %182 : vector<1x1024xi1> to vector<1x1024xi1>
    %184 = vector.broadcast %183 : vector<1x1024xi1> to vector<8x1024xi1>
    %185 = arith.select %184, %175, %180 : vector<8x1024xi1>, vector<8x1024xf32>
    %186 = vector.extract_strided_slice %185 {offsets = [0, 1014], sizes = [8, 10], strides = [1, 1]} : vector<8x1024xf32> to vector<8x10xf32>
    %187 = vector.extract_strided_slice %185 {offsets = [0, 0], sizes = [8, 1014], strides = [1, 1]} : vector<8x1024xf32> to vector<8x1014xf32>
    %188 = tpu.concatenate %186, %187 in 1 : vector<8x10xf32>, vector<8x1014xf32> -> vector<8x1024xf32>
    %189 = vector.extract_strided_slice %185 {offsets = [0, 1004], sizes = [8, 20], strides = [1, 1]} : vector<8x1024xf32> to vector<8x20xf32>
    %190 = vector.extract_strided_slice %185 {offsets = [0, 0], sizes = [8, 1004], strides = [1, 1]} : vector<8x1024xf32> to vector<8x1004xf32>
    %191 = tpu.concatenate %189, %190 in 1 : vector<8x20xf32>, vector<8x1004xf32> -> vector<8x1024xf32>
    %c0_i32_35 = arith.constant 0 : i32
    %192 = vector.broadcast %c0_i32_35 : i32 to vector<1x1024xi32>
    %193 = arith.cmpi eq, %1, %192 : vector<1x1024xi32>
    %194 = vector.shape_cast %193 : vector<1x1024xi1> to vector<1x1024xi1>
    %195 = vector.broadcast %194 : vector<1x1024xi1> to vector<8x1024xi1>
    %196 = arith.select %195, %185, %188 : vector<8x1024xi1>, vector<8x1024xf32>
    %c9_i32_36 = arith.constant 9 : i32
    %197 = vector.broadcast %c9_i32_36 : i32 to vector<1x1024xi32>
    %198 = arith.cmpi eq, %1, %197 : vector<1x1024xi32>
    %199 = vector.shape_cast %198 : vector<1x1024xi1> to vector<1x1024xi1>
    %200 = vector.broadcast %199 : vector<1x1024xi1> to vector<8x1024xi1>
    %201 = arith.select %200, %191, %196 : vector<8x1024xi1>, vector<8x1024xf32>
    %202 = vector.extract_strided_slice %201 {offsets = [0, 924], sizes = [8, 100], strides = [1, 1]} : vector<8x1024xf32> to vector<8x100xf32>
    %203 = vector.extract_strided_slice %201 {offsets = [0, 0], sizes = [8, 924], strides = [1, 1]} : vector<8x1024xf32> to vector<8x924xf32>
    %204 = tpu.concatenate %202, %203 in 1 : vector<8x100xf32>, vector<8x924xf32> -> vector<8x1024xf32>
    %205 = vector.extract_strided_slice %201 {offsets = [0, 824], sizes = [8, 200], strides = [1, 1]} : vector<8x1024xf32> to vector<8x200xf32>
    %206 = vector.extract_strided_slice %201 {offsets = [0, 0], sizes = [8, 824], strides = [1, 1]} : vector<8x1024xf32> to vector<8x824xf32>
    %207 = tpu.concatenate %205, %206 in 1 : vector<8x200xf32>, vector<8x824xf32> -> vector<8x1024xf32>
    %c0_i32_37 = arith.constant 0 : i32
    %208 = vector.broadcast %c0_i32_37 : i32 to vector<1x1024xi32>
    %209 = arith.cmpi eq, %2, %208 : vector<1x1024xi32>
    %210 = vector.shape_cast %209 : vector<1x1024xi1> to vector<1x1024xi1>
    %211 = vector.broadcast %210 : vector<1x1024xi1> to vector<8x1024xi1>
    %212 = arith.select %211, %201, %204 : vector<8x1024xi1>, vector<8x1024xf32>
    %c9_i32_38 = arith.constant 9 : i32
    %213 = vector.broadcast %c9_i32_38 : i32 to vector<1x1024xi32>
    %214 = arith.cmpi eq, %2, %213 : vector<1x1024xi32>
    %215 = vector.shape_cast %214 : vector<1x1024xi1> to vector<1x1024xi1>
    %216 = vector.broadcast %215 : vector<1x1024xi1> to vector<8x1024xi1>
    %217 = arith.select %216, %207, %212 : vector<8x1024xi1>, vector<8x1024xf32>
    %218 = vector.extract_strided_slice %217 {offsets = [0, 0], sizes = [8, 896], strides = [1, 1]} : vector<8x1024xf32> to vector<8x896xf32>
    %c0_39 = arith.constant 0 : index
    %c0_40 = arith.constant 0 : index
    %219 = vector.load %arg9[%c0_39, %c0_40] : memref<216x896xf32, #tpu.memory_space<vmem>>, vector<8x896xf32>
    tpu.vector_store %arg9[%c0_39, %c0_40], %218 {strides = array<i32>} : memref<216x896xf32, #tpu.memory_space<vmem>>, vector<8x896xf32>,
    %220 = vector.extract_strided_slice %217 {offsets = [0, 1], sizes = [8, 1023], strides = [1, 1]} : vector<8x1024xf32> to vector<8x1023xf32>
    %221 = vector.extract_strided_slice %217 {offsets = [0, 0], sizes = [8, 1], strides = [1, 1]} : vector<8x1024xf32> to vector<8x1xf32>
    %222 = tpu.concatenate %220, %221 in 1 : vector<8x1023xf32>, vector<8x1xf32> -> vector<8x1024xf32>
    %223 = vector.extract_strided_slice %222 {offsets = [0, 0], sizes = [8, 896], strides = [1, 1]} : vector<8x1024xf32> to vector<8x896xf32>
    %c8_41 = arith.constant 8 : index
    %c0_42 = arith.constant 0 : index
    %224 = vector.load %arg9[%c8_41, %c0_42] : memref<216x896xf32, #tpu.memory_space<vmem>>, vector<8x896xf32>
    tpu.vector_store %arg9[%c8_41, %c0_42], %223 {strides = array<i32>} : memref<216x896xf32, #tpu.memory_space<vmem>>, vector<8x896xf32>,
    %225 = vector.extract_strided_slice %217 {offsets = [0, 2], sizes = [8, 1022], strides = [1, 1]} : vector<8x1024xf32> to vector<8x1022xf32>
    %226 = vector.extract_strided_slice %217 {offsets = [0, 0], sizes = [8, 2], strides = [1, 1]} : vector<8x1024xf32> to vector<8x2xf32>
    %227 = tpu.concatenate %225, %226 in 1 : vector<8x1022xf32>, vector<8x2xf32> -> vector<8x1024xf32>
    %228 = vector.extract_strided_slice %227 {offsets = [0, 0], sizes = [8, 896], strides = [1, 1]} : vector<8x1024xf32> to vector<8x896xf32>
    %c16_43 = arith.constant 16 : index
    %c0_44 = arith.constant 0 : index
    %229 = vector.load %arg9[%c16_43, %c0_44] : memref<216x896xf32, #tpu.memory_space<vmem>>, vector<8x896xf32>
    tpu.vector_store %arg9[%c16_43, %c0_44], %228 {strides = array<i32>} : memref<216x896xf32, #tpu.memory_space<vmem>>, vector<8x896xf32>,
    %230 = vector.extract_strided_slice %217 {offsets = [0, 10], sizes = [8, 1014], strides = [1, 1]} : vector<8x1024xf32> to vector<8x1014xf32>
    %231 = vector.extract_strided_slice %217 {offsets = [0, 0], sizes = [8, 10], strides = [1, 1]} : vector<8x1024xf32> to vector<8x10xf32>
    %232 = tpu.concatenate %230, %231 in 1 : vector<8x1014xf32>, vector<8x10xf32> -> vector<8x1024xf32>
    %233 = vector.extract_strided_slice %232 {offsets = [0, 0], sizes = [8, 896], strides = [1, 1]} : vector<8x1024xf32> to vector<8x896xf32>
    %c24_45 = arith.constant 24 : index
    %c0_46 = arith.constant 0 : index
    %234 = vector.load %arg9[%c24_45, %c0_46] : memref<216x896xf32, #tpu.memory_space<vmem>>, vector<8x896xf32>
    tpu.vector_store %arg9[%c24_45, %c0_46], %233 {strides = array<i32>} : memref<216x896xf32, #tpu.memory_space<vmem>>, vector<8x896xf32>,
    %235 = vector.extract_strided_slice %217 {offsets = [0, 11], sizes = [8, 1013], strides = [1, 1]} : vector<8x1024xf32> to vector<8x1013xf32>
    %236 = vector.extract_strided_slice %217 {offsets = [0, 0], sizes = [8, 11], strides = [1, 1]} : vector<8x1024xf32> to vector<8x11xf32>
    %237 = tpu.concatenate %235, %236 in 1 : vector<8x1013xf32>, vector<8x11xf32> -> vector<8x1024xf32>
    %238 = vector.extract_strided_slice %237 {offsets = [0, 0], sizes = [8, 896], strides = [1, 1]} : vector<8x1024xf32> to vector<8x896xf32>
    %c32_47 = arith.constant 32 : index
    %c0_48 = arith.constant 0 : index
    %239 = vector.load %arg9[%c32_47, %c0_48] : memref<216x896xf32, #tpu.memory_space<vmem>>, vector<8x896xf32>
    tpu.vector_store %arg9[%c32_47, %c0_48], %238 {strides = array<i32>} : memref<216x896xf32, #tpu.memory_space<vmem>>, vector<8x896xf32>,
    %240 = vector.extract_strided_slice %217 {offsets = [0, 12], sizes = [8, 1012], strides = [1, 1]} : vector<8x1024xf32> to vector<8x1012xf32>
    %241 = vector.extract_strided_slice %217 {offsets = [0, 0], sizes = [8, 12], strides = [1, 1]} : vector<8x1024xf32> to vector<8x12xf32>
    %242 = tpu.concatenate %240, %241 in 1 : vector<8x1012xf32>, vector<8x12xf32> -> vector<8x1024xf32>
    %243 = vector.extract_strided_slice %242 {offsets = [0, 0], sizes = [8, 896], strides = [1, 1]} : vector<8x1024xf32> to vector<8x896xf32>
    %c40_49 = arith.constant 40 : index
    %c0_50 = arith.constant 0 : index
    %244 = vector.load %arg9[%c40_49, %c0_50] : memref<216x896xf32, #tpu.memory_space<vmem>>, vector<8x896xf32>
    tpu.vector_store %arg9[%c40_49, %c0_50], %243 {strides = array<i32>} : memref<216x896xf32, #tpu.memory_space<vmem>>, vector<8x896xf32>,
    %245 = vector.extract_strided_slice %217 {offsets = [0, 20], sizes = [8, 1004], strides = [1, 1]} : vector<8x1024xf32> to vector<8x1004xf32>
    %246 = vector.extract_strided_slice %217 {offsets = [0, 0], sizes = [8, 20], strides = [1, 1]} : vector<8x1024xf32> to vector<8x20xf32>
    %247 = tpu.concatenate %245, %246 in 1 : vector<8x1004xf32>, vector<8x20xf32> -> vector<8x1024xf32>
    %248 = vector.extract_strided_slice %247 {offsets = [0, 0], sizes = [8, 896], strides = [1, 1]} : vector<8x1024xf32> to vector<8x896xf32>
    %c48_51 = arith.constant 48 : index
    %c0_52 = arith.constant 0 : index
    %249 = vector.load %arg9[%c48_51, %c0_52] : memref<216x896xf32, #tpu.memory_space<vmem>>, vector<8x896xf32>
    tpu.vector_store %arg9[%c48_51, %c0_52], %248 {strides = array<i32>} : memref<216x896xf32, #tpu.memory_space<vmem>>, vector<8x896xf32>,
    %250 = vector.extract_strided_slice %217 {offsets = [0, 21], sizes = [8, 1003], strides = [1, 1]} : vector<8x1024xf32> to vector<8x1003xf32>
    %251 = vector.extract_strided_slice %217 {offsets = [0, 0], sizes = [8, 21], strides = [1, 1]} : vector<8x1024xf32> to vector<8x21xf32>
    %252 = tpu.concatenate %250, %251 in 1 : vector<8x1003xf32>, vector<8x21xf32> -> vector<8x1024xf32>
    %253 = vector.extract_strided_slice %252 {offsets = [0, 0], sizes = [8, 896], strides = [1, 1]} : vector<8x1024xf32> to vector<8x896xf32>
    %c56_53 = arith.constant 56 : index
    %c0_54 = arith.constant 0 : index
    %254 = vector.load %arg9[%c56_53, %c0_54] : memref<216x896xf32, #tpu.memory_space<vmem>>, vector<8x896xf32>
    tpu.vector_store %arg9[%c56_53, %c0_54], %253 {strides = array<i32>} : memref<216x896xf32, #tpu.memory_space<vmem>>, vector<8x896xf32>,
    %255 = vector.extract_strided_slice %217 {offsets = [0, 22], sizes = [8, 1002], strides = [1, 1]} : vector<8x1024xf32> to vector<8x1002xf32>
    %256 = vector.extract_strided_slice %217 {offsets = [0, 0], sizes = [8, 22], strides = [1, 1]} : vector<8x1024xf32> to vector<8x22xf32>
    %257 = tpu.concatenate %255, %256 in 1 : vector<8x1002xf32>, vector<8x22xf32> -> vector<8x1024xf32>
    %258 = vector.extract_strided_slice %257 {offsets = [0, 0], sizes = [8, 896], strides = [1, 1]} : vector<8x1024xf32> to vector<8x896xf32>
    %c64_55 = arith.constant 64 : index
    %c0_56 = arith.constant 0 : index
    %259 = vector.load %arg9[%c64_55, %c0_56] : memref<216x896xf32, #tpu.memory_space<vmem>>, vector<8x896xf32>
    tpu.vector_store %arg9[%c64_55, %c0_56], %258 {strides = array<i32>} : memref<216x896xf32, #tpu.memory_space<vmem>>, vector<8x896xf32>,
    %260 = vector.extract_strided_slice %217 {offsets = [0, 100], sizes = [8, 924], strides = [1, 1]} : vector<8x1024xf32> to vector<8x924xf32>
    %261 = vector.extract_strided_slice %217 {offsets = [0, 0], sizes = [8, 100], strides = [1, 1]} : vector<8x1024xf32> to vector<8x100xf32>
    %262 = tpu.concatenate %260, %261 in 1 : vector<8x924xf32>, vector<8x100xf32> -> vector<8x1024xf32>
    %263 = vector.extract_strided_slice %262 {offsets = [0, 0], sizes = [8, 896], strides = [1, 1]} : vector<8x1024xf32> to vector<8x896xf32>
    %c72_57 = arith.constant 72 : index
    %c0_58 = arith.constant 0 : index
    %264 = vector.load %arg9[%c72_57, %c0_58] : memref<216x896xf32, #tpu.memory_space<vmem>>, vector<8x896xf32>
    tpu.vector_store %arg9[%c72_57, %c0_58], %263 {strides = array<i32>} : memref<216x896xf32, #tpu.memory_space<vmem>>, vector<8x896xf32>,
    %265 = vector.extract_strided_slice %217 {offsets = [0, 101], sizes = [8, 923], strides = [1, 1]} : vector<8x1024xf32> to vector<8x923xf32>
    %266 = vector.extract_strided_slice %217 {offsets = [0, 0], sizes = [8, 101], strides = [1, 1]} : vector<8x1024xf32> to vector<8x101xf32>
    %267 = tpu.concatenate %265, %266 in 1 : vector<8x923xf32>, vector<8x101xf32> -> vector<8x1024xf32>
    %268 = vector.extract_strided_slice %267 {offsets = [0, 0], sizes = [8, 896], strides = [1, 1]} : vector<8x1024xf32> to vector<8x896xf32>
    %c80_59 = arith.constant 80 : index
    %c0_60 = arith.constant 0 : index
    %269 = vector.load %arg9[%c80_59, %c0_60] : memref<216x896xf32, #tpu.memory_space<vmem>>, vector<8x896xf32>
    tpu.vector_store %arg9[%c80_59, %c0_60], %268 {strides = array<i32>} : memref<216x896xf32, #tpu.memory_space<vmem>>, vector<8x896xf32>,
    %270 = vector.extract_strided_slice %217 {offsets = [0, 102], sizes = [8, 922], strides = [1, 1]} : vector<8x1024xf32> to vector<8x922xf32>
    %271 = vector.extract_strided_slice %217 {offsets = [0, 0], sizes = [8, 102], strides = [1, 1]} : vector<8x1024xf32> to vector<8x102xf32>
    %272 = tpu.concatenate %270, %271 in 1 : vector<8x922xf32>, vector<8x102xf32> -> vector<8x1024xf32>
    %273 = vector.extract_strided_slice %272 {offsets = [0, 0], sizes = [8, 896], strides = [1, 1]} : vector<8x1024xf32> to vector<8x896xf32>
    %c88_61 = arith.constant 88 : index
    %c0_62 = arith.constant 0 : index
    %274 = vector.load %arg9[%c88_61, %c0_62] : memref<216x896xf32, #tpu.memory_space<vmem>>, vector<8x896xf32>
    tpu.vector_store %arg9[%c88_61, %c0_62], %273 {strides = array<i32>} : memref<216x896xf32, #tpu.memory_space<vmem>>, vector<8x896xf32>,
    %275 = vector.extract_strided_slice %217 {offsets = [0, 110], sizes = [8, 914], strides = [1, 1]} : vector<8x1024xf32> to vector<8x914xf32>
    %276 = vector.extract_strided_slice %217 {offsets = [0, 0], sizes = [8, 110], strides = [1, 1]} : vector<8x1024xf32> to vector<8x110xf32>
    %277 = tpu.concatenate %275, %276 in 1 : vector<8x914xf32>, vector<8x110xf32> -> vector<8x1024xf32>
    %278 = vector.extract_strided_slice %277 {offsets = [0, 0], sizes = [8, 896], strides = [1, 1]} : vector<8x1024xf32> to vector<8x896xf32>
    %c96_63 = arith.constant 96 : index
    %c0_64 = arith.constant 0 : index
    %279 = vector.load %arg9[%c96_63, %c0_64] : memref<216x896xf32, #tpu.memory_space<vmem>>, vector<8x896xf32>
    tpu.vector_store %arg9[%c96_63, %c0_64], %278 {strides = array<i32>} : memref<216x896xf32, #tpu.memory_space<vmem>>, vector<8x896xf32>,
    %280 = vector.extract_strided_slice %217 {offsets = [0, 111], sizes = [8, 913], strides = [1, 1]} : vector<8x1024xf32> to vector<8x913xf32>
    %281 = vector.extract_strided_slice %217 {offsets = [0, 0], sizes = [8, 111], strides = [1, 1]} : vector<8x1024xf32> to vector<8x111xf32>
    %282 = tpu.concatenate %280, %281 in 1 : vector<8x913xf32>, vector<8x111xf32> -> vector<8x1024xf32>
    %283 = vector.extract_strided_slice %282 {offsets = [0, 0], sizes = [8, 896], strides = [1, 1]} : vector<8x1024xf32> to vector<8x896xf32>
    %c104_65 = arith.constant 104 : index
    %c0_66 = arith.constant 0 : index
    %284 = vector.load %arg9[%c104_65, %c0_66] : memref<216x896xf32, #tpu.memory_space<vmem>>, vector<8x896xf32>
    tpu.vector_store %arg9[%c104_65, %c0_66], %283 {strides = array<i32>} : memref<216x896xf32, #tpu.memory_space<vmem>>, vector<8x896xf32>,
    %285 = vector.extract_strided_slice %217 {offsets = [0, 112], sizes = [8, 912], strides = [1, 1]} : vector<8x1024xf32> to vector<8x912xf32>
    %286 = vector.extract_strided_slice %217 {offsets = [0, 0], sizes = [8, 112], strides = [1, 1]} : vector<8x1024xf32> to vector<8x112xf32>
    %287 = tpu.concatenate %285, %286 in 1 : vector<8x912xf32>, vector<8x112xf32> -> vector<8x1024xf32>
    %288 = vector.extract_strided_slice %287 {offsets = [0, 0], sizes = [8, 896], strides = [1, 1]} : vector<8x1024xf32> to vector<8x896xf32>
    %c112 = arith.constant 112 : index
    %c0_67 = arith.constant 0 : index
    %289 = vector.load %arg9[%c112, %c0_67] : memref<216x896xf32, #tpu.memory_space<vmem>>, vector<8x896xf32>
    tpu.vector_store %arg9[%c112, %c0_67], %288 {strides = array<i32>} : memref<216x896xf32, #tpu.memory_space<vmem>>, vector<8x896xf32>,
    %290 = vector.extract_strided_slice %217 {offsets = [0, 120], sizes = [8, 904], strides = [1, 1]} : vector<8x1024xf32> to vector<8x904xf32>
    %291 = vector.extract_strided_slice %217 {offsets = [0, 0], sizes = [8, 120], strides = [1, 1]} : vector<8x1024xf32> to vector<8x120xf32>
    %292 = tpu.concatenate %290, %291 in 1 : vector<8x904xf32>, vector<8x120xf32> -> vector<8x1024xf32>
    %293 = vector.extract_strided_slice %292 {offsets = [0, 0], sizes = [8, 896], strides = [1, 1]} : vector<8x1024xf32> to vector<8x896xf32>
    %c120 = arith.constant 120 : index
    %c0_68 = arith.constant 0 : index
    %294 = vector.load %arg9[%c120, %c0_68] : memref<216x896xf32, #tpu.memory_space<vmem>>, vector<8x896xf32>
    tpu.vector_store %arg9[%c120, %c0_68], %293 {strides = array<i32>} : memref<216x896xf32, #tpu.memory_space<vmem>>, vector<8x896xf32>,
    %295 = vector.extract_strided_slice %217 {offsets = [0, 121], sizes = [8, 903], strides = [1, 1]} : vector<8x1024xf32> to vector<8x903xf32>
    %296 = vector.extract_strided_slice %217 {offsets = [0, 0], sizes = [8, 121], strides = [1, 1]} : vector<8x1024xf32> to vector<8x121xf32>
    %297 = tpu.concatenate %295, %296 in 1 : vector<8x903xf32>, vector<8x121xf32> -> vector<8x1024xf32>
    %298 = vector.extract_strided_slice %297 {offsets = [0, 0], sizes = [8, 896], strides = [1, 1]} : vector<8x1024xf32> to vector<8x896xf32>
    %c128 = arith.constant 128 : index
    %c0_69 = arith.constant 0 : index
    %299 = vector.load %arg9[%c128, %c0_69] : memref<216x896xf32, #tpu.memory_space<vmem>>, vector<8x896xf32>
    tpu.vector_store %arg9[%c128, %c0_69], %298 {strides = array<i32>} : memref<216x896xf32, #tpu.memory_space<vmem>>, vector<8x896xf32>,
    %300 = vector.extract_strided_slice %217 {offsets = [0, 122], sizes = [8, 902], strides = [1, 1]} : vector<8x1024xf32> to vector<8x902xf32>
    %301 = vector.extract_strided_slice %217 {offsets = [0, 0], sizes = [8, 122], strides = [1, 1]} : vector<8x1024xf32> to vector<8x122xf32>
    %302 = tpu.concatenate %300, %301 in 1 : vector<8x902xf32>, vector<8x122xf32> -> vector<8x1024xf32>
    %303 = vector.extract_strided_slice %302 {offsets = [0, 0], sizes = [8, 896], strides = [1, 1]} : vector<8x1024xf32> to vector<8x896xf32>
    %c136 = arith.constant 136 : index
    %c0_70 = arith.constant 0 : index
    %304 = vector.load %arg9[%c136, %c0_70] : memref<216x896xf32, #tpu.memory_space<vmem>>, vector<8x896xf32>
    tpu.vector_store %arg9[%c136, %c0_70], %303 {strides = array<i32>} : memref<216x896xf32, #tpu.memory_space<vmem>>, vector<8x896xf32>,
    %305 = vector.extract_strided_slice %217 {offsets = [0, 200], sizes = [8, 824], strides = [1, 1]} : vector<8x1024xf32> to vector<8x824xf32>
    %306 = vector.extract_strided_slice %217 {offsets = [0, 0], sizes = [8, 200], strides = [1, 1]} : vector<8x1024xf32> to vector<8x200xf32>
    %307 = tpu.concatenate %305, %306 in 1 : vector<8x824xf32>, vector<8x200xf32> -> vector<8x1024xf32>
    %308 = vector.extract_strided_slice %307 {offsets = [0, 0], sizes = [8, 896], strides = [1, 1]} : vector<8x1024xf32> to vector<8x896xf32>
    %c144 = arith.constant 144 : index
    %c0_71 = arith.constant 0 : index
    %309 = vector.load %arg9[%c144, %c0_71] : memref<216x896xf32, #tpu.memory_space<vmem>>, vector<8x896xf32>
    tpu.vector_store %arg9[%c144, %c0_71], %308 {strides = array<i32>} : memref<216x896xf32, #tpu.memory_space<vmem>>, vector<8x896xf32>,
    %310 = vector.extract_strided_slice %217 {offsets = [0, 201], sizes = [8, 823], strides = [1, 1]} : vector<8x1024xf32> to vector<8x823xf32>
    %311 = vector.extract_strided_slice %217 {offsets = [0, 0], sizes = [8, 201], strides = [1, 1]} : vector<8x1024xf32> to vector<8x201xf32>
    %312 = tpu.concatenate %310, %311 in 1 : vector<8x823xf32>, vector<8x201xf32> -> vector<8x1024xf32>
    %313 = vector.extract_strided_slice %312 {offsets = [0, 0], sizes = [8, 896], strides = [1, 1]} : vector<8x1024xf32> to vector<8x896xf32>
    %c152 = arith.constant 152 : index
    %c0_72 = arith.constant 0 : index
    %314 = vector.load %arg9[%c152, %c0_72] : memref<216x896xf32, #tpu.memory_space<vmem>>, vector<8x896xf32>
    tpu.vector_store %arg9[%c152, %c0_72], %313 {strides = array<i32>} : memref<216x896xf32, #tpu.memory_space<vmem>>, vector<8x896xf32>,
    %315 = vector.extract_strided_slice %217 {offsets = [0, 202], sizes = [8, 822], strides = [1, 1]} : vector<8x1024xf32> to vector<8x822xf32>
    %316 = vector.extract_strided_slice %217 {offsets = [0, 0], sizes = [8, 202], strides = [1, 1]} : vector<8x1024xf32> to vector<8x202xf32>
    %317 = tpu.concatenate %315, %316 in 1 : vector<8x822xf32>, vector<8x202xf32> -> vector<8x1024xf32>
    %318 = vector.extract_strided_slice %317 {offsets = [0, 0], sizes = [8, 896], strides = [1, 1]} : vector<8x1024xf32> to vector<8x896xf32>
    %c160 = arith.constant 160 : index
    %c0_73 = arith.constant 0 : index
    %319 = vector.load %arg9[%c160, %c0_73] : memref<216x896xf32, #tpu.memory_space<vmem>>, vector<8x896xf32>
    tpu.vector_store %arg9[%c160, %c0_73], %318 {strides = array<i32>} : memref<216x896xf32, #tpu.memory_space<vmem>>, vector<8x896xf32>,
    %320 = vector.extract_strided_slice %217 {offsets = [0, 210], sizes = [8, 814], strides = [1, 1]} : vector<8x1024xf32> to vector<8x814xf32>
    %321 = vector.extract_strided_slice %217 {offsets = [0, 0], sizes = [8, 210], strides = [1, 1]} : vector<8x1024xf32> to vector<8x210xf32>
    %322 = tpu.concatenate %320, %321 in 1 : vector<8x814xf32>, vector<8x210xf32> -> vector<8x1024xf32>
    %323 = vector.extract_strided_slice %322 {offsets = [0, 0], sizes = [8, 896], strides = [1, 1]} : vector<8x1024xf32> to vector<8x896xf32>
    %c168 = arith.constant 168 : index
    %c0_74 = arith.constant 0 : index
    %324 = vector.load %arg9[%c168, %c0_74] : memref<216x896xf32, #tpu.memory_space<vmem>>, vector<8x896xf32>
    tpu.vector_store %arg9[%c168, %c0_74], %323 {strides = array<i32>} : memref<216x896xf32, #tpu.memory_space<vmem>>, vector<8x896xf32>,
    %325 = vector.extract_strided_slice %217 {offsets = [0, 211], sizes = [8, 813], strides = [1, 1]} : vector<8x1024xf32> to vector<8x813xf32>
    %326 = vector.extract_strided_slice %217 {offsets = [0, 0], sizes = [8, 211], strides = [1, 1]} : vector<8x1024xf32> to vector<8x211xf32>
    %327 = tpu.concatenate %325, %326 in 1 : vector<8x813xf32>, vector<8x211xf32> -> vector<8x1024xf32>
    %328 = vector.extract_strided_slice %327 {offsets = [0, 0], sizes = [8, 896], strides = [1, 1]} : vector<8x1024xf32> to vector<8x896xf32>
    %c176 = arith.constant 176 : index
    %c0_75 = arith.constant 0 : index
    %329 = vector.load %arg9[%c176, %c0_75] : memref<216x896xf32, #tpu.memory_space<vmem>>, vector<8x896xf32>
    tpu.vector_store %arg9[%c176, %c0_75], %328 {strides = array<i32>} : memref<216x896xf32, #tpu.memory_space<vmem>>, vector<8x896xf32>,
    %330 = vector.extract_strided_slice %217 {offsets = [0, 212], sizes = [8, 812], strides = [1, 1]} : vector<8x1024xf32> to vector<8x812xf32>
    %331 = vector.extract_strided_slice %217 {offsets = [0, 0], sizes = [8, 212], strides = [1, 1]} : vector<8x1024xf32> to vector<8x212xf32>
    %332 = tpu.concatenate %330, %331 in 1 : vector<8x812xf32>, vector<8x212xf32> -> vector<8x1024xf32>
    %333 = vector.extract_strided_slice %332 {offsets = [0, 0], sizes = [8, 896], strides = [1, 1]} : vector<8x1024xf32> to vector<8x896xf32>
    %c184 = arith.constant 184 : index
    %c0_76 = arith.constant 0 : index
    %334 = vector.load %arg9[%c184, %c0_76] : memref<216x896xf32, #tpu.memory_space<vmem>>, vector<8x896xf32>
    tpu.vector_store %arg9[%c184, %c0_76], %333 {strides = array<i32>} : memref<216x896xf32, #tpu.memory_space<vmem>>, vector<8x896xf32>,
    %335 = vector.extract_strided_slice %217 {offsets = [0, 220], sizes = [8, 804], strides = [1, 1]} : vector<8x1024xf32> to vector<8x804xf32>
    %336 = vector.extract_strided_slice %217 {offsets = [0, 0], sizes = [8, 220], strides = [1, 1]} : vector<8x1024xf32> to vector<8x220xf32>
    %337 = tpu.concatenate %335, %336 in 1 : vector<8x804xf32>, vector<8x220xf32> -> vector<8x1024xf32>
    %338 = vector.extract_strided_slice %337 {offsets = [0, 0], sizes = [8, 896], strides = [1, 1]} : vector<8x1024xf32> to vector<8x896xf32>
    %c192 = arith.constant 192 : index
    %c0_77 = arith.constant 0 : index
    %339 = vector.load %arg9[%c192, %c0_77] : memref<216x896xf32, #tpu.memory_space<vmem>>, vector<8x896xf32>
    tpu.vector_store %arg9[%c192, %c0_77], %338 {strides = array<i32>} : memref<216x896xf32, #tpu.memory_space<vmem>>, vector<8x896xf32>,
    %340 = vector.extract_strided_slice %217 {offsets = [0, 221], sizes = [8, 803], strides = [1, 1]} : vector<8x1024xf32> to vector<8x803xf32>
    %341 = vector.extract_strided_slice %217 {offsets = [0, 0], sizes = [8, 221], strides = [1, 1]} : vector<8x1024xf32> to vector<8x221xf32>
    %342 = tpu.concatenate %340, %341 in 1 : vector<8x803xf32>, vector<8x221xf32> -> vector<8x1024xf32>
    %343 = vector.extract_strided_slice %342 {offsets = [0, 0], sizes = [8, 896], strides = [1, 1]} : vector<8x1024xf32> to vector<8x896xf32>
    %c200 = arith.constant 200 : index
    %c0_78 = arith.constant 0 : index
    %344 = vector.load %arg9[%c200, %c0_78] : memref<216x896xf32, #tpu.memory_space<vmem>>, vector<8x896xf32>
    tpu.vector_store %arg9[%c200, %c0_78], %343 {strides = array<i32>} : memref<216x896xf32, #tpu.memory_space<vmem>>, vector<8x896xf32>,
    %345 = vector.extract_strided_slice %217 {offsets = [0, 222], sizes = [8, 802], strides = [1, 1]} : vector<8x1024xf32> to vector<8x802xf32>
    %346 = vector.extract_strided_slice %217 {offsets = [0, 0], sizes = [8, 222], strides = [1, 1]} : vector<8x1024xf32> to vector<8x222xf32>
    %347 = tpu.concatenate %345, %346 in 1 : vector<8x802xf32>, vector<8x222xf32> -> vector<8x1024xf32>
    %348 = vector.extract_strided_slice %347 {offsets = [0, 0], sizes = [8, 896], strides = [1, 1]} : vector<8x1024xf32> to vector<8x896xf32>
    %c208 = arith.constant 208 : index
    %c0_79 = arith.constant 0 : index
    %349 = vector.load %arg9[%c208, %c0_79] : memref<216x896xf32, #tpu.memory_space<vmem>>, vector<8x896xf32>
    tpu.vector_store %arg9[%c208, %c0_79], %348 {strides = array<i32>} : memref<216x896xf32, #tpu.memory_space<vmem>>, vector<8x896xf32>,
    %c0_80 = arith.constant 0 : index
    %c0_81 = arith.constant 0 : index
    %350 = vector.load %arg5[%c0_80, %c0_81] : memref<8x216xf32, #tpu.memory_space<vmem>>, vector<8x216xf32>
    %c0_82 = arith.constant 0 : index
    %c0_83 = arith.constant 0 : index
    %351 = vector.load %arg9[%c0_82, %c0_83] : memref<216x896xf32, #tpu.memory_space<vmem>>, vector<216x896xf32>
    %cst_84 = arith.constant dense<0.000000e+00> : vector<8x896xf32>
    %352 = tpu.matmul %350, %351, %cst_84 {dimension_numbers = #tpu.dot_dimension_numbers<[1], [0], [0], [1], [0, 0, 1, 1], [], []>} : vector<8x216xf32>, vector<216x896xf32>, vector<8x896xf32> -> vector<8x896xf32>
    %c0_85 = arith.constant 0 : index
    %c0_86 = arith.constant 0 : index
    %353 = vector.load %arg6[%c0_85, %c0_86] : memref<8x1xf32, #tpu.memory_space<vmem>>, vector<8x1xf32>
    %354 = vector.broadcast %353 : vector<8x1xf32> to vector<8x896xf32>
    %355 = arith.addf %352, %354 : vector<8x896xf32>
    %cst_87 = arith.constant 0.000000e+00 : f32
    %356 = vector.broadcast %cst_87 : f32 to vector<8x896xf32>
    %357 = arith.cmpf ogt, %355, %356 : vector<8x896xf32>
    %cst_88 = arith.constant 1.000000e-01 : f32
    %358 = vector.broadcast %cst_88 : f32 to vector<8x896xf32>
    %359 = arith.mulf %358, %355 : vector<8x896xf32>
    %360 = arith.select %357, %355, %359 : vector<8x896xi1>, vector<8x896xf32>
    %c0_89 = arith.constant 0 : index
    %c0_90 = arith.constant 0 : index
    %c0_91 = arith.constant 0 : index
    %361 = vector.load %arg7[%c0_89, %c0_90, %c0_91] : memref<1x8x896xf32, #tpu.memory_space<vmem>>, vector<1x8x896xf32>
    %362 = vector.shape_cast %361 : vector<1x8x896xf32> to vector<8x896xf32>
    %363 = vector.shape_cast %360 : vector<8x896xf32> to vector<1x8x896xf32>
    tpu.vector_store %arg7[%c0_89, %c0_90, %c0_91], %363 {strides = array<i32>} : memref<1x8x896xf32, #tpu.memory_space<vmem>>, vector<1x8x896xf32>,
    return
  }
  func.func @transform_0(%arg0: i32) -> (i32, i32, i32) {
    %c0_i32 = arith.constant 0 : i32
    %c0_i32_0 = arith.constant 0 : i32
    %c0_i32_1 = arith.constant 0 : i32
    return %arg0, %c0_i32, %c0_i32_0 : i32, i32, i32
  }
  func.func @transform_1(%arg0: i32) -> (i32, i32) {
    %c0_i32 = arith.constant 0 : i32
    %c0_i32_0 = arith.constant 0 : i32
    %c0_i32_1 = arith.constant 0 : i32
    return %c0_i32, %c0_i32_0 : i32, i32
  }
  func.func @transform_2(%arg0: i32) -> (i32, i32) {
    %c0_i32 = arith.constant 0 : i32
    %c0_i32_0 = arith.constant 0 : i32
    %c0_i32_1 = arith.constant 0 : i32
    return %c0_i32, %c0_i32_0 : i32, i32
  }
  func.func @transform_3(%arg0: i32) -> (i32, i32) {
    %c0_i32 = arith.constant 0 : i32
    %c0_i32_0 = arith.constant 0 : i32
    %c0_i32_1 = arith.constant 0 : i32
    return %c0_i32, %c0_i32_0 : i32, i32
  }
  func.func @transform_4(%arg0: i32) -> (i32, i32) {
    %c0_i32 = arith.constant 0 : i32
    %c0_i32_0 = arith.constant 0 : i32
    %c0_i32_1 = arith.constant 0 : i32
    return %c0_i32, %c0_i32_0 : i32, i32
  }
  func.func @transform_5(%arg0: i32) -> (i32, i32) {
    %c0_i32 = arith.constant 0 : i32
    %c0_i32_0 = arith.constant 0 : i32
    %c0_i32_1 = arith.constant 0 : i32
    return %c0_i32, %c0_i32_0 : i32, i32
  }
  func.func @transform_6(%arg0: i32) -> (i32, i32, i32) {
    %c0_i32 = arith.constant 0 : i32
    %c0_i32_0 = arith.constant 0 : i32
    %c0_i32_1 = arith.constant 0 : i32
    return %arg0, %c0_i32, %c0_i32_0 : i32, i32, i32
  }
}

</mosaic_0001>

<bundles_post_ra>
// kernel: inconv3d_forward.1
= control target key start
LH: loop header
LB: loop body
LE: loop exit
PB: predicated region body
PF: predicated region fallthrough
CT: control target
= control target key end

     0   :  { %s5221_s21 = smov 0   ;;  %s7967_s0 = inlined_call_operand.vmem [shape: f32[2,4,1100], index: 0, kind: input, shape index: {}]   ;;  %s7968_s1 = inlined_call_operand.vmem [shape: s32[3,1024], index: 1, kind: input, shape index: {}]   ;;  %s7969_s2 = inlined_call_operand.vmem [shape: f32[8,108], index: 2, kind: input, shape index: {}]   ;;  %s7970_s3 = inlined_call_operand.vmem [shape: f32[8,1], index: 3, kind: input, shape index: {}]   ;;  %s7971_s4 = inlined_call_operand.vmem [shape: f32[8,216], index: 4, kind: input, shape index: {}]   ;;  %s7972_s5 = inlined_call_operand.vmem [shape: f32[8,1], index: 5, kind: input, shape index: {}]   ;;  %s7973_s6 = inlined_call_operand.vmem [shape: f32[2,8,896], index: 6, kind: output, shape index: {}]  }
   0x1 LB: > { %s4309_s22 = sadd.s32 4294967295, %s5148_s21   ;;  %p4313_p0 = scmp.ge.s32.totalorder %s5148_s21, 1  ;;  %s5148_s21 = sphi %s5221_s21, %s16_s21  }
   0x2   : > { %p212_p1 = scmp.lt.s32.totalorder %s5148_s21, 3 }
   0x4   : > { %p213_p2 = pnand %p4313_p0, %p212_p1 }
   0x6   : > { %216 = sbr.rel (%p213_p2) target bundleno = 2152 (0x868), region = 44 }
   0xd   : > { %p242_p3 = scmp.lt.s32.totalorder %s4309_s22, 1  ;;  %v5150_v0 = vmov 0   ;;  %s8059_s27 = smov 1   ;;  %v339_v9 = vlaneseq  ;;  %v252_v12 = vld [vmem:[%s7968_s1] ss:$4 sm:$0xff]  ;;  %vm7975_vm2 = vcmask 7168  }
   0xe   : > { %4697 = vset.pattern.permute.xlu0 %v5150_v0  ;;  %s8057_s28 = smov 2   ;;  %vm337_vm0 = vcmp.eq.s32.totalorder %v252_v12, 0  ;;  %vm391_vm1 = vcmp.eq.s32.totalorder %v252_v12, 9  ;;  %v8165_v33 = vmov 0  ;;  %vm7976_vm4 = vcmask 15360   ;;  %s8054_s7 = smov 10  }
   0xf   : > { %s8895_s22 = smov (!%p242_p3, %s4309_s22), 1  ;;  %v5295_v13 = vshrl.u32 %v339_v9, 7  ;;  %v5308_v20 = vsel %vm337_vm0, 1, %v5150_v0  ;;  %v5311_v21 = vsel %vm391_vm1, 1, %v5150_v0  ;;  %v8168_v36 = vmov 0  ;;  %s8052_s8 = smov 20  }
  0x10   : > { %s4651_s23 = smul.u32 36, %s8895_s22  ;;  %v8171_v37 = vmov 0  ;;  %v8174_v38 = vmov 0  ;;  %v8177_v43 = vmov 0  ;;  %v8180_v44 = vmov 0  ;;  %s8039_s11 = smov 100  }
  0x11   : > { %v5300_v16 = vsub.s32 2, %v5295_v13  ;;  %v5303_v17 = vsub.s32 1, %v5295_v13  ;;  %v5314_v22 = vsub.s32 4, %v5295_v13  ;;  %v5317_v23 = vsub.s32 3, %v5295_v13  ;;  %s8037_s12 = smov 72   ;;  %s8031_s15 = smov 127  }
  0x12   : > { %s246_s26 = scalar_lea.vmem %s7967_s0, %s4651_s23  ;;  %v5334_v32 = vsub.s32 0, %v5295_v13  ;;  %v5369_v46 = vsub.s32 7, %v5295_v13  ;;  %v8183_v55 = vmov 0  ;;  %v8186_v56 = vmov 0  ;;  %s5158_s16 = smov 126  }
  0x13   : > { %v5236_v1 = vld [vmem:[%s246_s26 + $0x8] sm:$0xff]  ;;  %v5238_v2 = vld [vmem:[%s246_s26] sm:$0xff]  ;;  %v5248_v4 = vld [vmem:[%s246_s26 + $0x10] sm:$0xff]  ;;  %v350_v24 = vrot.slane %v5308_v20, %v5300_v16  ;;  %v346_v25 = vrot.slane %v5308_v20, %v5303_v17  ;;  %v404_v26 = vrot.slane %v5311_v21, %v5300_v16  ;;  %v400_v27 = vrot.slane %v5311_v21, %v5303_v17  ;;  %s5159_s17 = smov 118   ;;  %s5160_s18 = smov 116  }
  0x14   : > { %276 = vrot.lane.b32.xlu1 %v5236_v1, %s8059_s27  ;;  %272 = vrot.lane.b32.xlu0 %v5238_v2, %s8059_s27  ;;  %v5246_v3 = vcombine.high %v5236_v1, %v5236_v1  ;;  %v5250_v5 = vld [vmem:[%s246_s26 + $0x18] sm:$0xff]  ;;  %v5262_v7 = vcombine.high %v5238_v2, %v5238_v2  ;;  %v5282_v8 = vcombine.high %v5248_v4, %v5248_v4  ;;  %v8189_v12 = vmov 0  ;;  %s5161_s19 = smov 107   ;;  %s5162_s20 = smov 117  }
  0x15   : > { %v5258_v6 = vcombine.high %v5250_v5, %v5250_v5  ;;  %v358_v30 = vrot.slane %v5308_v20, %v5314_v22  ;;  %v354_v31 = vrot.slane %v5308_v20, %v5317_v23  ;;  %vm5336_vm3 = vcmp.eq.s32.totalorder %v350_v24, 1  ;;  %s5163_s23 = smov 108   ;;  %s5164_s24 = smov 28  }
  0x16   : > { %v8166_v33 = vsel %vm5336_vm3, 4294967295, %v8165_v33  ;;  %vm5342_vm5 = vcmp.eq.s32.totalorder %v346_v25, 1  ;;  %vm5346_vm6 = vcmp.eq.s32.totalorder %v404_v26, 1  ;;  %vm5350_vm7 = vcmp.eq.s32.totalorder %v400_v27, 1  ;;  %s5165_s25 = smov 26   ;;  %s5166_s26 = smov 106  }
  0x17   : > { %8167 = vst [vmem:[#allocation4_spill] sm:$0xff] %v8166_v33  ;;  %v8169_v36 = vsel %vm5342_vm5, 4294967295, %v8168_v36  ;;  %v8172_v37 = vsel %vm5346_vm6, 4294967295, %v8171_v37  ;;  %v8175_v38 = vsel %vm5350_vm7, 4294967295, %v8174_v38  ;;  %v412_v39 = vrot.slane %v5311_v21, %v5314_v22  ;;  %s8145_s29 = smov 27   ;;  %s8130_s30 = smov 17  }
  0x18   : > { %278 = vrot.lane.b32.xlu1 %v5246_v3, %s8059_s27  ;;  %280 = vrot.lane.b32.xlu0 %v5248_v4, %s8059_s27  ;;  %8170 = vst [vmem:[#allocation5_spill] sm:$0xff] %v8169_v36  ;;  %8173 = vst [vmem:[#allocation6_spill] sm:$0xff] %v8172_v37  ;;  %v408_v40 = vrot.slane %v5311_v21, %v5317_v23  ;;  %vm5358_vm8 = vcmp.eq.s32.totalorder %v358_v30, 1  ;;  %vm5362_vm9 = vcmp.eq.s32.totalorder %v354_v31, 1  ;;  %v8195_v27 = vmov 0  ;;  %s5169_s9 = smov 8  }
  0x19   : > { %8176 = vst [vmem:[#allocation7_spill] sm:$0xff] %v8175_v38  ;;  %v8178_v43 = vsel %vm5358_vm8, 4294967295, %v8177_v43  ;;  %v8181_v44 = vsel %vm5362_vm9, 4294967295, %v8180_v44  ;;  %v342_v45 = vrot.slane %v5308_v20, %v5334_v32  ;;  %vm5394_vm10 = vcmp.eq.s32.totalorder %v412_v39, 1  ;;  %s8132_s10 = smov 18   ;;  %s8141_s13 = smov 16  }
  0x1a   : > { %8179 = vst [vmem:[#allocation8_spill] sm:$0xff] %v8178_v43  ;;  %8182 = vst [vmem:[#allocation9_spill] sm:$0xff] %v8181_v44  ;;  %v8184_v55 = vsel %vm5394_vm10, 4294967295, %v8183_v55  ;;  %vm5398_vm11 = vcmp.eq.s32.totalorder %v408_v40, 1  ;;  %v396_v57 = vrot.slane %v5311_v21, %v5334_v32  ;;  %v370_v60 = vrot.slane %v5308_v20, %v5369_v46  ;;  %s8143_s14 = smov 6  }
  0x1b   : > { %8185 = vst [vmem:[#allocation10_spill] sm:$0xff] %v8184_v55  ;;  %v8187_v56 = vsel %vm5398_vm11, 4294967295, %v8186_v56  ;;  %vm5424_vm12 = vcmp.eq.s32.totalorder %v342_v45, 1 }
  0x1c   : > { %263 = vrot.lane.b32.xlu1 %v5258_v6, %s8059_s27  ;;  %274 = vrot.lane.b32.xlu0 %v5262_v7, %s8059_s27  ;;  %8188 = vst [vmem:[#allocation11_spill] sm:$0xff] %v8187_v56  ;;  %v8190_v12 = vsel %vm5424_vm12, 4294967295, %v8189_v12  ;;  %vm5432_vm13 = vcmp.eq.s32.totalorder %v396_v57, 1  ;;  %vm5449_vm14 = vcmp.eq.s32.totalorder %v370_v60, 1 }
  0x1d   : > { %8191 = vst [vmem:[#allocation12_spill] sm:$0xff] %v8190_v12  ;;  %v8196_v27 = vsel %vm5449_vm14, 4294967295, %v8195_v27 }
  0x1e   : > { %8197 = vst [vmem:[#allocation14_spill] sm:$0xff] %v8196_v27 }
  0x20   : > { %306 = vrot.lane.b32.xlu1 %v5238_v2, %s8057_s28  ;;  %284 = vrot.lane.b32.xlu0 %v5250_v5, %s8059_s27 }
  0x24   : > { %310 = vrot.lane.b32.xlu1 %v5236_v1, %s8057_s28  ;;  %308 = vrot.lane.b32.xlu0 %v5262_v7, %s8057_s28 }
  0x28   : > { %314 = vrot.lane.b32.xlu1 %v5248_v4, %s8057_s28  ;;  %312 = vrot.lane.b32.xlu0 %v5246_v3, %s8057_s28 }
  0x2c   : > { %303 = vrot.lane.b32.xlu1 %v5258_v6, %s8057_s28  ;;  %282 = vrot.lane.b32.xlu0 %v5282_v8, %s8059_s27  ;;  %s8074_s27 = smov 45  }
  0x30   : > { %316 = vrot.lane.b32.xlu1 %v5282_v8, %s8057_s28  ;;  %318 = vrot.lane.b32.xlu0 %v5250_v5, %s8057_s28  ;;  %s8077_s28 = smov 54  }
  0x86   : > { %v277_v10 = vpop.permute.xlu1 %276  ;;  %v273_v11 = vpop.permute.xlu0 %272 }
  0x8a   : > { %v279_v14 = vpop.permute.xlu1 %278  ;;  %v5297_v15 = vpop.permute.xlu0 %280 }
  0x8b   : > { %v289_v51 = vsel %vm7975_vm2, %v277_v10, %v279_v14  ;;  %v290_v52 = vsel %vm7975_vm2, %v279_v14, %v5297_v15 }
  0x8c   : > { %v387_v63 = vsel %vm5358_vm8, %v5248_v4, %v290_v52  ;;  %v424_v4 = vrot.slane %v5311_v21, %v5369_v46 }
  0x8e   : > { %v5305_v18 = vpop.permute.xlu1 %263  ;;  %v275_v19 = vpop.permute.xlu0 %274  ;;  %vm5455_vm15 = vcmp.eq.s32.totalorder %v424_v4, 1 }
  0x8f   : > { %v287_v34 = vsel %vm7975_vm2, %v273_v11, %v275_v19  ;;  %v288_v35 = vsel %vm7975_vm2, %v275_v19, %v277_v10 }
  0x90   : > { %v385_v49 = vsel %vm5336_vm3, %v5236_v1, %v288_v35  ;;  %v384_v50 = vsel %vm5342_vm5, %v5262_v7, %v287_v34  ;;  %v386_v1 = vsel %vm5362_vm9, %v5246_v3, %v289_v51  ;;  %v302_v7 = vsel %vm7975_vm2, %v5305_v18, %v273_v11 }
  0x91   : > { %v8192_v3 = vmov 0  ;;  %v383_v24 = vsel %vm5424_vm12, %v5238_v2, %v302_v7  ;;  %v5468_v34 = vsub.s32 5, %v5295_v13  ;;  %v5471_v35 = vsub.s32 6, %v5295_v13 }
  0x92   : > { %v307_v28 = vpop.permute.xlu1 %306  ;;  %v5327_v29 = vpop.permute.xlu0 %284  ;;  %v8193_v3 = vsel %vm5432_vm13, 4294967295, %v8192_v3 }
  0x93   : > { %8194 = vst [vmem:[#allocation13_spill] sm:$0xff] %v8193_v3  ;;  %v293_v25 = vsel %vm7975_vm2, %v5327_v29, %v5305_v18  ;;  %v366_v39 = vrot.slane %v5308_v20, %v5471_v35  ;;  %v416_v13 = vrot.slane %v5311_v21, %v5468_v34  ;;  %v420_v40 = vrot.slane %v5311_v21, %v5471_v35 }
  0x94   : > { %v390_v18 = vsel %vm5449_vm14, %v5258_v6, %v293_v25  ;;  %v362_v6 = vrot.slane %v5308_v20, %v5468_v34  ;;  %v8201_v20 = vmov 0  ;;  %v8210_v21 = vmov 0 }
  0x95   : > { %vm5497_vm1 = vcmp.eq.s32.totalorder %v366_v39, 1  ;;  %v8216_v25 = vmov 0 }
  0x96   : > { %v311_v41 = vpop.permute.xlu1 %310  ;;  %v309_v42 = vpop.permute.xlu0 %308  ;;  %vm5493_vm0 = vcmp.eq.s32.totalorder %v362_v6, 1 }
  0x97   : > { %v321_v47 = vsel %vm7976_vm4, %v307_v28, %v309_v42  ;;  %v322_v48 = vsel %vm7976_vm4, %v309_v42, %v311_v41  ;;  %v8202_v20 = vsel %vm5493_vm0, 4294967295, %v8201_v20 }
  0x98   : > { %v5384_v53 = vsel %vm5346_vm6, %v322_v48, %v385_v49  ;;  %v5388_v54 = vsel %vm5350_vm7, %v321_v47, %v384_v50  ;;  %8203 = vst [vmem:[#allocation16_spill] sm:$0xff] %v8202_v20  ;;  %v8204_v47 = vmov 0 }
  0x99   : > { %456 = vrot.lane.b32.xlu1 %v5384_v53, %s8054_s7  ;;  %454 = vrot.lane.b32.xlu0 %v5388_v54, %s8054_s7  ;;  %v8205_v47 = vsel %vm5497_vm1, 4294967295, %v8204_v47 }
  0x9a   : > { %v315_v58 = vpop.permute.xlu1 %314  ;;  %v313_v59 = vpop.permute.xlu0 %312  ;;  %8206 = vst [vmem:[#allocation17_spill] sm:$0xff] %v8205_v47 }
  0x9b   : > { %v323_v61 = vsel %vm7976_vm4, %v311_v41, %v313_v59  ;;  %v324_v62 = vsel %vm7976_vm4, %v313_v59, %v315_v58 }
  0x9c   : > { %v5418_v9 = vsel %vm5394_vm10, %v324_v62, %v387_v63  ;;  %v5422_v10 = vsel %vm5398_vm11, %v323_v61, %v386_v1 }
  0x9d   : > { %460 = vrot.lane.b32.xlu1 %v5418_v9, %s8054_s7  ;;  %458 = vrot.lane.b32.xlu0 %v5422_v10, %s8054_s7 }
  0x9e   : > { %v304_v11 = vpop.permute.xlu1 %303  ;;  %v283_v14 = vpop.permute.xlu0 %282 }
  0x9f   : > { %v336_v19 = vsel %vm7976_vm4, %v304_v11, %v307_v28  ;;  %v8198_v28 = vmov 0  ;;  %v291_v42 = vsel %vm7975_vm2, %v5297_v15, %v283_v14  ;;  %v292_v45 = vsel %vm7975_vm2, %v283_v14, %v5327_v29 }
  0xa0   : > { %v5447_v26 = vsel %vm5432_vm13, %v336_v19, %v383_v24  ;;  %v8199_v28 = vsel %vm5455_vm15, 4294967295, %v8198_v28  ;;  %vm5507_vm13 = vcmp.eq.s32.totalorder %v416_v13, 1  ;;  %v8207_v15 = vmov 0 }
  0xa1   : > { %452 = vrot.lane.b32.xlu1 %v5447_v26, %s8054_s7  ;;  %8200 = vst [vmem:[#allocation15_spill] sm:$0xff] %v8199_v28  ;;  %v8208_v15 = vsel %vm5507_vm13, 4294967295, %v8207_v15  ;;  %vm5511_vm2 = vcmp.eq.s32.totalorder %v420_v40, 1  ;;  %v388_v29 = vsel %vm5493_vm0, %v5282_v8, %v291_v42  ;;  %v389_v50 = vsel %vm5497_vm1, %v5250_v5, %v292_v45  ;;  %v4316_v8 = vld [vmem:[%s7968_s1 + $0x1] ss:$4 sm:$0xff] }
  0xa2   : > { %v319_v2 = vpop.permute.xlu0 %318  ;;  %v317_v41 = vpop.permute.xlu1 %316  ;;  %8209 = vst [vmem:[#allocation18_spill] sm:$0xff] %v8208_v15  ;;  %v8211_v21 = vsel %vm5511_vm2, 4294967295, %v8210_v21  ;;  %vm7980_vm0 = vcmask 80896   ;;  %v8213_v19 = vmov 0  ;;  %v8219_v13 = vmov 0 }
  0xa3   : > { %v327_v30 = vsel %vm7976_vm4, %v319_v2, %v304_v11  ;;  %v325_v48 = vsel %vm7976_vm4, %v315_v58, %v317_v41  ;;  %v326_v49 = vsel %vm7976_vm4, %v317_v41, %v319_v2  ;;  %8212 = vst [vmem:[#allocation19_spill] sm:$0xff] %v8211_v21  ;;  %vm517_vm4 = vcmp.eq.s32.totalorder %v4316_v8, 0 }
  0xa4   : > { %v5465_v31 = vsel %vm5455_vm15, %v327_v30, %v390_v18  ;;  %v5523_v51 = vsel %vm5507_vm13, %v325_v48, %v388_v29  ;;  %v5527_v52 = vsel %vm5511_vm2, %v326_v49, %v389_v50  ;;  %vm567_vm13 = vcmp.eq.s32.totalorder %v4316_v8, 9 }
  0xa5   : > { %490 = vrot.lane.b32.xlu1 %v5384_v53, %s8052_s8  ;;  %442 = vrot.lane.b32.xlu0 %v5465_v31, %s8054_s7  ;;  %v5545_v59 = vsel %vm517_vm4, 1, %v5150_v0  ;;  %v5548_v62 = vsel %vm567_vm13, 1, %v5150_v0  ;;  %vm7984_vm4 = vcmask 162816   ;;  %vm8222_vm1 = vcmask 80896  }
  0xa6   : > { %v530_v63 = vrot.slane %v5545_v59, %v5300_v16  ;;  %v580_v1 = vrot.slane %v5548_v62, %v5300_v16  ;;  %v538_v4 = vrot.slane %v5545_v59, %v5314_v22  ;;  %v534_v24 = vrot.slane %v5545_v59, %v5317_v23  ;;  %vm8223_vm12 = vmmov %vm8222_vm1 }
  0xa7   : > { %v588_v2 = vrot.slane %v5548_v62, %v5314_v22  ;;  %v584_v30 = vrot.slane %v5548_v62, %v5317_v23  ;;  %v8224_v45 = vmov 0  ;;  %v8230_v48 = vmov 0 }
  0xa8   : > { %vm5557_vm2 = vcmp.eq.s32.totalorder %v530_v63, 1  ;;  %vm5563_vm13 = vcmp.eq.s32.totalorder %v580_v1, 1  ;;  %vm5586_vm15 = vcmp.eq.s32.totalorder %v534_v24, 1 }
  0xa9   : > { %494 = vrot.lane.b32.xlu1 %v5418_v9, %s8052_s8  ;;  %488 = vrot.lane.b32.xlu0 %v5388_v54, %s8052_s8  ;;  %v8214_v19 = vsel %vm5557_vm2, 4294967295, %v8213_v19  ;;  %v8217_v25 = vsel %vm5563_vm13, 4294967295, %v8216_v25  ;;  %v8225_v45 = vsel %vm5586_vm15, 4294967295, %v8224_v45 }
  0xaa   : > { %8215 = vst [vmem:[#allocation20_spill] sm:$0xff] %v8214_v19  ;;  %8218 = vst [vmem:[#allocation21_spill] sm:$0xff] %v8217_v25 }
  0xab   : > { %8226 = vst [vmem:[#allocation23_spill] sm:$0xff] %v8225_v45 }
  0xad   : > { %483 = vrot.lane.b32.xlu1 %v5465_v31, %s8052_s8  ;;  %492 = vrot.lane.b32.xlu0 %v5422_v10, %s8052_s8 }
  0xb1   : > { %462 = vrot.lane.b32.xlu1 %v5523_v51, %s8054_s7  ;;  %464 = vrot.lane.b32.xlu0 %v5527_v52, %s8054_s7  ;;  %s8072_s7 = smov 44  }
  0xb5   : > { %496 = vrot.lane.b32.xlu1 %v5523_v51, %s8052_s8  ;;  %486 = vrot.lane.b32.xlu0 %v5447_v26, %s8052_s8 }
  0xb9   : > { %498 = vrot.lane.b32.xlu0 %v5527_v52, %s8052_s8  ;;  %s8125_s8 = smov 46  }
 0x10b   : > { %v457_v5 = vpop.permute.xlu1 %456  ;;  %v455_v57 = vpop.permute.xlu0 %454 }
 0x10c   : > { %v468_v11 = vsel %vm7980_vm0, %v455_v57, %v457_v5  ;;  %vm5575_vm0 = vcmp.eq.s32.totalorder %v538_v4, 1  ;;  %v522_v4 = vrot.slane %v5545_v59, %v5334_v32 }
 0x10d   : > { %v561_v39 = vsel %vm5557_vm2, %v5384_v53, %v468_v11  ;;  %v8220_v13 = vsel %vm5575_vm0, 4294967295, %v8219_v13  ;;  %v8227_v53 = vmov 0  ;;  %v526_v11 = vrot.slane %v5545_v59, %v5303_v17 }
 0x10e   : > { %8221 = vst [vmem:[#allocation22_spill] sm:$0xff] %v8220_v13 }
 0x10f   : > { %v5542_v58 = vpop.permute.xlu1 %460  ;;  %v459_v60 = vpop.permute.xlu0 %458 }
 0x110   : > { %v469_v40 = vsel %vm8222_vm1, %v457_v5, %v459_v60  ;;  %v470_v41 = vsel %vm8223_vm12, %v459_v60, %v5542_v58  ;;  %vm5596_vm1 = vcmp.eq.s32.totalorder %v584_v30, 1  ;;  %vm8233_vm12 = vcmask 162816  }
 0x111   : > { %v8231_v48 = vsel %vm5596_vm1, 4294967295, %v8230_v48  ;;  %v563_v8 = vsel %vm5575_vm0, %v5418_v9, %v470_v41  ;;  %v562_v60 = vsel %vm5586_vm15, %v5422_v10, %v469_v40  ;;  %v572_v9 = vrot.slane %v5548_v62, %v5334_v32 }
 0x112   : > { %8232 = vst [vmem:[#allocation25_spill] sm:$0xff] %v8231_v48  ;;  %v576_v10 = vrot.slane %v5548_v62, %v5303_v17  ;;  %v8237_v30 = vmov 0  ;;  %vm5634_vm0 = vcmp.eq.s32.totalorder %v526_v11, 1  ;;  %v8246_v40 = vmov 0 }
 0x113   : > { %v453_v61 = vpop.permute.xlu1 %452  ;;  %vm5638_vm2 = vcmp.eq.s32.totalorder %v572_v9, 1  ;;  %v8252_v9 = vmov 0 }
 0x117   : > { %v443_v7 = vpop.permute.xlu0 %442  ;;  %v491_v14 = vpop.permute.xlu1 %490 }
 0x11b   : > { %v489_v18 = vpop.permute.xlu0 %488  ;;  %v495_v49 = vpop.permute.xlu1 %494 }
 0x11c   : > { %v502_v6 = vsel %vm7984_vm4, %v489_v18, %v491_v14  ;;  %vm5592_vm4 = vcmp.eq.s32.totalorder %v588_v2, 1 }
 0x11d   : > { %v5584_v42 = vsel %vm5563_vm13, %v502_v6, %v561_v39  ;;  %v8228_v53 = vsel %vm5592_vm4, 4294967295, %v8227_v53  ;;  %vm8234_vm13 = vmmov %vm8233_vm12  ;;  %v8240_v6 = vmov 0  ;;  %v8243_v39 = vmov 0 }
 0x11e   : > { %632 = vrot.lane.b32.xlu0 %v5584_v42, %s8039_s11  ;;  %8229 = vst [vmem:[#allocation24_spill] sm:$0xff] %v8228_v53  ;;  %v8241_v6 = vsel %vm5634_vm0, 4294967295, %v8240_v6  ;;  %v8244_v39 = vsel %vm5638_vm2, 4294967295, %v8243_v39 }
 0x11f   : > { %v493_v29 = vpop.permute.xlu0 %492  ;;  %8242 = vst [vmem:[#allocation27_spill] sm:$0xff] %v8241_v6  ;;  %8245 = vst [vmem:[#allocation28_spill] sm:$0xff] %v8244_v39  ;;  %v484_v41 = vpop.permute.xlu1 %483  ;;  %v8281_v6 = vmov 0  ;;  %v8288_v39 = vmov 0 }
 0x120   : > { %v503_v50 = vsel %vm8233_vm12, %v491_v14, %v493_v29  ;;  %v504_v5 = vsel %vm8234_vm13, %v493_v29, %v495_v49  ;;  %vm8235_vm13 = vcmask 80896  }
 0x121   : > { %v5610_v63 = vsel %vm5592_vm4, %v504_v5, %v563_v8  ;;  %v5614_v1 = vsel %vm5596_vm1, %v503_v50, %v562_v60  ;;  %v467_v24 = vsel %vm8235_vm13, %v453_v61, %v455_v57  ;;  %vm8236_vm12 = vmmov %vm8235_vm13  ;;  %vm5630_vm4 = vcmp.eq.s32.totalorder %v522_v4, 1 }
 0x122   : > { %636 = vrot.lane.b32.xlu0 %v5610_v63, %s8039_s11  ;;  %634 = vrot.lane.b32.xlu1 %v5614_v1, %s8039_s11  ;;  %v482_v2 = vsel %vm8236_vm12, %v443_v7, %v453_v61  ;;  %v8238_v30 = vsel %vm5630_vm4, 4294967295, %v8237_v30  ;;  %vm5642_vm1 = vcmp.eq.s32.totalorder %v576_v10, 1  ;;  %vm8249_vm13 = vcmask 162816  }
 0x123   : > { %v465_v14 = vpop.permute.xlu0 %464  ;;  %8239 = vst [vmem:[#allocation26_spill] sm:$0xff] %v8238_v30  ;;  %v8247_v40 = vsel %vm5642_vm1, 4294967295, %v8246_v40  ;;  %vm8250_vm12 = vmmov %vm8249_vm13  ;;  %v559_v50 = vsel %vm5630_vm4, %v5447_v26, %v482_v2  ;;  %v560_v5 = vsel %vm5634_vm0, %v5388_v54, %v467_v24  ;;  %v600_v54 = vrot.slane %v5548_v62, %v5369_v46  ;;  %v463_v4 = vpop.permute.xlu1 %462 }
 0x124   : > { %8248 = vst [vmem:[#allocation29_spill] sm:$0xff] %v8247_v40  ;;  %v8256_v24 = vmov 0 }
 0x125   : > { %vm5680_vm0 = vcmp.eq.s32.totalorder %v600_v54, 1 }
 0x126   : > { %v8257_v24 = vsel %vm5680_vm0, 4294967295, %v8256_v24 }
 0x127   : > { %v487_v57 = vpop.permute.xlu0 %486  ;;  %8258 = vst [vmem:[#allocation31_spill] sm:$0xff] %v8257_v24  ;;  %v8284_v24 = vmov 0 }
 0x128   : > { %v501_v61 = vsel %vm8249_vm13, %v487_v57, %v489_v18  ;;  %v516_v29 = vsel %vm8250_vm12, %v484_v41, %v487_v57  ;;  %v550_v18 = vrot.slane %v5545_v59, %v5369_v46  ;;  %vm8251_vm13 = vcmask 80896  }
 0x129   : > { %v5656_v8 = vsel %vm5638_vm2, %v516_v29, %v559_v50  ;;  %v5660_v60 = vsel %vm5642_vm1, %v501_v61, %v560_v5  ;;  %v473_v11 = vsel %vm8251_vm13, %v465_v14, %v443_v7  ;;  %vm8255_vm1 = vcmask 162816   ;;  %v497_v29 = vpop.permute.xlu1 %496 }
 0x12a   : > { %628 = vrot.lane.b32.xlu1 %v5656_v8, %s8039_s11  ;;  %630 = vrot.lane.b32.xlu0 %v5660_v60, %s8039_s11  ;;  %vm5671_vm12 = vcmp.eq.s32.totalorder %v550_v18, 1  ;;  %v546_v57 = vrot.slane %v5545_v59, %v5471_v35  ;;  %v592_v61 = vrot.slane %v5548_v62, %v5468_v34  ;;  %v8264_v18 = vmov 0 }
 0x12b   : > { %v499_v26 = vpop.permute.xlu0 %498  ;;  %v8253_v9 = vsel %vm5671_vm12, 4294967295, %v8252_v9  ;;  %v566_v7 = vsel %vm5671_vm12, %v5465_v31, %v473_v11  ;;  %v596_v31 = vrot.slane %v5548_v62, %v5471_v35  ;;  %vm8267_vm2 = vcmask 162816  }
 0x12c   : > { %8254 = vst [vmem:[#allocation30_spill] sm:$0xff] %v8253_v9  ;;  %v507_v10 = vsel %vm8255_vm1, %v499_v26, %v484_v41  ;;  %v542_v41 = vrot.slane %v5545_v59, %v5468_v34  ;;  %vm8259_vm1 = vmmov %vm8251_vm13  ;;  %v8261_v59 = vmov 0  ;;  %vm5710_vm12 = vcmp.eq.s32.totalorder %v546_v57, 1 }
 0x12d   : > { %v5689_v2 = vsel %vm5680_vm0, %v507_v10, %v566_v7  ;;  %v471_v50 = vsel %vm8259_vm1, %v5542_v58, %v463_v4  ;;  %vm8260_vm13 = vmmov %vm8259_vm1  ;;  %v8265_v18 = vsel %vm5710_vm12, 4294967295, %v8264_v18  ;;  %v505_v54 = vsel %vm8267_vm2, %v495_v49, %v497_v29  ;;  %v4317_v7 = vld [vmem:[%s7968_s1 + $0x2] ss:$4 sm:$0xff] }
 0x12e   : > { %669 = vrot.lane.b32.xlu1 %v5660_v60, %s8037_s12  ;;  %671 = vrot.lane.b32.xlu0 %v5584_v42, %s8037_s12  ;;  %v472_v5 = vsel %vm8260_vm13, %v463_v4, %v465_v14  ;;  %vm5706_vm0 = vcmp.eq.s32.totalorder %v542_v41, 1  ;;  %8266 = vst [vmem:[#allocation33_spill] sm:$0xff] %v8265_v18  ;;  %vm8268_vm4 = vmmov %vm8267_vm2  ;;  %vm5720_vm1 = vcmp.eq.s32.totalorder %v592_v61, 1  ;;  %v8269_v58 = vmov 0 }
 0x12f   : > { %v8262_v59 = vsel %vm5706_vm0, 4294967295, %v8261_v59  ;;  %v506_v11 = vsel %vm8268_vm4, %v497_v29, %v499_v26  ;;  %v8270_v58 = vsel %vm5720_vm1, 4294967295, %v8269_v58  ;;  %vm5724_vm13 = vcmp.eq.s32.totalorder %v596_v31, 1 }
 0x130   : > { %8263 = vst [vmem:[#allocation32_spill] sm:$0xff] %v8262_v59  ;;  %8271 = vst [vmem:[#allocation34_spill] sm:$0xff] %v8270_v58  ;;  %v8272_v62 = vmov 0  ;;  %v564_v49 = vsel %vm5706_vm0, %v5523_v51, %v471_v50  ;;  %v565_v14 = vsel %vm5710_vm12, %v5527_v52, %v472_v5  ;;  %vm693_vm2 = vcmp.eq.s32.totalorder %v4317_v7, 0 }
 0x131   : > { %v8273_v62 = vsel %vm5724_vm13, 4294967295, %v8272_v62  ;;  %v5736_v26 = vsel %vm5720_vm1, %v505_v54, %v564_v49  ;;  %v5740_v4 = vsel %vm5724_vm13, %v506_v11, %v565_v14  ;;  %vm743_vm4 = vcmp.eq.s32.totalorder %v4317_v7, 9 }
 0x132   : > { %673 = vrot.lane.b32.xlu1 %v5614_v1, %s8037_s12  ;;  %618 = vrot.lane.b32.xlu0 %v5689_v2, %s8039_s11  ;;  %8274 = vst [vmem:[#allocation35_spill] sm:$0xff] %v8273_v62  ;;  %v5762_v29 = vsel %vm693_vm2, 1, %v5150_v0  ;;  %v5767_v5 = vsel %vm743_vm4, 1, %v5150_v0  ;;  %vm8003_vm1 = vcmask 818176   ;;  %v8275_v58 = vmov 0 }
 0x133   : > { %v702_v50 = vrot.slane %v5762_v29, %v5303_v17  ;;  %v752_v54 = vrot.slane %v5767_v5, %v5303_v17  ;;  %v710_v14 = vrot.slane %v5762_v29, %v5317_v23  ;;  %v760_v7 = vrot.slane %v5767_v5, %v5317_v23 }
 0x134   : > { %v698_v59 = vrot.slane %v5762_v29, %v5334_v32  ;;  %v8278_v17 = vmov 0  ;;  %v748_v62 = vrot.slane %v5767_v5, %v5334_v32  ;;  %v706_v40 = vrot.slane %v5762_v29, %v5300_v16 }
 0x135   : > { %vm5777_vm2 = vcmp.eq.s32.totalorder %v702_v50, 1  ;;  %vm5784_vm4 = vcmp.eq.s32.totalorder %v752_v54, 1  ;;  %vm8013_vm0 = vcmask 588800   ;;  %v718_v18 = vrot.slane %v5762_v29, %v5468_v34 }
 0x136   : > { %661 = vrot.lane.b32.xlu1 %v5689_v2, %s8037_s12  ;;  %667 = vrot.lane.b32.xlu0 %v5656_v8, %s8037_s12  ;;  %v8276_v58 = vsel %vm5777_vm2, 4294967295, %v8275_v58  ;;  %v8279_v17 = vsel %vm5784_vm4, 4294967295, %v8278_v17  ;;  %vm5801_vm13 = vcmp.eq.s32.totalorder %v760_v7, 1  ;;  %vm8287_vm12 = vcmask 818176  }
 0x137   : > { %8277 = vst [vmem:[#allocation36_spill] sm:$0xff] %v8276_v58  ;;  %8280 = vst [vmem:[#allocation37_spill] sm:$0xff] %v8279_v17  ;;  %v8285_v24 = vsel %vm5801_vm13, 4294967295, %v8284_v24  ;;  %vm5808_vm15 = vcmp.eq.s32.totalorder %v698_v59, 1  ;;  %v756_v7 = vrot.slane %v5767_v5, %v5300_v16  ;;  %v8292_v59 = vmov 0 }
 0x138   : > { %8286 = vst [vmem:[#allocation39_spill] sm:$0xff] %v8285_v24  ;;  %v8289_v39 = vsel %vm5808_vm15, 4294967295, %v8288_v39  ;;  %vm8291_vm14 = vmmov %vm8287_vm12  ;;  %v764_v16 = vrot.slane %v5767_v5, %v5314_v22  ;;  %v8298_v17 = vmov 0  ;;  %v726_v53 = vrot.slane %v5762_v29, %v5369_v46 }
 0x139   : > { %8290 = vst [vmem:[#allocation40_spill] sm:$0xff] %v8289_v39  ;;  %vm5861_vm10 = vcmp.eq.s32.totalorder %v756_v7, 1  ;;  %v8313_v7 = vmov 0 }
 0x13a   : > { %638 = vrot.lane.b32.xlu0 %v5736_v26, %s8039_s11  ;;  %659 = vrot.lane.b32.xlu1 %v5740_v4, %s8037_s12 }
 0x13e   : > { %640 = vrot.lane.b32.xlu0 %v5740_v4, %s8039_s11  ;;  %675 = vrot.lane.b32.xlu1 %v5610_v63, %s8037_s12  ;;  %s8119_s11 = smov 56  }
 0x142   : > { %677 = vrot.lane.b32.xlu1 %v5736_v26, %s8037_s12  ;;  %s8139_s12 = smov 7  }
 0x190   : > { %v633_v51 = vpop.permute.xlu0 %632 }
 0x194   : > { %v5752_v52 = vpop.permute.xlu1 %634  ;;  %v5754_v10 = vpop.permute.xlu0 %636 }
 0x195   : > { %v645_v9 = vsel %vm8287_vm12, %v633_v51, %v5752_v52  ;;  %vm5823_vm12 = vcmp.eq.s32.totalorder %v748_v62, 1 }
 0x196   : > { %v8293_v59 = vsel %vm5823_vm12, 4294967295, %v8292_v59 }
 0x197   : > { %8294 = vst [vmem:[#allocation41_spill] sm:$0xff] %v8293_v59 }
 0x19c   : > { %v629_v41 = vpop.permute.xlu1 %628  ;;  %v631_v57 = vpop.permute.xlu0 %630 }
 0x19d   : > { %v643_v0 = vsel %vm8003_vm1, %v629_v41, %v631_v57  ;;  %vm5794_vm1 = vcmp.eq.s32.totalorder %v710_v14, 1 }
 0x19e   : > { %v8282_v6 = vsel %vm5794_vm1, 4294967295, %v8281_v6  ;;  %v736_v54 = vsel %vm5777_vm2, %v5660_v60, %v643_v0  ;;  %v714_v0 = vrot.slane %v5762_v29, %v5314_v22  ;;  %vm8302_vm2 = vcmask 818176  }
 0x19f   : > { %8283 = vst [vmem:[#allocation38_spill] sm:$0xff] %v8282_v6  ;;  %v644_v22 = vsel %vm8302_vm2, %v631_v57, %v633_v51  ;;  %v8307_v51 = vmov 0  ;;  %v8310_v57 = vmov 0 }
 0x1a0   : > { %v670_v61 = vpop.permute.xlu1 %669  ;;  %v5759_v31 = vpop.permute.xlu0 %671 }
 0x1a1   : > { %v680_v60 = vsel %vm8013_vm0, %v670_v61, %v5759_v31 }
 0x1a4   : > { %v5771_v11 = vpop.permute.xlu1 %673  ;;  %v619_v49 = vpop.permute.xlu0 %618 }
 0x1a5   : > { %v658_v14 = vsel %vm8291_vm14, %v619_v49, %v629_v41  ;;  %v768_v41 = vrot.slane %v5767_v5, %v5468_v34  ;;  %vm5831_vm14 = vcmp.eq.s32.totalorder %v706_v40, 1  ;;  %v738_v34 = vsel %vm5794_vm1, %v5614_v1, %v645_v9  ;;  %vm8303_vm1 = vmmov %vm8302_vm2 }
 0x1a6   : > { %v735_v40 = vsel %vm5808_vm15, %v5656_v8, %v658_v14  ;;  %v8304_v8 = vmov 0  ;;  %v737_v14 = vsel %vm5831_vm14, %v5584_v42, %v644_v22  ;;  %vm8316_vm15 = vcmask 818176  }
 0x1a7   : > { %v8305_v8 = vsel %vm5861_vm10, 4294967295, %v8304_v8  ;;  %vm5870_vm2 = vcmp.eq.s32.totalorder %v768_v41, 1 }
 0x1a8   : > { %v662_v23 = vpop.permute.xlu1 %661  ;;  %v668_v50 = vpop.permute.xlu0 %667  ;;  %8306 = vst [vmem:[#allocation44_spill] sm:$0xff] %v8305_v8  ;;  %v8308_v51 = vsel %vm5870_vm2, 4294967295, %v8307_v51 }
 0x1a9   : > { %v692_v32 = vsel %vm8013_vm0, %v662_v23, %v668_v50  ;;  %vm5837_vm0 = vcmp.eq.s32.totalorder %v718_v18, 1  ;;  %v5853_v18 = vsel %vm5801_vm13, %v680_v60, %v738_v34  ;;  %8309 = vst [vmem:[#allocation45_spill] sm:$0xff] %v8308_v51  ;;  %vm5906_vm13 = vcmp.eq.s32.totalorder %v764_v16, 1 }
 0x1aa   : > { %v5815_v30 = vsel %vm5784_vm4, %v692_v32, %v736_v54  ;;  %v8295_v54 = vmov 0  ;;  %v8299_v17 = vsel %vm5837_vm0, 4294967295, %v8298_v17  ;;  %vm8301_vm4 = vcmask 588800  }
 0x1ab   : > { %803 = vrot.lane.b32.xlu1 %v5815_v30, %s8031_s15  ;;  %v8296_v54 = vsel %vm5831_vm14, 4294967295, %v8295_v54  ;;  %8300 = vst [vmem:[#allocation43_spill] sm:$0xff] %v8299_v17  ;;  %v679_v9 = vsel %vm8301_vm4, %v668_v50, %v670_v61  ;;  %v722_v61 = vrot.slane %v5762_v29, %v5471_v35  ;;  %v646_v29 = vsel %vm8316_vm15, %v5752_v52, %v5754_v10 }
 0x1ac   : > { %8297 = vst [vmem:[#allocation42_spill] sm:$0xff] %v8296_v54  ;;  %v660_v32 = vpop.permute.xlu1 %659  ;;  %v639_v62 = vpop.permute.xlu0 %638  ;;  %v5899_v41 = vsel %vm5861_vm10, %v679_v9, %v737_v14  ;;  %v772_v52 = vrot.slane %v5767_v5, %v5471_v35  ;;  %v8325_v35 = vmov 0 }
 0x1ad   : > { %v664_v58 = vsel %vm8301_vm4, %v660_v32, %v662_v23  ;;  %v647_v1 = vsel %vm8303_vm1, %v5754_v10, %v639_v62  ;;  %vm5876_vm1 = vcmp.eq.s32.totalorder %v714_v0, 1  ;;  %v8318_v0 = vmov 0 }
 0x1ae   : > { %v5857_v13 = vsel %vm5823_vm12, %v664_v58, %v735_v40  ;;  %v776_v58 = vrot.slane %v5767_v5, %v5369_v46  ;;  %v8311_v57 = vsel %vm5876_vm1, 4294967295, %v8310_v57  ;;  %v740_v60 = vsel %vm5837_vm0, %v5736_v26, %v647_v1  ;;  %vm8317_vm0 = vmmov %vm8316_vm15 }
 0x1af   : > { %801 = vrot.lane.b32.xlu0 %v5857_v13, %s8031_s15  ;;  %807 = vrot.lane.b32.xlu1 %v5853_v18, %s8031_s15  ;;  %8312 = vst [vmem:[#allocation46_spill] sm:$0xff] %v8311_v57  ;;  %vm5890_vm12 = vcmp.eq.s32.totalorder %v726_v53, 1  ;;  %v8319_v0 = vsel %vm5906_vm13, 4294967295, %v8318_v0  ;;  %v681_v53 = vsel %vm8301_vm4, %v5759_v31, %v5771_v11  ;;  %v8321_v10 = vmov 0 }
 0x1b0   : > { %v676_v23 = vpop.permute.xlu1 %675  ;;  %v641_v50 = vpop.permute.xlu0 %640  ;;  %v8314_v7 = vsel %vm5890_vm12, 4294967295, %v8313_v7  ;;  %8320 = vst [vmem:[#allocation48_spill] sm:$0xff] %v8319_v0  ;;  %vm5919_vm15 = vcmp.eq.s32.totalorder %v776_v58, 1  ;;  %v739_v16 = vsel %vm5876_vm1, %v5610_v63, %v646_v29  ;;  %vm5943_vm10 = vcmp.eq.s32.totalorder %v772_v52, 1 }
 0x1b1   : > { %v682_v46 = vsel %vm8301_vm4, %v5771_v11, %v676_v23  ;;  %8315 = vst [vmem:[#allocation47_spill] sm:$0xff] %v8314_v7  ;;  %v649_v26 = vsel %vm8317_vm0, %v641_v50, %v619_v49  ;;  %v8322_v10 = vsel %vm5919_vm15, 4294967295, %v8321_v10  ;;  %vm8324_vm0 = vmmov %vm8301_vm4  ;;  %v5932_v34 = vsel %vm5906_vm13, %v681_v53, %v739_v16 }
 0x1b2   : > { %v5903_v42 = vsel %vm5870_vm2, %v682_v46, %v740_v60  ;;  %8323 = vst [vmem:[#allocation49_spill] sm:$0xff] %v8322_v10  ;;  %v742_v31 = vsel %vm5890_vm12, %v5689_v2, %v649_v26  ;;  %vm5934_vm4 = vcmp.eq.s32.totalorder %v722_v61, 1  ;;  %vm8328_vm2 = vcmask 818176   ;;  %vm8332_vm12 = vmmov %vm8324_vm0 }
 0x1b3   : > { %805 = vrot.lane.b32.xlu0 %v5899_v41, %s8031_s15  ;;  %811 = vrot.lane.b32.xlu1 %v5903_v42, %s8031_s15  ;;  %v8326_v35 = vsel %vm5934_vm4, 4294967295, %v8325_v35  ;;  %v648_v5 = vsel %vm8328_vm2, %v639_v62, %v641_v50  ;;  %v8329_v63 = vmov 0  ;;  %vm8035_vm2 = vcmask 1043456  }
 0x1b4   : > { %v678_v49 = vpop.permute.xlu1 %677  ;;  %8327 = vst [vmem:[#allocation50_spill] sm:$0xff] %v8326_v35  ;;  %v8330_v63 = vsel %vm5943_vm10, 4294967295, %v8329_v63 }
 0x1b5   : > { %v684_v11 = vsel %vm8324_vm0, %v678_v49, %v660_v32  ;;  %8331 = vst [vmem:[#allocation51_spill] sm:$0xff] %v8330_v63  ;;  %v683_v2 = vsel %vm8332_vm12, %v676_v23, %v678_v49  ;;  %v741_v32 = vsel %vm5934_vm4, %v5740_v4, %v648_v5  ;;  %vm8029_vm12 = vcmask 1039360  }
 0x1b6   : > { %v5941_v40 = vsel %vm5919_vm15, %v684_v11, %v742_v31  ;;  %v5957_v62 = vsel %vm5943_vm10, %v683_v2, %v741_v32  ;;  %vm8034_vm0 = vcmask 965632   ;;  %vm8333_vm10 = vcmask 1043456  }
 0x1b7   : > { %809 = vrot.lane.b32.xlu0 %v5932_v34, %s8031_s15  ;;  %815 = vrot.lane.b32.xlu1 %v5941_v40, %s8031_s15  ;;  %vm8334_vm15 = vcmask 1043456  }
 0x1b8   : > { %vm8335_vm4 = vmmov %vm8334_vm15 }
 0x1bb   : > { %864 = vrot.lane.b32.xlu1 %v5815_v30, %s5158_s16  ;;  %813 = vrot.lane.b32.xlu0 %v5957_v62, %s8031_s15  ;;  %s8114_s15 = smov 55  }
 0x1bf   : > { %904 = vrot.lane.b32.xlu1 %v5932_v34, %s5159_s17  ;;  %862 = vrot.lane.b32.xlu0 %v5857_v13, %s5158_s16 }
 0x1c3   : > { %900 = vrot.lane.b32.xlu1 %v5899_v41, %s5159_s17  ;;  %902 = vrot.lane.b32.xlu0 %v5853_v18, %s5159_s17 }
 0x1c7   : > { %870 = vrot.lane.b32.xlu1 %v5932_v34, %s5158_s16  ;;  %898 = vrot.lane.b32.xlu0 %v5815_v30, %s5159_s17 }
 0x1cb   : > { %866 = vrot.lane.b32.xlu1 %v5899_v41, %s5158_s16  ;;  %868 = vrot.lane.b32.xlu0 %v5853_v18, %s5158_s16 }
 0x1cf   : > { %998 = vrot.lane.b32.xlu1 %v5932_v34, %s5160_s18  ;;  %896 = vrot.lane.b32.xlu0 %v5857_v13, %s5159_s17 }
 0x1d3   : > { %1092 = vrot.lane.b32.xlu1 %v5932_v34, %s5161_s19  ;;  %996 = vrot.lane.b32.xlu0 %v5853_v18, %s5160_s18 }
 0x1d7   : > { %994 = vrot.lane.b32.xlu1 %v5899_v41, %s5160_s18  ;;  %1090 = vrot.lane.b32.xlu0 %v5853_v18, %s5161_s19 }
 0x1db   : > { %1088 = vrot.lane.b32.xlu1 %v5899_v41, %s5161_s19  ;;  %992 = vrot.lane.b32.xlu0 %v5815_v30, %s5160_s18 }
 0x1df   : > { %964 = vrot.lane.b32.xlu1 %v5932_v34, %s5162_s20  ;;  %1086 = vrot.lane.b32.xlu0 %v5815_v30, %s5161_s19 }
 0x1e3   : > { %1056 = vrot.lane.b32.xlu1 %v5853_v18, %s5163_s23  ;;  %962 = vrot.lane.b32.xlu0 %v5853_v18, %s5162_s20 }
 0x1e7   : > { %1084 = vrot.lane.b32.xlu1 %v5857_v13, %s5161_s19  ;;  %990 = vrot.lane.b32.xlu0 %v5857_v13, %s5160_s18 }
 0x1eb   : > { %960 = vrot.lane.b32.xlu1 %v5899_v41, %s5162_s20  ;;  %1058 = vrot.lane.b32.xlu0 %v5932_v34, %s5163_s23 }
 0x1ef   : > { %1054 = vrot.lane.b32.xlu1 %v5899_v41, %s5163_s23  ;;  %958 = vrot.lane.b32.xlu0 %v5815_v30, %s5162_s20 }
 0x1f3   : > { %1050 = vrot.lane.b32.xlu1 %v5857_v13, %s5163_s23  ;;  %1052 = vrot.lane.b32.xlu0 %v5815_v30, %s5163_s23 }
 0x1f7   : > { %1186 = vrot.lane.b32.xlu1 %v5932_v34, %s5164_s24  ;;  %956 = vrot.lane.b32.xlu0 %v5857_v13, %s5162_s20 }
 0x1fb   : > { %1280 = vrot.lane.b32.xlu1 %v5932_v34, %s5165_s25  ;;  %1184 = vrot.lane.b32.xlu0 %v5853_v18, %s5164_s24 }
 0x1ff   : > { %1182 = vrot.lane.b32.xlu1 %v5899_v41, %s5164_s24  ;;  %1278 = vrot.lane.b32.xlu0 %v5853_v18, %s5165_s25 }
 0x203   : > { %1276 = vrot.lane.b32.xlu1 %v5899_v41, %s5165_s25  ;;  %1180 = vrot.lane.b32.xlu0 %v5815_v30, %s5164_s24 }
 0x207   : > { %1152 = vrot.lane.b32.xlu1 %v5932_v34, %s5166_s26  ;;  %1274 = vrot.lane.b32.xlu0 %v5815_v30, %s5165_s25 }
 0x20b   : > { %1244 = vrot.lane.b32.xlu1 %v5853_v18, %s8145_s29  ;;  %1150 = vrot.lane.b32.xlu0 %v5853_v18, %s5166_s26 }
 0x20f   : > { %1272 = vrot.lane.b32.xlu1 %v5857_v13, %s5165_s25  ;;  %1178 = vrot.lane.b32.xlu0 %v5857_v13, %s5164_s24 }
 0x213   : > { %1148 = vrot.lane.b32.xlu1 %v5899_v41, %s5166_s26  ;;  %1246 = vrot.lane.b32.xlu0 %v5932_v34, %s8145_s29 }
 0x217   : > { %1242 = vrot.lane.b32.xlu1 %v5899_v41, %s8145_s29  ;;  %1146 = vrot.lane.b32.xlu0 %v5815_v30, %s5166_s26 }
 0x21b   : > { %1238 = vrot.lane.b32.xlu1 %v5857_v13, %s8145_s29  ;;  %1240 = vrot.lane.b32.xlu0 %v5815_v30, %s8145_s29 }
 0x21d   : > { %v804_v4 = vpop.permute.xlu1 %803 }
 0x21f   : > { %1374 = vrot.lane.b32.xlu1 %v5932_v34, %s8130_s30  ;;  %1144 = vrot.lane.b32.xlu0 %v5857_v13, %s5166_s26 }
 0x221   : > { %v808_v22 = vpop.permute.xlu1 %807  ;;  %v802_v1 = vpop.permute.xlu0 %801 }
 0x222   : > { %v818_v9 = vsel %vm8029_vm12, %v802_v1, %v804_v4 }
 0x223   : > { %v829_v58 = vrot.slane %v818_v9, 4  ;;  %1468 = vrot.lane.b32.xlu1 %v5932_v34, %s5169_s9  ;;  %1372 = vrot.lane.b32.xlu0 %v5853_v18, %s8130_s30 }
 0x225   : > { %v6070_v23 = vsel %vm8035_vm2, %v5857_v13, %v829_v58  ;;  %v812_v61 = vpop.permute.xlu1 %811  ;;  %v806_v50 = vpop.permute.xlu0 %805 }
 0x226   : > { %v819_v14 = vsel %vm8029_vm12, %v804_v4, %v806_v50  ;;  %v820_v60 = vsel %vm8029_vm12, %v806_v50, %v808_v22 }
 0x227   : > { %v830_v46 = vrot.slane %v819_v14, 4  ;;  %v831_v29 = vrot.slane %v820_v60, 4  ;;  %1370 = vrot.lane.b32.xlu1 %v5899_v41, %s8130_s30  ;;  %1466 = vrot.lane.b32.xlu0 %v5853_v18, %s5169_s9 }
 0x229   : > { %v6080_v26 = vsel %vm8035_vm2, %v5815_v30, %v830_v46  ;;  %v6084_v53 = vsel %vm8035_vm2, %v5899_v41, %v831_v29  ;;  %v816_v52 = vpop.permute.xlu1 %815  ;;  %v810_v49 = vpop.permute.xlu0 %809 }
 0x22a   : > { %v827_v16 = vsel %vm8029_vm12, %v816_v52, %v802_v1  ;;  %v821_v31 = vsel %vm8029_vm12, %v808_v22, %v810_v49  ;;  %v822_v11 = vsel %vm8029_vm12, %v810_v49, %v812_v61 }
 0x22b   : > { %v836_v5 = vrot.slane %v827_v16, 4  ;;  %v832_v2 = vrot.slane %v821_v31, 4  ;;  %v833_v32 = vrot.slane %v822_v11, 4  ;;  %1464 = vrot.lane.b32.xlu1 %v5899_v41, %s5169_s9  ;;  %1368 = vrot.lane.b32.xlu0 %v5815_v30, %s8130_s30 }
 0x22d   : > { %v853_v4 = vsel %vm8035_vm2, %v5941_v40, %v836_v5  ;;  %v849_v9 = vsel %vm8035_vm2, %v5853_v18, %v832_v2  ;;  %v850_v22 = vsel %vm8035_vm2, %v5932_v34, %v833_v32  ;;  %v865_v1 = vpop.permute.xlu1 %864  ;;  %v814_v58 = vpop.permute.xlu0 %813 }
 0x22e   : > { %861 = vst [vmem:[#allocation2 + $0x38] sm:$0xff] %v853_v4  ;;  %858 = vst [vmem:[#allocation2 + $0x20] sm:$0xff] %v850_v22  ;;  %v823_v50 = vsel %vm8029_vm12, %v812_v61, %v814_v58  ;;  %v824_v14 = vsel %vm8029_vm12, %v814_v58, %v816_v52  ;;  %vm8033_vm12 = vcmask 1031168  }
 0x22f   : > { %v834_v60 = vrot.slane %v823_v50, 4  ;;  %v835_v46 = vrot.slane %v824_v14, 4  ;;  %1340 = vrot.lane.b32.xlu1 %v5932_v34, %s8132_s10  ;;  %1462 = vrot.lane.b32.xlu0 %v5815_v30, %s5169_s9 }
 0x231   : > { %v851_v29 = vsel %vm8035_vm2, %v5903_v42, %v834_v60  ;;  %v852_v49 = vsel %vm8035_vm2, %v5957_v62, %v835_v46  ;;  %v6109_v16 = vpop.permute.xlu1 %904  ;;  %v6111_v61 = vpop.permute.xlu0 %862 }
 0x232   : > { %859 = vst [vmem:[#allocation2 + $0x28] sm:$0xff] %v851_v29  ;;  %860 = vst [vmem:[#allocation2 + $0x30] sm:$0xff] %v852_v49 }
 0x233   : > { %1432 = vrot.lane.b32.xlu1 %v5853_v18, %s8141_s13  ;;  %1338 = vrot.lane.b32.xlu0 %v5853_v18, %s8132_s10 }
 0x235   : > { %v901_v52 = vpop.permute.xlu1 %900  ;;  %v903_v31 = vpop.permute.xlu0 %902 }
 0x236   : > { %v915_v2 = vsel %vm8034_vm0, %v901_v52, %v903_v31  ;;  %v916_v32 = vsel %vm8034_vm0, %v903_v31, %v6109_v16 }
 0x237   : > { %1460 = vrot.lane.b32.xlu1 %v5857_v13, %s5169_s9  ;;  %1366 = vrot.lane.b32.xlu0 %v5857_v13, %s8130_s30  ;;  %v926_v22 = vrot.slane %v915_v2, 4  ;;  %v927_v58 = vrot.slane %v916_v32, 4 }
 0x239   : > { %v6121_v11 = vpop.permute.xlu1 %870  ;;  %v899_v5 = vpop.permute.xlu0 %898 }
 0x23a   : > { %v914_v4 = vsel %vm8034_vm0, %v899_v5, %v901_v52 }
 0x23b   : > { %1336 = vrot.lane.b32.xlu1 %v5899_v41, %s8132_s10  ;;  %1434 = vrot.lane.b32.xlu0 %v5932_v34, %s8141_s13  ;;  %v925_v50 = vrot.slane %v914_v4, 4 }
 0x23d   : > { %v867_v14 = vpop.permute.xlu1 %866  ;;  %v869_v60 = vpop.permute.xlu0 %868 }
 0x23e   : > { %v880_v46 = vsel %vm8033_vm12, %v865_v1, %v867_v14  ;;  %v881_v29 = vsel %vm8033_vm12, %v867_v14, %v869_v60  ;;  %v882_v49 = vsel %vm8033_vm12, %v869_v60, %v6121_v11 }
 0x23f   : > { %v941_v52 = vsel %vm8035_vm2, %v880_v46, %v925_v50  ;;  %v942_v31 = vsel %vm8035_vm2, %v881_v29, %v926_v22  ;;  %v943_v51 = vsel %vm8035_vm2, %v882_v49, %v927_v58  ;;  %1430 = vrot.lane.b32.xlu1 %v5899_v41, %s8141_s13  ;;  %1334 = vrot.lane.b32.xlu0 %v5815_v30, %s8132_s10 }
 0x240   : > { %v4336_v2 = vpack.c.bf16 %v941_v52, %v6080_v26  ;;  %v4366_v32 = vpack.c.bf16 %v943_v51, %v849_v9  ;;  %v4368_v4 = vpack.c.bf16 %v942_v31, %v6084_v53  ;;  %v879_v51 = vsel %vm8033_vm12, %v6111_v61, %v865_v1 }
 0x241   : > { %v6144_v14 = vpop.permute.xlu1 %998  ;;  %v6146_v60 = vpop.permute.xlu0 %896  ;;  %vm8065_vm12 = vcmask 949248  }
 0x242   : > { %v913_v22 = vsel %vm8034_vm0, %v6146_v60, %v899_v5  ;;  %4337 = vmatprep.subr.bf16.mxu0 %v4336_v2  ;;  %4367 = vmatprep.subr.bf16.mxu1 %v4366_v32  ;;  %vm8056_vm0 = vcmask 957440  }
 0x243   : > { %v924_v58 = vrot.slane %v913_v22, 4  ;;  %1426 = vrot.lane.b32.xlu1 %v5857_v13, %s8141_s13  ;;  %1428 = vrot.lane.b32.xlu0 %v5815_v30, %s8141_s13 }
 0x244   : > { %4369 = vmatpush1.bf16.msra.mxu1 %v4368_v4 }
 0x245   : > { %v940_v26 = vsel %vm8035_vm2, %v879_v51, %v924_v58  ;;  %v6157_v53 = vpop.permute.xlu1 %1092  ;;  %v997_v9 = vpop.permute.xlu0 %996  ;;  %vm8051_vm2 = vcmask 875520  }
 0x246   : > { %v4338_v5 = vpack.c.bf16 %v940_v26, %v6070_v23  ;;  %v1010_v52 = vsel %vm8065_vm12, %v997_v9, %v6144_v14 }
 0x247   : > { %1562 = vrot.lane.b32.xlu1 %v5932_v34, %s8143_s14  ;;  %1332 = vrot.lane.b32.xlu0 %v5857_v13, %s8132_s10  ;;  %v1021_v31 = vrot.slane %v1010_v52, 4 }
 0x248   : > { %4339 = vmatpush1.bf16.msra.mxu0 %v4338_v5 }
 0x249   : > { %v995_v50 = vpop.permute.xlu1 %994  ;;  %v1091_v46 = vpop.permute.xlu0 %1090 }
 0x24a   : > { %v1009_v26 = vsel %vm8065_vm12, %v995_v50, %v997_v9  ;;  %v1104_v5 = vsel %vm8051_vm2, %v1091_v46, %v6157_v53 }
 0x24b   : > { %1656 = vrot.lane.b32.xlu1 %v5903_v42, %s8114_s15  ;;  %1560 = vrot.lane.b32.xlu0 %v5853_v18, %s8143_s14  ;;  %v1020_v52 = vrot.slane %v1009_v26, 4 }
 0x24d   : > { %v1089_v1 = vpop.permute.xlu1 %1088  ;;  %v993_v29 = vpop.permute.xlu0 %992 }
 0x24e   : > { %v1103_v17 = vsel %vm8051_vm2, %v1089_v1, %v1091_v46  ;;  %v1008_v9 = vsel %vm8065_vm12, %v993_v29, %v995_v50 }
 0x24f   : > { %1558 = vrot.lane.b32.xlu1 %v5899_v41, %s8143_s14  ;;  %1654 = vrot.lane.b32.xlu0 %v5932_v34, %s8114_s15  ;;  %v1019_v46 = vrot.slane %v1008_v9, 4 }
 0x251   : > { %v6172_v23 = vpop.permute.xlu1 %964  ;;  %v1087_v49 = vpop.permute.xlu0 %1086 }
 0x253   : > { %1652 = vrot.lane.b32.xlu1 %v5853_v18, %s8114_s15  ;;  %1556 = vrot.lane.b32.xlu0 %v5815_v30, %s8143_s14 }
 0x255   : > { %v1057_v2 = vpop.permute.xlu1 %1056  ;;  %v963_v32 = vpop.permute.xlu0 %962 }
 0x256   : > { %v976_v4 = vsel %vm8056_vm0, %v963_v32, %v6172_v23 }
 0x257   : > { %v1037_v22 = vsel %vm8333_vm10, %v976_v4, %v1021_v31  ;;  %1528 = vrot.lane.b32.xlu1 %v5932_v34, %s8139_s12  ;;  %1650 = vrot.lane.b32.xlu0 %v5899_v41, %s8114_s15  ;;  %vm8067_vm10 = vcmask 883712   ;;  %v1115_v31 = vrot.slane %v1104_v5, 4  ;;  %v1114_v5 = vrot.slane %v1103_v17, 4 }
 0x259   : > { %v6187_v58 = vpop.permute.xlu1 %1084  ;;  %v6189_v51 = vpop.permute.xlu0 %990 }
 0x25a   : > { %v1101_v24 = vsel %vm8051_vm2, %v6187_v58, %v1087_v49 }
 0x25b   : > { %1620 = vrot.lane.b32.xlu1 %v5932_v34, %s8119_s11  ;;  %1526 = vrot.lane.b32.xlu0 %v5853_v18, %s8139_s12 }
 0x25d   : > { %v961_v4 = vpop.permute.xlu1 %960  ;;  %v6198_v63 = vpop.permute.xlu0 %1058 }
 0x25e   : > { %v975_v10 = vsel %vm8056_vm0, %v961_v4, %v963_v32  ;;  %v1070_v35 = vsel %vm8067_vm10, %v1057_v2, %v6198_v63  ;;  %v1102_v32 = vsel %vm8051_vm2, %v1087_v49, %v1089_v1  ;;  %v1112_v1 = vrot.slane %v1101_v24, 4  ;;  %vm8338_vm2 = vmmov %vm8335_vm4 }
 0x25f   : > { %v1036_v7 = vsel %vm8334_vm15, %v975_v10, %v1020_v52  ;;  %v1131_v59 = vsel %vm8335_vm4, %v1070_v35, %v1115_v31  ;;  %1648 = vrot.lane.b32.xlu1 %v5815_v30, %s8114_s15  ;;  %1554 = vrot.lane.b32.xlu0 %v5857_v13, %s8143_s14  ;;  %vm8336_vm15 = vmmov %vm8335_vm4 }
 0x260   : > { %v4370_v26 = vpack.c.bf16 %v1131_v59, %v1037_v22  ;;  %v1113_v59 = vrot.slane %v1102_v32, 4 }
 0x261   : > { %v1055_v39 = vpop.permute.xlu1 %1054  ;;  %v959_v50 = vpop.permute.xlu0 %958 }
 0x262   : > { %v1069_v10 = vsel %vm8067_vm10, %v1055_v39, %v1057_v2  ;;  %v974_v35 = vsel %vm8056_vm0, %v959_v50, %v961_v4  ;;  %4371 = vmatprep.subr.bf16.mxu1 %v4370_v26  ;;  %v1007_v2 = vsel %vm8065_vm12, %v6189_v51, %v993_v29  ;;  %vm8340_vm12 = vcmask 1043456  }
 0x263   : > { %v1130_v52 = vsel %vm8336_vm15, %v1069_v10, %v1114_v5  ;;  %v1035_v31 = vsel %vm8335_vm4, %v974_v35, %v1019_v46  ;;  %1524 = vrot.lane.b32.xlu1 %v5899_v41, %s8139_s12  ;;  %1622 = vrot.lane.b32.xlu0 %v5903_v42, %s8119_s11  ;;  %vm8337_vm15 = vmmov %vm8335_vm4 }
 0x264   : > { %v4372_v17 = vpack.c.bf16 %v1130_v52, %v1036_v7  ;;  %v1018_v7 = vrot.slane %v1007_v2, 4 }
 0x265   : > { %v6222_v22 = vpop.permute.xlu1 %1050  ;;  %v1053_v49 = vpop.permute.xlu0 %1052 }
 0x266   : > { %v1067_v4 = vsel %vm8067_vm10, %v6222_v22, %v1053_v49  ;;  %v1068_v9 = vsel %vm8067_vm10, %v1053_v49, %v1055_v39  ;;  %4373 = vmatpush1.bf16.msra.mxu1 %v4372_v17  ;;  %vm8341_vm10 = vmmov %vm8340_vm12 }
 0x267   : > { %v1128_v26 = vsel %vm8337_vm15, %v1067_v4, %v1112_v1  ;;  %v1129_v5 = vsel %vm8335_vm4, %v1068_v9, %v1113_v59  ;;  %1618 = vrot.lane.b32.xlu1 %v5853_v18, %s8119_s11  ;;  %1522 = vrot.lane.b32.xlu0 %v5815_v30, %s8139_s12  ;;  %vm8082_vm15 = vcmask 867328   ;;  %vm8076_vm4 = vcmask 211968  }
 0x268   : > { %v4340_v24 = vpack.c.bf16 %v1129_v5, %v1035_v31 }
 0x269   : > { %v6235_v46 = vpop.permute.xlu1 %1186  ;;  %v6237_v29 = vpop.permute.xlu0 %956 }
 0x26a   : > { %v973_v39 = vsel %vm8056_vm0, %v6237_v29, %v959_v50  ;;  %4341 = vmatprep.subr.bf16.mxu0 %v4340_v24  ;;  %vm8339_vm0 = vcmask 1043456  }
 0x26b   : > { %v1034_v32 = vsel %vm8338_vm2, %v973_v39, %v1018_v7  ;;  %1614 = vrot.lane.b32.xlu1 %v5815_v30, %s8119_s11  ;;  %1616 = vrot.lane.b32.xlu0 %v5899_v41, %s8119_s11  ;;  %vm8084_vm2 = vcmask 228352  }
 0x26c   : > { %v4342_v10 = vpack.c.bf16 %v1128_v26, %v1034_v32 }
 0x26d   : > { %v6246_v35 = vpop.permute.xlu1 %1280  ;;  %v1185_v52 = vpop.permute.xlu0 %1184 }
 0x26e   : > { %4343 = vmatpush1.bf16.msra.mxu0 %v4342_v10  ;;  %v1198_v2 = vsel %vm8084_vm2, %v1185_v52, %v6235_v46 }
 0x26f   : > { %1750 = vrot.lane.b32.xlu1 %v5903_v42, %s8125_s8  ;;  %1520 = vrot.lane.b32.xlu0 %v5857_v13, %s8139_s12  ;;  %v1209_v4 = vrot.slane %v1198_v2, 4 }
 0x271   : > { %v1183_v50 = vpop.permute.xlu1 %1182  ;;  %v1279_v31 = vpop.permute.xlu0 %1278 }
 0x272   : > { %v1197_v32 = vsel %vm8084_vm2, %v1183_v50, %v1185_v52  ;;  %v1292_v10 = vsel %vm8076_vm4, %v1279_v31, %v6246_v35 }
 0x273   : > { %1844 = vrot.lane.b32.xlu1 %v5903_v42, %s8072_s7  ;;  %1748 = vrot.lane.b32.xlu0 %v5932_v34, %s8125_s8  ;;  %v1208_v2 = vrot.slane %v1197_v32, 4 }
 0x275   : > { %v1277_v17 = vpop.permute.xlu1 %1276  ;;  %v1181_v59 = vpop.permute.xlu0 %1180 }
 0x276   : > { %v1291_v54 = vsel %vm8076_vm4, %v1277_v17, %v1279_v31  ;;  %v1196_v52 = vsel %vm8084_vm2, %v1181_v59, %v1183_v50 }
 0x277   : > { %1746 = vrot.lane.b32.xlu1 %v5853_v18, %s8125_s8  ;;  %1842 = vrot.lane.b32.xlu0 %v5932_v34, %s8072_s7  ;;  %v1207_v31 = vrot.slane %v1196_v52, 4 }
 0x279   : > { %v6260_v1 = vpop.permute.xlu1 %1152  ;;  %v1275_v49 = vpop.permute.xlu0 %1274 }
 0x27b   : > { %1840 = vrot.lane.b32.xlu1 %v5853_v18, %s8072_s7  ;;  %1744 = vrot.lane.b32.xlu0 %v5899_v41, %s8125_s8 }
 0x27d   : > { %v1245_v9 = vpop.permute.xlu1 %1244  ;;  %v1151_v26 = vpop.permute.xlu0 %1150 }
 0x27e   : > { %v1164_v5 = vsel %vm8082_vm15, %v1151_v26, %v6260_v1 }
 0x27f   : > { %v1225_v24 = vsel %vm8339_vm0, %v1164_v5, %v1209_v4  ;;  %1716 = vrot.lane.b32.xlu1 %v5903_v42, %s8077_s28  ;;  %1838 = vrot.lane.b32.xlu0 %v5899_v41, %s8072_s7  ;;  %vm8071_vm0 = vcmask 220160   ;;  %v1303_v4 = vrot.slane %v1292_v10, 4  ;;  %v1302_v10 = vrot.slane %v1291_v54, 4 }
 0x281   : > { %v6275_v7 = vpop.permute.xlu1 %1272  ;;  %v6277_v39 = vpop.permute.xlu0 %1178 }
 0x282   : > { %v1289_v48 = vsel %vm8076_vm4, %v6275_v7, %v1275_v49 }
 0x283   : > { %1808 = vrot.lane.b32.xlu1 %v5932_v34, %s8074_s27  ;;  %1714 = vrot.lane.b32.xlu0 %v5932_v34, %s8077_s28 }
 0x285   : > { %v1149_v5 = vpop.permute.xlu1 %1148  ;;  %v6286_v8 = vpop.permute.xlu0 %1246 }
 0x286   : > { %v1163_v6 = vsel %vm8082_vm15, %v1149_v5, %v1151_v26  ;;  %v1258_v0 = vsel %vm8071_vm0, %v1245_v9, %v6286_v8  ;;  %v1290_v26 = vsel %vm8076_vm4, %v1275_v49, %v1277_v17  ;;  %v1300_v17 = vrot.slane %v1289_v48, 4 }
 0x287   : > { %v1224_v57 = vsel %vm8340_vm12, %v1163_v6, %v1208_v2  ;;  %v1319_v25 = vsel %vm8341_vm10, %v1258_v0, %v1303_v4  ;;  %1836 = vrot.lane.b32.xlu1 %v5815_v30, %s8072_s7  ;;  %1742 = vrot.lane.b32.xlu0 %v5815_v30, %s8125_s8  ;;  %vm8342_vm12 = vmmov %vm8341_vm10  ;;  %v1301_v54 = vrot.slane %v1290_v26, 4  ;;  %s5180_s7 = smov 35   ;;  %vm8345_vm4 = vcmask 1043456  }
 0x288   : > { %v4374_v32 = vpack.c.bf16 %v1319_v25, %v1225_v24 }
 0x289   : > { %v1243_v19 = vpop.permute.xlu1 %1242  ;;  %v1147_v50 = vpop.permute.xlu0 %1146 }
 0x28a   : > { %v1257_v6 = vsel %vm8071_vm0, %v1243_v19, %v1245_v9  ;;  %v1162_v0 = vsel %vm8082_vm15, %v1147_v50, %v1149_v5  ;;  %4375 = vmatprep.subr.bf16.mxu1 %v4374_v32  ;;  %v1195_v9 = vsel %vm8084_vm2, %v6277_v39, %v1181_v59 }
 0x28b   : > { %v1318_v2 = vsel %vm8342_vm12, %v1257_v6, %v1302_v10  ;;  %v1223_v4 = vsel %vm8341_vm10, %v1162_v0, %v1207_v31  ;;  %1712 = vrot.lane.b32.xlu1 %v5853_v18, %s8077_s28  ;;  %1810 = vrot.lane.b32.xlu0 %v5903_v42, %s8074_s27  ;;  %vm8343_vm12 = vmmov %vm8341_vm10 }
 0x28c   : > { %v4376_v25 = vpack.c.bf16 %v1318_v2, %v1224_v57  ;;  %v1206_v57 = vrot.slane %v1195_v9, 4 }
 0x28d   : > { %v6310_v24 = vpop.permute.xlu1 %1238  ;;  %v1241_v49 = vpop.permute.xlu0 %1240 }
 0x28e   : > { %v1255_v5 = vsel %vm8071_vm0, %v6310_v24, %v1241_v49  ;;  %v1256_v52 = vsel %vm8071_vm0, %v1241_v49, %v1243_v19  ;;  %4377 = vmatpush1.bf16.msra.mxu1 %v4376_v25  ;;  %vm8344_vm0 = vmmov %vm8341_vm10 }
 0x28f   : > { %v1316_v32 = vsel %vm8343_vm12, %v1255_v5, %v1300_v17  ;;  %v1317_v10 = vsel %vm8341_vm10, %v1256_v52, %v1301_v54  ;;  %1806 = vrot.lane.b32.xlu1 %v5853_v18, %s8074_s27  ;;  %1710 = vrot.lane.b32.xlu0 %v5899_v41, %s8077_s28  ;;  %vm8093_vm12 = vcmask 146432   ;;  %vm8089_vm10 = vcmask 64512  }
 0x290   : > { %v4344_v48 = vpack.c.bf16 %v1317_v10, %v1223_v4 }
 0x291   : > { %v6323_v31 = vpop.permute.xlu1 %1374  ;;  %v6325_v59 = vpop.permute.xlu0 %1144 }
 0x292   : > { %v1161_v19 = vsel %vm8082_vm15, %v6325_v59, %v1147_v50  ;;  %4345 = vmatprep.subr.bf16.mxu0 %v4344_v48  ;;  %vm8346_vm15 = vcmask 1043456  }
 0x293   : > { %v1222_v26 = vsel %vm8344_vm0, %v1161_v19, %v1206_v57  ;;  %1802 = vrot.lane.b32.xlu1 %v5815_v30, %s8074_s27  ;;  %1804 = vrot.lane.b32.xlu0 %v5899_v41, %s8074_s27  ;;  %vm8095_vm0 = vcmask 138240   ;;  %s8137_s27 = smov 36   ;;  %vm8347_vm2 = vmmov %vm8346_vm15 }
 0x294   : > { %v4346_v6 = vpack.c.bf16 %v1316_v32, %v1222_v26 }
 0x295   : > { %v6334_v0 = vpop.permute.xlu1 %1468  ;;  %v1373_v2 = vpop.permute.xlu0 %1372 }
 0x296   : > { %4347 = vmatpush1.bf16.msra.mxu0 %v4346_v6  ;;  %v1386_v9 = vsel %vm8095_vm0, %v1373_v2, %v6323_v31 }
 0x297   : > { %1938 = vrot.lane.b32.xlu1 %v5903_v42, %s5180_s7  ;;  %1708 = vrot.lane.b32.xlu0 %v5815_v30, %s8077_s28  ;;  %v1397_v5 = vrot.slane %v1386_v9, 4  ;;  %s5182_s28 = smov 34  }
 0x299   : > { %v1371_v50 = vpop.permute.xlu1 %1370  ;;  %v1467_v4 = vpop.permute.xlu0 %1466 }
 0x29a   : > { %v1385_v26 = vsel %vm8095_vm0, %v1371_v50, %v1373_v2  ;;  %v1480_v6 = vsel %vm8089_vm10, %v1467_v4, %v6334_v0 }
 0x29b   : > { %1934 = vrot.lane.b32.xlu1 %v5853_v18, %s5180_s7  ;;  %1936 = vrot.lane.b32.xlu0 %v5932_v34, %s5180_s7  ;;  %v1491_v9 = vrot.slane %v1480_v6, 4 }
 0x29d   : > { %v1465_v25 = vpop.permute.xlu1 %1464  ;;  %v1369_v54 = vpop.permute.xlu0 %1368 }
 0x29e   : > { %v1479_v45 = vsel %vm8089_vm10, %v1465_v25, %v1467_v4  ;;  %v1384_v15 = vsel %vm8095_vm0, %v1369_v54, %v1371_v50 }
 0x29f   : > { %1904 = vrot.lane.b32.xlu1 %v5903_v42, %s8137_s27  ;;  %1932 = vrot.lane.b32.xlu0 %v5899_v41, %s5180_s7  ;;  %v1490_v6 = vrot.slane %v1479_v45, 4  ;;  %v1395_v4 = vrot.slane %v1384_v15, 4 }
 0x2a1   : > { %v6348_v17 = vpop.permute.xlu1 %1340  ;;  %v1463_v49 = vpop.permute.xlu0 %1462 }
 0x2a3   : > { %1898 = vrot.lane.b32.xlu1 %v5899_v41, %s8137_s27  ;;  %1902 = vrot.lane.b32.xlu0 %v5932_v34, %s8137_s27 }
 0x2a5   : > { %v1433_v52 = vpop.permute.xlu1 %1432  ;;  %v1339_v32 = vpop.permute.xlu0 %1338 }
 0x2a6   : > { %v1352_v10 = vsel %vm8093_vm12, %v1339_v32, %v6348_v17 }
 0x2a7   : > { %v1413_v48 = vsel %vm8345_vm4, %v1352_v10, %v1397_v5  ;;  %1996 = vrot.lane.b32.xlu1 %v5932_v34, %s5182_s28  ;;  %1930 = vrot.lane.b32.xlu0 %v5815_v30, %s5180_s7  ;;  %vm8088_vm4 = vcmask 130048   ;;  %v1396_v34 = vrot.slane %v1385_v26, 4 }
 0x2a9   : > { %v6363_v57 = vpop.permute.xlu1 %1460  ;;  %v6365_v19 = vpop.permute.xlu0 %1366 }
 0x2aa   : > { %v1477_v12 = vsel %vm8089_vm10, %v6363_v57, %v1463_v49 }
 0x2ab   : > { %910 = vrot.lane.b32.xlu1 %v5941_v40, %s5159_s17  ;;  %1900 = vrot.lane.b32.xlu0 %v5853_v18, %s8137_s27  ;;  %v1488_v45 = vrot.slane %v1477_v12, 4 }
 0x2ad   : > { %v1337_v5 = vpop.permute.xlu1 %1336  ;;  %v6374_v10 = vpop.permute.xlu0 %1434 }
 0x2ae   : > { %v1351_v2 = vsel %vm8093_vm12, %v1337_v5, %v1339_v32  ;;  %v1446_v20 = vsel %vm8088_vm4, %v1433_v52, %v6374_v10  ;;  %v1478_v32 = vsel %vm8089_vm10, %v1463_v49, %v1465_v25  ;;  %vm8350_vm10 = vcmask 1043456  }
 0x2af   : > { %v1412_v21 = vsel %vm8346_vm15, %v1351_v2, %v1396_v34  ;;  %v1507_v3 = vsel %vm8347_vm2, %v1446_v20, %v1491_v9  ;;  %1992 = vrot.lane.b32.xlu1 %v5899_v41, %s5182_s28  ;;  %1998 = vrot.lane.b32.xlu0 %v5903_v42, %s5182_s28  ;;  %vm8348_vm15 = vmmov %vm8347_vm2  ;;  %v1489_v15 = vrot.slane %v1478_v32, 4 }
 0x2b0   : > { %v4378_v26 = vpack.c.bf16 %v1507_v3, %v1413_v48 }
 0x2b1   : > { %v1431_v47 = vpop.permute.xlu1 %1430  ;;  %v1335_v50 = vpop.permute.xlu0 %1334 }
 0x2b2   : > { %v1445_v34 = vsel %vm8088_vm4, %v1431_v47, %v1433_v52  ;;  %v1350_v20 = vsel %vm8093_vm12, %v1335_v50, %v1337_v5  ;;  %4379 = vmatprep.subr.bf16.mxu1 %v4378_v26  ;;  %v1383_v52 = vsel %vm8095_vm0, %v6365_v19, %v1369_v54 }
 0x2b3   : > { %v1506_v41 = vsel %vm8347_vm2, %v1445_v34, %v1490_v6  ;;  %v1411_v9 = vsel %vm8348_vm15, %v1350_v20, %v1395_v4  ;;  %906 = vrot.lane.b32.xlu1 %v5903_v42, %s5159_s17  ;;  %1896 = vrot.lane.b32.xlu0 %v5815_v30, %s8137_s27  ;;  %vm8349_vm15 = vmmov %vm8347_vm2  ;;  %v8090_v4 = vmov 0.0  }
 0x2b4   : > { %v4380_v3 = vpack.c.bf16 %v1506_v41, %v1412_v21  ;;  %v1394_v21 = vrot.slane %v1383_v52, 4  ;;  %2242 = vmatprep.mubr.f32.mxu0 %v8090_v4  ;;  %2313 = vmatprep.mubr.f32.mxu1 %v8090_v4 }
 0x2b5   : > { %v6398_v25 = vpop.permute.xlu1 %1426  ;;  %v1429_v49 = vpop.permute.xlu0 %1428 }
 0x2b6   : > { %v1443_v48 = vsel %vm8088_vm4, %v6398_v25, %v1429_v49  ;;  %v1444_v5 = vsel %vm8088_vm4, %v1429_v49, %v1431_v47  ;;  %4381 = vmatpush1.bf16.msra.mxu1 %v4380_v3  ;;  %vm8100_vm4 = vcmask 449536  }
 0x2b7   : > { %v1504_v2 = vsel %vm8347_vm2, %v1443_v48, %v1488_v45  ;;  %v1505_v26 = vsel %vm8349_vm15, %v1444_v5, %v1489_v15  ;;  %1990 = vrot.lane.b32.xlu1 %v5815_v30, %s5182_s28  ;;  %1994 = vrot.lane.b32.xlu0 %v5853_v18, %s5182_s28  ;;  %vm8107_vm15 = vcmask 48128  }
 0x2b8   : > { %v4348_v12 = vpack.c.bf16 %v1505_v26, %v1411_v9 }
 0x2b9   : > { %v6411_v6 = vpop.permute.xlu1 %1562  ;;  %v6413_v54 = vpop.permute.xlu0 %1332 }
 0x2ba   : > { %v1349_v47 = vsel %vm8093_vm12, %v6413_v54, %v1335_v50  ;;  %4349 = vmatprep.subr.bf16.mxu0 %v4348_v12  ;;  %vm8351_vm12 = vcmask 1043456  }
 0x2bb   : > { %v1410_v30 = vsel %vm8347_vm2, %v1349_v47, %v1394_v21  ;;  %872 = vrot.lane.b32.xlu1 %v5903_v42, %s5158_s16  ;;  %908 = vrot.lane.b32.xlu0 %v5957_v62, %s5159_s17  ;;  %vm8105_vm2 = vcmask 56320   ;;  %vm8352_vm0 = vmmov %vm8351_vm12 }
 0x2bc   : > { %v4350_v18 = vpack.c.bf16 %v1504_v2, %v1410_v30 }
 0x2bd   : > { %v6424_v32 = vpop.permute.xlu1 %1656  ;;  %v1561_v34 = vpop.permute.xlu0 %1560 }
 0x2be   : > { %4351 = vmatpush1.bf16.msra.mxu0 %v4350_v18  ;;  %v1574_v45 = vsel %vm8107_vm15, %v1561_v34, %v6411_v6 }
 0x2bf   : > { %1004 = vrot.lane.b32.xlu1 %v5941_v40, %s5160_s18  ;;  %876 = vrot.lane.b32.xlu0 %v5941_v40, %s5158_s16  ;;  %v1585_v49 = vrot.slane %v1574_v45, 4 }
 0x2c1   : > { %v1559_v50 = vpop.permute.xlu1 %1558  ;;  %v1655_v20 = vpop.permute.xlu0 %1654 }
 0x2c2   : > { %v1573_v21 = vsel %vm8107_vm15, %v1559_v50, %v1561_v34  ;;  %v1666_v47 = vsel %vm8100_vm4, %v1655_v20, %v6424_v32 }
 0x2c3   : > { %1000 = vrot.lane.b32.xlu1 %v5903_v42, %s5160_s18  ;;  %874 = vrot.lane.b32.xlu0 %v5957_v62, %s5158_s16  ;;  %v1584_v30 = vrot.slane %v1573_v21, 4  ;;  %v1679_v18 = vrot.slane %v1666_v47, 4 }
 0x2c5   : > { %v1653_v41 = vpop.permute.xlu1 %1652  ;;  %v1557_v9 = vpop.permute.xlu0 %1556 }
 0x2c6   : > { %v1572_v4 = vsel %vm8107_vm15, %v1557_v9, %v1559_v50 }
 0x2c7   : > { %1094 = vrot.lane.b32.xlu1 %v5903_v42, %s5161_s19  ;;  %1098 = vrot.lane.b32.xlu0 %v5941_v40, %s5161_s19 }
 0x2c9   : > { %v6438_v3 = vpop.permute.xlu1 %1528  ;;  %v1651_v15 = vpop.permute.xlu0 %1650 }
 0x2cb   : > { %970 = vrot.lane.b32.xlu1 %v5941_v40, %s5162_s20  ;;  %1002 = vrot.lane.b32.xlu0 %v5957_v62, %s5160_s18 }
 0x2cd   : > { %v1621_v52 = vpop.permute.xlu1 %1620  ;;  %v1527_v48 = vpop.permute.xlu0 %1526 }
 0x2ce   : > { %v1540_v5 = vsel %vm8105_vm2, %v1527_v48, %v6438_v3 }
 0x2cf   : > { %v1601_v2 = vsel %vm8350_vm10, %v1540_v5, %v1585_v49  ;;  %966 = vrot.lane.b32.xlu1 %v5903_v42, %s5162_s20  ;;  %1096 = vrot.lane.b32.xlu0 %v5957_v62, %s5161_s19  ;;  %vm8099_vm10 = vcmask 457728   ;;  %v1665_v5 = vsel %vm8100_vm4, %v1653_v41, %v1655_v20  ;;  %v1583_v20 = vrot.slane %v1572_v4, 4 }
 0x2d0   : > { %v1678_v47 = vrot.slane %v1665_v5, 4 }
 0x2d1   : > { %v6453_v26 = vpop.permute.xlu1 %1648  ;;  %v6455_v12 = vpop.permute.xlu0 %1554 }
 0x2d2   : > { %v1663_v56 = vsel %vm8100_vm4, %v6453_v26, %v1651_v15 }
 0x2d3   : > { %1060 = vrot.lane.b32.xlu1 %v5903_v42, %s5163_s23  ;;  %1064 = vrot.lane.b32.xlu0 %v5941_v40, %s5163_s23 }
 0x2d5   : > { %v1525_v45 = vpop.permute.xlu1 %1524  ;;  %v6464_v49 = vpop.permute.xlu0 %1622 }
 0x2d6   : > { %v1539_v34 = vsel %vm8105_vm2, %v1525_v45, %v1527_v48  ;;  %v1632_v28 = vsel %vm8099_vm10, %v1621_v52, %v6464_v49  ;;  %v1664_v48 = vsel %vm8100_vm4, %v1651_v15, %v1653_v41  ;;  %v1676_v41 = vrot.slane %v1663_v56, 4 }
 0x2d7   : > { %v1600_v27 = vsel %vm8351_vm12, %v1539_v34, %v1584_v30  ;;  %v1695_v55 = vsel %vm8352_vm0, %v1632_v28, %v1679_v18  ;;  %1192 = vrot.lane.b32.xlu1 %v5941_v40, %s5164_s24  ;;  %968 = vrot.lane.b32.xlu0 %v5957_v62, %s5162_s20  ;;  %vm8353_vm12 = vmmov %vm8352_vm0  ;;  %v1677_v4 = vrot.slane %v1664_v48, 4  ;;  %vm8358_vm4 = vcmask 1043456  }
 0x2d8   : > { %v4382_v21 = vpack.c.bf16 %v1695_v55, %v1601_v2 }
 0x2d9   : > { %v1619_v43 = vpop.permute.xlu1 %1618  ;;  %v1523_v50 = vpop.permute.xlu0 %1522 }
 0x2da   : > { %v1631_v30 = vsel %vm8099_vm10, %v1619_v43, %v1621_v52  ;;  %v1538_v28 = vsel %vm8105_vm2, %v1523_v50, %v1525_v45  ;;  %4383 = vmatprep.subr.bf16.mxu1 %v4382_v21  ;;  %v1571_v52 = vsel %vm8107_vm15, %v6455_v12, %v1557_v9 }
 0x2db   : > { %v1694_v18 = vsel %vm8352_vm0, %v1631_v30, %v1678_v47  ;;  %v1599_v34 = vsel %vm8353_vm12, %v1538_v28, %v1583_v20  ;;  %1188 = vrot.lane.b32.xlu1 %v5903_v42, %s5164_s24  ;;  %1062 = vrot.lane.b32.xlu0 %v5957_v62, %s5163_s23  ;;  %vm8354_vm12 = vmmov %vm8352_vm0 }
 0x2dc   : > { %v4384_v55 = vpack.c.bf16 %v1694_v18, %v1600_v27  ;;  %v1582_v27 = vrot.slane %v1571_v52, 4 }
 0x2dd   : > { %v6488_v2 = vpop.permute.xlu1 %1614  ;;  %v1617_v15 = vpop.permute.xlu0 %1616 }
 0x2de   : > { %v1629_v45 = vsel %vm8099_vm10, %v6488_v2, %v1617_v15  ;;  %v1630_v5 = vsel %vm8099_vm10, %v1617_v15, %v1619_v43  ;;  %4385 = vmatpush1.bf16.msra.mxu1 %v4384_v55  ;;  %vm8355_vm10 = vmmov %vm8352_vm0 }
 0x2df   : > { %v1692_v21 = vsel %vm8352_vm0, %v1629_v45, %v1676_v41  ;;  %v1693_v47 = vsel %vm8354_vm12, %v1630_v5, %v1677_v4  ;;  %1282 = vrot.lane.b32.xlu1 %v5903_v42, %s5165_s25  ;;  %1286 = vrot.lane.b32.xlu0 %v5941_v40, %s5165_s25  ;;  %vm8113_vm0 = vcmask 441344   ;;  %vm8112_vm12 = vcmask 359424  }
 0x2e0   : > { %v4352_v56 = vpack.c.bf16 %v1693_v47, %v1599_v34 }
 0x2e1   : > { %v6501_v20 = vpop.permute.xlu1 %1750  ;;  %v6503_v9 = vpop.permute.xlu0 %1520 }
 0x2e2   : > { %v1537_v43 = vsel %vm8105_vm2, %v6503_v9, %v1523_v50  ;;  %4353 = vmatprep.subr.bf16.mxu0 %v4352_v56  ;;  %vm8360_vm2 = vcmask 1043456  }
 0x2e3   : > { %v1598_v48 = vsel %vm8355_vm10, %v1537_v43, %v1582_v27  ;;  %1158 = vrot.lane.b32.xlu1 %v5941_v40, %s5166_s26  ;;  %1190 = vrot.lane.b32.xlu0 %v5957_v62, %s5164_s24  ;;  %vm8123_vm10 = vcmask 375808   ;;  %vm8361_vm15 = vmmov %vm8360_vm2 }
 0x2e4   : > { %v4354_v30 = vpack.c.bf16 %v1692_v21, %v1598_v48 }
 0x2e5   : > { %v6512_v28 = vpop.permute.xlu1 %1844  ;;  %v1749_v18 = vpop.permute.xlu0 %1748 }
 0x2e6   : > { %8356 = vst [vmem:[#allocation52_spill] sm:$0xff] %v6512_v28  ;;  %4355 = vmatpush1.bf16.msra.mxu0 %v4354_v30  ;;  %v1760_v52 = vsel %vm8123_vm10, %v1749_v18, %v6501_v20 }
 0x2e7   : > { %1154 = vrot.lane.b32.xlu1 %v5903_v42, %s5166_s26  ;;  %1284 = vrot.lane.b32.xlu0 %v5957_v62, %s5165_s25  ;;  %v1773_v45 = vrot.slane %v1760_v52, 4 }
 0x2e9   : > { %v1747_v50 = vpop.permute.xlu1 %1746  ;;  %v1843_v34 = vpop.permute.xlu0 %1842 }
 0x2ea   : > { %v1759_v48 = vsel %vm8123_vm10, %v1747_v50, %v1749_v18  ;;  %v1854_v30 = vsel %vm8112_vm12, %v1843_v34, %v6512_v28 }
 0x2eb   : > { %1248 = vrot.lane.b32.xlu1 %v5903_v42, %s8145_s29  ;;  %1252 = vrot.lane.b32.xlu0 %v5941_v40, %s8145_s29  ;;  %v1772_v52 = vrot.slane %v1759_v48, 4 }
 0x2ed   : > { %v1841_v55 = vpop.permute.xlu1 %1840  ;;  %v1745_v4 = vpop.permute.xlu0 %1744 }
 0x2ee   : > { %v1853_v38 = vsel %vm8112_vm12, %v1841_v55, %v1843_v34  ;;  %v1758_v36 = vsel %vm8123_vm10, %v1745_v4, %v1747_v50 }
 0x2ef   : > { %1380 = vrot.lane.b32.xlu1 %v5941_v40, %s8130_s30  ;;  %1156 = vrot.lane.b32.xlu0 %v5957_v62, %s5166_s26  ;;  %v1771_v34 = vrot.slane %v1758_v36, 4 }
 0x2f1   : > { %v6526_v41 = vpop.permute.xlu1 %1716  ;;  %v1839_v15 = vpop.permute.xlu0 %1838 }
 0x2f2   : > { %8357 = vst [vmem:[#allocation53_spill] sm:$0xff] %v6526_v41 }
 0x2f3   : > { %1376 = vrot.lane.b32.xlu1 %v5903_v42, %s8130_s30  ;;  %1250 = vrot.lane.b32.xlu0 %v5957_v62, %s8145_s29 }
 0x2f5   : > { %v1809_v5 = vpop.permute.xlu1 %1808  ;;  %v1715_v21 = vpop.permute.xlu0 %1714 }
 0x2f6   : > { %v1726_v47 = vsel %vm8113_vm0, %v1715_v21, %v6526_v41 }
 0x2f7   : > { %v1789_v56 = vsel %vm8358_vm4, %v1726_v47, %v1773_v45  ;;  %1470 = vrot.lane.b32.xlu1 %v5903_v42, %s5169_s9  ;;  %1474 = vrot.lane.b32.xlu0 %v5941_v40, %s5169_s9  ;;  %vm8111_vm4 = vcmask 367616   ;;  %v1867_v45 = vrot.slane %v1854_v30, 4  ;;  %v1866_v30 = vrot.slane %v1853_v38, 4 }
 0x2f9   : > { %v6541_v27 = vpop.permute.xlu1 %1836  ;;  %v6543_v43 = vpop.permute.xlu0 %1742 }
 0x2fb   : > { %1346 = vrot.lane.b32.xlu1 %v5941_v40, %s8132_s10  ;;  %1378 = vrot.lane.b32.xlu0 %v5957_v62, %s8130_s30  ;;  %s8530_s30 = smov 1  }
 0x2fd   : > { %v1713_v47 = vpop.permute.xlu1 %1712  ;;  %v6552_v44 = vpop.permute.xlu0 %1810 }
 0x2fe   : > { %8359 = vst [vmem:[#allocation54_spill] sm:$0xff] %v6552_v44  ;;  %v1725_v18 = vsel %vm8113_vm0, %v1713_v47, %v1715_v21  ;;  %v1820_v37 = vsel %vm8111_vm4, %v1809_v5, %v6552_v44  ;;  %v1852_v21 = vsel %vm8112_vm12, %v1839_v15, %v1841_v55  ;;  %v1851_v44 = vsel %vm8112_vm12, %v6541_v27, %v1839_v15  ;;  %vm8368_vm12 = vmmov %vm8360_vm2 }
 0x2ff   : > { %v1788_v33 = vsel %vm8360_vm2, %v1725_v18, %v1772_v52  ;;  %v1883_v41 = vsel %vm8361_vm15, %v1820_v37, %v1867_v45  ;;  %1342 = vrot.lane.b32.xlu1 %v5903_v42, %s8132_s10  ;;  %1472 = vrot.lane.b32.xlu0 %v5957_v62, %s5169_s9  ;;  %vm8362_vm15 = vmmov %vm8360_vm2  ;;  %v1865_v38 = vrot.slane %v1852_v21, 4  ;;  %v1864_v55 = vrot.slane %v1851_v44, 4 }
 0x300   : > { %v4386_v48 = vpack.c.bf16 %v1883_v41, %v1789_v56 }
 0x301   : > { %v1807_v28 = vpop.permute.xlu1 %1806  ;;  %v1711_v50 = vpop.permute.xlu0 %1710 }
 0x302   : > { %v1819_v52 = vsel %vm8111_vm4, %v1807_v28, %v1809_v5  ;;  %v1724_v37 = vsel %vm8113_vm0, %v1711_v50, %v1713_v47  ;;  %4387 = vmatprep.subr.bf16.mxu1 %v4386_v48  ;;  %v1757_v5 = vsel %vm8123_vm10, %v6543_v43, %v1745_v4 }
 0x303   : > { %v1882_v45 = vsel %vm8362_vm15, %v1819_v52, %v1866_v30  ;;  %v1787_v18 = vsel %vm8360_vm2, %v1724_v37, %v1771_v34  ;;  %1436 = vrot.lane.b32.xlu1 %v5903_v42, %s8141_s13  ;;  %1440 = vrot.lane.b32.xlu0 %v5941_v40, %s8141_s13  ;;  %vm8363_vm15 = vmmov %vm8360_vm2  ;;  %v1770_v44 = vrot.slane %v1757_v5, 4 }
 0x304   : > { %v4388_v36 = vpack.c.bf16 %v1882_v45, %v1788_v33 }
 0x305   : > { %v6576_v41 = vpop.permute.xlu1 %1802  ;;  %v1805_v15 = vpop.permute.xlu0 %1804 }
 0x306   : > { %v1817_v56 = vsel %vm8111_vm4, %v6576_v41, %v1805_v15  ;;  %v1818_v47 = vsel %vm8111_vm4, %v1805_v15, %v1807_v28  ;;  %4389 = vmatpush1.bf16.msra.mxu1 %v4388_v36  ;;  %vm8365_vm4 = vmmov %vm8360_vm2 }
 0x307   : > { %v1880_v48 = vsel %vm8363_vm15, %v1817_v56, %v1864_v55  ;;  %v1881_v30 = vsel %vm8360_vm2, %v1818_v47, %v1865_v38  ;;  %1568 = vrot.lane.b32.xlu1 %v5941_v40, %s8143_s14  ;;  %1344 = vrot.lane.b32.xlu0 %v5957_v62, %s8132_s10  ;;  %vm8118_vm15 = vcmask 285696   ;;  %s8531_s10 = smov 2  }
 0x308   : > { %v4356_v33 = vpack.c.bf16 %v1881_v30, %v1787_v18 }
 0x309   : > { %v6589_v34 = vpop.permute.xlu1 %1938  ;;  %v6591_v4 = vpop.permute.xlu0 %1708 }
 0x30a   : > { %8364 = vst [vmem:[#allocation55_spill] sm:$0xff] %v6589_v34  ;;  %v1723_v28 = vsel %vm8113_vm0, %v6591_v4, %v1711_v50  ;;  %4357 = vmatprep.subr.bf16.mxu0 %v4356_v33  ;;  %vm8122_vm0 = vcmask 277504  }
 0x30b   : > { %v1786_v21 = vsel %vm8365_vm4, %v1723_v28, %v1770_v44  ;;  %1564 = vrot.lane.b32.xlu1 %v5903_v42, %s8143_s14  ;;  %1438 = vrot.lane.b32.xlu0 %v5957_v62, %s8141_s13  ;;  %vm8117_vm4 = vcmask 293888  }
 0x30c   : > { %v4358_v52 = vpack.c.bf16 %v1880_v48, %v1786_v21 }
 0x30d   : > { %v1935_v37 = vpop.permute.xlu1 %1934  ;;  %v1937_v45 = vpop.permute.xlu0 %1936 }
 0x30e   : > { %4359 = vmatpush1.bf16.msra.mxu0 %v4358_v52  ;;  %v1948_v36 = vsel %vm8118_vm15, %v1937_v45, %v6589_v34  ;;  %v1947_v30 = vsel %vm8118_vm15, %v1935_v37, %v1937_v45 }
 0x30f   : > { %1658 = vrot.lane.b32.xlu1 %v5957_v62, %s8114_s15  ;;  %1670 = vrot.lane.b32.xlu0 %v5857_v13, %s8114_s15  ;;  %v1961_v38 = vrot.slane %v1948_v36, 4  ;;  %v1960_v44 = vrot.slane %v1947_v30, 4 }
 0x311   : > { %v6604_v50 = vpop.permute.xlu1 %1904  ;;  %v1933_v18 = vpop.permute.xlu0 %1932 }
 0x312   : > { %8366 = vst [vmem:[#allocation56_spill] sm:$0xff] %v6604_v50  ;;  %v1946_v33 = vsel %vm8118_vm15, %v1933_v18, %v1935_v37 }
 0x313   : > { %1534 = vrot.lane.b32.xlu1 %v5941_v40, %s8139_s12  ;;  %1566 = vrot.lane.b32.xlu0 %v5957_v62, %s8143_s14  ;;  %v1959_v28 = vrot.slane %v1946_v33, 4 }
 0x315   : > { %v1899_v55 = vpop.permute.xlu1 %1898  ;;  %v1903_v15 = vpop.permute.xlu0 %1902 }
 0x316   : > { %v1914_v5 = vsel %vm8117_vm4, %v1903_v15, %v6604_v50  ;;  %v2040_v50 = vld [vmem:[#allocation2 + $0x38] sm:$0xff] }
 0x317   : > { %v1977_v56 = vsel %vm8360_vm2, %v1914_v5, %v1961_v38  ;;  %1530 = vrot.lane.b32.xlu1 %v5903_v42, %s8139_s12  ;;  %1660 = vrot.lane.b32.xlu0 %v5941_v40, %s8114_s15  ;;  %s8372_s15 = smov 44  }
 0x319   : > { %v1997_v47 = vpop.permute.xlu1 %1996  ;;  %v6619_v48 = vpop.permute.xlu0 %1930 }
 0x31a   : > { %8367 = vst [vmem:[#allocation57_spill] sm:$0xff] %v6619_v48  ;;  %v1945_v30 = vsel %vm8118_vm15, %v6619_v48, %v1933_v18 }
 0x31b   : > { %1624 = vrot.lane.b32.xlu1 %v5957_v62, %s8119_s11  ;;  %1642 = vrot.lane.b32.xlu0 %v5857_v13, %s8119_s11  ;;  %v1958_v33 = vrot.slane %v1945_v30, 4 }
 0x31d   : > { %v911_v21 = vpop.permute.xlu1 %910  ;;  %v1901_v42 = vpop.permute.xlu0 %1900 }
 0x31e   : > { %v1912_v52 = vsel %vm8117_vm4, %v1899_v55, %v1901_v42  ;;  %v1913_v36 = vsel %vm8117_vm4, %v1901_v42, %v1903_v15 }
 0x31f   : > { %v6630_v38 = vsel %vm8360_vm2, %v1912_v52, %v1959_v28  ;;  %v6633_v45 = vsel %vm8368_vm12, %v1913_v36, %v1960_v44  ;;  %1764 = vrot.lane.b32.xlu1 %v5857_v13, %s8125_s8  ;;  %1532 = vrot.lane.b32.xlu0 %v5957_v62, %s8139_s12  ;;  %vm8371_vm12 = vmmov %vm8360_vm2  ;;  %vm8374_vm2 = vcmask 965632  }
 0x321   : > { %v1993_v37 = vpop.permute.xlu1 %1992  ;;  %v6639_v5 = vpop.permute.xlu0 %1998 }
 0x322   : > { %8369 = vst [vmem:[#allocation58_spill] sm:$0xff] %v6639_v5  ;;  %v2008_v15 = vsel %vm8122_vm0, %v1997_v47, %v6639_v5 }
 0x323   : > { %2027 = vst [vmem:[#allocation2 + $0x358] sm:$0xf] %v2008_v15  ;;  %1752 = vrot.lane.b32.xlu1 %v5957_v62, %s8125_s8  ;;  %1626 = vrot.lane.b32.xlu0 %v5941_v40, %s8119_s11  ;;  %s8378_s11 = smov 54  }
 0x325   : > { %v907_v44 = vpop.permute.xlu1 %906  ;;  %v6649_v28 = vpop.permute.xlu0 %1896 }
 0x326   : > { %8370 = vst [vmem:[#allocation59_spill] sm:$0xff] %v6649_v28  ;;  %v1911_v42 = vsel %vm8117_vm4, %v6649_v28, %v1899_v55  ;;  %v917_v30 = vsel %vm8374_vm2, %v6109_v16, %v907_v44  ;;  %vm8375_vm4 = vcmask 1043456  }
 0x327   : > { %v1974_v52 = vsel %vm8371_vm12, %v1911_v42, %v1958_v33  ;;  %1846 = vrot.lane.b32.xlu1 %v5957_v62, %s8372_s15  ;;  %1858 = vrot.lane.b32.xlu0 %v5857_v13, %s8372_s15  ;;  %vm5184_vm12 = vmmov 1  }
 0x328   : > { %vm6667_vm15 = vmpackc.low %vm8375_vm4, %vm5184_vm12  ;;  %vm8381_vm12 = vcmask 1043456  }
 0x329   : > { %v6658_v18 = vpop.permute.xlu1 %1990  ;;  %v1995_v36 = vpop.permute.xlu0 %1994  ;;  %vm8379_vm4 = vmmov %vm8374_vm2  ;;  %vm8380_vm2 = vcmask 1031168  }
 0x32a   : > { %8373 = vst [vmem:[#allocation60_spill] sm:$0xff] %v6658_v18  ;;  %v2005_v15 = vsel %vm8122_vm0, %v6658_v18, %v1993_v37  ;;  %v2006_v5 = vsel %vm8122_vm0, %v1993_v37, %v1995_v36  ;;  %v2007_v55 = vsel %vm8122_vm0, %v1995_v36, %v1997_v47  ;;  %v2140_v33 = vld [vmem:[#allocation2 + $0x358] sm:$0xf]  ;;  %v928_v37 = vrot.slane %v917_v30, 4  ;;  %vm8382_vm0 = vmmov %vm8379_vm4 }
 0x32b   : > { %2024 = vst [vmem:[#allocation2 + $0x340] sm:$0xf] %v2005_v15  ;;  %2025 = vst [vmem:[#allocation2 + $0x348] sm:$0xf] %v2006_v5  ;;  %1736 = vrot.lane.b32.xlu1 %v5857_v13, %s8378_s11  ;;  %1754 = vrot.lane.b32.xlu0 %v5941_v40, %s8125_s8  ;;  %v4390_v16 = vpack.c.bf16 %v2140_v33, %v1977_v56  ;;  %v922_v36 = vsel %vm8379_vm4, %v911_v21, %v6146_v60  ;;  %s8386_s8 = smov 45  }
 0x32c   : > { %2026 = vst [vmem:[#allocation2 + $0x350] sm:$0xf] %v2007_v55  ;;  %v931_v56 = vrot.slane %v922_v36, 4  ;;  %vm8383_vm10 = vmmov %vm8382_vm0 }
 0x32d   : > { %v873_v28 = vpop.permute.xlu1 %872  ;;  %4392 = vmatprep.subr.msk.bf16.mxu1 %vm6667_vm15, %v4390_v16  ;;  %v909_v47 = vpop.permute.xlu0 %908  ;;  %vm8384_vm4 = vmmov %vm8380_vm2 }
 0x32e   : > { %v883_v5 = vsel %vm8380_vm2, %v6121_v11, %v873_v28  ;;  %v918_v33 = vsel %vm8382_vm0, %v907_v44, %v909_v47  ;;  %v919_v16 = vsel %vm8383_vm10, %v909_v47, %v911_v21  ;;  %vm8385_vm2 = vmmov %vm8381_vm12 }
 0x32f   : > { %v944_v15 = vsel %vm8381_vm12, %v883_v5, %v928_v37  ;;  %1718 = vrot.lane.b32.xlu1 %v5957_v62, %s8378_s11  ;;  %1848 = vrot.lane.b32.xlu0 %v5941_v40, %s8372_s15  ;;  %v929_v34 = vrot.slane %v918_v33, 4  ;;  %vm8387_vm10 = vmmov %vm8384_vm4  ;;  %v2039_v33 = vld [vmem:[#allocation2 + $0x30] sm:$0xff] }
 0x330   : > { %vm8388_vm0 = vmmov %vm8384_vm4 }
 0x331   : > { %v6686_v30 = vpop.permute.xlu1 %1004  ;;  %v877_v55 = vpop.permute.xlu0 %876  ;;  %vm8389_vm12 = vmmov %vm8385_vm2 }
 0x332   : > { %v895_v60 = vsel %vm8384_vm4, %v877_v55, %v6111_v61  ;;  %v2138_v11 = vld [vmem:[#allocation2 + $0x348] sm:$0xf]  ;;  %v2137_v37 = vld [vmem:[#allocation2 + $0x340] sm:$0xf]  ;;  %v930_v61 = vrot.slane %v919_v16, 4  ;;  %vm8390_vm4 = vmmov %vm8385_vm2 }
 0x333   : > { %v2139_v18 = vld [vmem:[#allocation2 + $0x350] sm:$0xf]  ;;  %v947_v5 = vsel %vm8385_vm2, %v895_v60, %v931_v56  ;;  %1812 = vrot.lane.b32.xlu1 %v5957_v62, %s8386_s8  ;;  %1830 = vrot.lane.b32.xlu0 %v5857_v13, %s8386_s8  ;;  %v4360_v36 = vpack.c.bf16 %v2138_v11, %v6630_v38  ;;  %v4363_v21 = vpack.c.bf16 %v2137_v37, %v1974_v52  ;;  %v6706_v60 = vld [vmem:[%s7969_s2] sm:$0xff]  ;;  %vm8391_vm2 = vcmask 883712  }
 0x334   : > { %v4393_v44 = vpack.c.bf16 %v2139_v18, %v6633_v45  ;;  %v4426_v47 = vpack.c.bf16 %v947_v5, %v2040_v50  ;;  %v2038_v18 = vld [vmem:[#allocation2 + $0x28] sm:$0xff]  ;;  %v2037_v11 = vld [vmem:[#allocation2 + $0x20] sm:$0xff]  ;;  %v8393_v37 = vmov 0.0  }
 0x335   : > { %v1001_v48 = vpop.permute.xlu1 %1000  ;;  %4362 = vmatprep.subr.msk.bf16.mxu0 %vm6667_vm15, %v4360_v36  ;;  %v875_v56 = vpop.permute.xlu0 %874  ;;  %v4398_v36 = vpack.c.bf16 %v944_v15, %v2037_v11 }
 0x336   : > { %4395 = vmatpush1.bf16.msk.msra.mxu1 %vm6667_vm15, %v4393_v44  ;;  %v884_v38 = vsel %vm8387_vm10, %v873_v28, %v875_v56  ;;  %v885_v45 = vsel %vm8388_vm0, %v875_v56, %v877_v55  ;;  %4365 = vmatpush1.bf16.msk.msra.mxu0 %vm6667_vm15, %v4363_v21  ;;  %vm8392_vm10 = vmmov %vm8391_vm2  ;;  %vm8394_vm0 = vcmask 949248  }
 0x337   : > { %4427 = vmatprep.subr.bf16.mxu1 %v4426_v47  ;;  %v945_v50 = vsel %vm8389_vm12, %v884_v38, %v929_v34  ;;  %v946_v52 = vsel %vm8390_vm4, %v885_v45, %v930_v61  ;;  %1952 = vrot.lane.b32.xlu1 %v5857_v13, %s5180_s7  ;;  %v1016_v5 = vsel %vm8394_vm0, %v6686_v30, %v6189_v51  ;;  %vm8395_vm12 = vmmov %vm8394_vm0  ;;  %vm8396_vm4 = vcmask 957440  }
 0x338   : > { %1720 = vrot.lane.b32.xlu0 %v5941_v40, %s8378_s11  ;;  %v4396_v28 = vpack.c.bf16 %v945_v50, %v2038_v18  ;;  %v4428_v55 = vpack.c.bf16 %v946_v52, %v2039_v33  ;;  %v1025_v44 = vrot.slane %v1016_v5, 4  ;;  %v1011_v61 = vsel %vm8395_vm12, %v6144_v14, %v1001_v48  ;;  %vm8400_vm12 = vmmov %vm8396_vm4 }
 0x339   : > { %4323 = vmatmul.mubr.msk.f32.vlgmr.msra.gmra.mrb[0].mxu1 %vm8391_vm2, %v6706_v60  ;;  %v1095_v16 = vpop.permute.xlu1 %1094  ;;  %4320 = vmatmul.mubr.msk.f32.vlgmr.msra.gmra.mrb[0].mxu0 %vm8392_vm10, %v6706_v60  ;;  %v1099_v34 = vpop.permute.xlu0 %1098  ;;  %vm8397_vm2 = vcmask 1043456   ;;  %v1022_v56 = vrot.slane %v1011_v61, 4  ;;  %vm8398_vm10 = vcmask 875520  }
 0x33a   : > { %2455 = vmatprep.mubr.f32.mxu1 %v8393_v37  ;;  %4397 = vmatprep.subr.bf16.mxu0 %v4396_v28  ;;  %v1105_v50 = vsel %vm8398_vm10, %v6157_v53, %v1095_v16  ;;  %vm8399_vm0 = vmmov %vm8398_vm10 }
 0x33b   : > { %4429 = vmatpush1.bf16.msra.mxu1 %v4428_v55  ;;  %1942 = vrot.lane.b32.xlu1 %v5941_v40, %s5180_s7  ;;  %v1110_v14 = vsel %vm8399_vm0, %v1099_v34, %v6187_v58  ;;  %v1116_v18 = vrot.slane %v1105_v50, 4  ;;  %vm8404_vm0 = vcmask 883712  }
 0x33c   : > { %1814 = vrot.lane.b32.xlu0 %v5941_v40, %s8386_s8  ;;  %4399 = vmatpush1.bf16.msra.mxu0 %v4398_v36  ;;  %v1119_v33 = vrot.slane %v1110_v14, 4 }
 0x33d   : > { %2384 = vmatprep.mubr.f32.mxu0 %v8393_v37  ;;  %v971_v21 = vpop.permute.xlu1 %970  ;;  %v1003_v47 = vpop.permute.xlu0 %1002 }
 0x33e   : > { %v989_v51 = vsel %vm8396_vm4, %v971_v21, %v6237_v29  ;;  %vm8401_vm4 = vmmov %vm8397_vm2 }
 0x33f   : > { %v1041_v15 = vsel %vm8397_vm2, %v989_v51, %v1025_v44  ;;  %1906 = vrot.lane.b32.xlu1 %v5957_v62, %s8137_s27  ;;  %vm8402_vm2 = vcmask 949248   ;;  %vm8406_vm14 = vmmov %vm8401_vm4 }
 0x340   : > { %1940 = vrot.lane.b32.xlu0 %v5957_v62, %s5180_s7  ;;  %v1012_v53 = vsel %vm8402_vm2, %v1001_v48, %v1003_v47  ;;  %vm8403_vm10 = vmmov %vm8402_vm2  ;;  %vm8407_vm2 = vcmask 875520  }
 0x341   : > { %v967_v38 = vpop.permute.xlu1 %966  ;;  %v1097_v45 = vpop.permute.xlu0 %1096  ;;  %v1013_v58 = vsel %vm8403_vm10, %v1003_v47, %v6686_v30  ;;  %v1023_v48 = vrot.slane %v1012_v53, 4  ;;  %vm8408_vm10 = vmmov %vm8407_vm2 }
 0x342   : > { %v977_v29 = vsel %vm8400_vm12, %v6172_v23, %v967_v38  ;;  %vm8405_vm12 = vmmov %vm8404_vm0  ;;  %v1024_v44 = vrot.slane %v1013_v58, 4  ;;  %v1107_v61 = vsel %vm8408_vm10, %v1097_v45, %v1099_v34 }
 0x343   : > { %v1038_v52 = vsel %vm8401_vm4, %v977_v29, %v1022_v56  ;;  %2018 = vrot.lane.b32.xlu1 %v5857_v13, %s5182_s28 }
 0x344   : > { %1924 = vrot.lane.b32.xlu0 %v5857_v13, %s8137_s27 }
 0x345   : > { %v1061_v28 = vpop.permute.xlu1 %1060  ;;  %v1065_v55 = vpop.permute.xlu0 %1064 }
 0x346   : > { %v1071_v23 = vsel %vm8404_vm0, %v6198_v63, %v1061_v28  ;;  %v1083_v11 = vsel %vm8405_vm12, %v1065_v55, %v6222_v22  ;;  %v1106_v63 = vsel %vm8407_vm2, %v1095_v16, %v1097_v45  ;;  %vm8409_vm0 = vcmask 957440  }
 0x347   : > { %v1132_v5 = vsel %vm8401_vm4, %v1071_v23, %v1116_v18  ;;  %v1135_v36 = vsel %vm8406_vm14, %v1083_v11, %v1119_v33  ;;  %2002 = vrot.lane.b32.xlu1 %v5941_v40, %s5182_s28  ;;  %vm8410_vm12 = vmmov %vm8409_vm0  ;;  %v1118_v16 = vrot.slane %v1107_v61, 4  ;;  %vm8412_vm2 = vcmask 883712  }
 0x348   : > { %1908 = vrot.lane.b32.xlu0 %v5941_v40, %s8137_s27  ;;  %v4430_v13 = vpack.c.bf16 %v1135_v36, %v1041_v15  ;;  %vm8411_vm14 = vmmov %vm8401_vm4  ;;  %v2145_v40 = vld [vmem:[%s7970_s3] sm:$0xff]  ;;  %v1117_v15 = vrot.slane %v1106_v63, 4  ;;  %v4402_v58 = vpack.c.bf16 %v1132_v5, %v1038_v52  ;;  %s8541_s27 = smov 20  }
 0x349   : > { %v1193_v30 = vpop.permute.xlu1 %1192  ;;  %v969_v47 = vpop.permute.xlu0 %968  ;;  %vm8413_vm10 = vmmov %vm8412_vm2 }
 0x34a   : > { %v978_v22 = vsel %vm8409_vm0, %v967_v38, %v969_v47  ;;  %v979_v51 = vsel %vm8410_vm12, %v969_v47, %v971_v21  ;;  %4431 = vmatprep.subr.bf16.mxu1 %v4430_v13  ;;  %vm8414_vm0 = vmmov %vm8401_vm4 }
 0x34b   : > { %v1039_v56 = vsel %vm8411_vm14, %v978_v22, %v1023_v48  ;;  %v1040_v50 = vsel %vm8401_vm4, %v979_v51, %v1024_v44  ;;  %vm8415_vm12 = vmmov %vm8414_vm0  ;;  %vm8416_vm14 = vcmask 228352  }
 0x34c   : > { %2000 = vrot.lane.b32.xlu0 %v5957_v62, %s5182_s28  ;;  %v1204_v23 = vsel %vm8416_vm14, %v1193_v30, %v6277_v39  ;;  %vm8417_vm4 = vmmov %vm8416_vm14 }
 0x34d   : > { %v1189_v14 = vpop.permute.xlu1 %1188  ;;  %v1063_v34 = vpop.permute.xlu0 %1062  ;;  %v1213_v11 = vrot.slane %v1204_v23, 4 }
 0x34e   : > { %v1072_v38 = vsel %vm8412_vm2, %v1061_v28, %v1063_v34  ;;  %v1073_v21 = vsel %vm8413_vm10, %v1063_v34, %v1065_v55  ;;  %v1199_v55 = vsel %vm8417_vm4, %v6235_v46, %v1189_v14  ;;  %vm8418_vm2 = vcmask 867328   ;;  %vm8419_vm10 = vmmov %vm8414_vm0 }
 0x34f   : > { %v1133_v45 = vsel %vm8414_vm0, %v1072_v38, %v1117_v15  ;;  %v1134_v29 = vsel %vm8415_vm12, %v1073_v21, %v1118_v16  ;;  %v1210_v44 = vrot.slane %v1199_v55, 4  ;;  %vm8420_vm0 = vcmask 211968   ;;  %vm8422_vm14 = vmmov %vm8418_vm2 }
 0x350   : > { %2148 = vperm.xlu0 %4697, %v2145_v40   ;;  %v4400_v18 = vpack.c.bf16 %v1133_v45, %v1039_v56  ;;  %v4432_v33 = vpack.c.bf16 %v1134_v29, %v1040_v50  ;;  %vm8421_vm12 = vmmov %vm8420_vm0 }
 0x351   : > { %v1283_v62 = vpop.permute.xlu1 %1282  ;;  %v1287_v53 = vpop.permute.xlu0 %1286  ;;  %vm8423_vm13 = vmmov %vm8419_vm10 }
 0x352   : > { %4401 = vmatprep.subr.bf16.mxu0 %v4400_v18  ;;  %4433 = vmatpush1.bf16.msra.mxu1 %v4432_v33  ;;  %v1293_v39 = vsel %vm8420_vm0, %v6246_v35, %v1283_v62  ;;  %v1298_v5 = vsel %vm8421_vm12, %v1287_v53, %v6275_v7  ;;  %vm8427_vm12 = vmmov %vm8423_vm13 }
 0x353   : > { %4403 = vmatpush1.bf16.msra.mxu0 %v4402_v58  ;;  %v1304_v46 = vrot.slane %v1293_v39, 4  ;;  %v1307_v22 = vrot.slane %v1298_v5, 4  ;;  %vm8428_vm1 = vmmov %vm8427_vm12 }
 0x355   : > { %v1159_v28 = vpop.permute.xlu1 %1158  ;;  %v1191_v36 = vpop.permute.xlu0 %1190 }
 0x356   : > { %v1177_v13 = vsel %vm8418_vm2, %v1159_v28, %v6325_v59  ;;  %v1200_v56 = vsel %vm8417_vm4, %v1189_v14, %v1191_v36  ;;  %vm8424_vm2 = vmmov %vm8417_vm4  ;;  %vm8431_vm4 = vcmask 867328  }
 0x357   : > { %v1229_v48 = vsel %vm8419_vm10, %v1177_v13, %v1213_v11  ;;  %v1201_v50 = vsel %vm8424_vm2, %v1191_v36, %v1193_v30  ;;  %vm8425_vm10 = vcmask 220160   ;;  %v1211_v16 = vrot.slane %v1200_v56, 4  ;;  %vm8432_vm2 = vmmov %vm8431_vm4 }
 0x358   : > { %vm8426_vm0 = vmmov %vm8425_vm10  ;;  %v1212_v34 = vrot.slane %v1201_v50, 4 }
 0x359   : > { %v1155_v47 = vpop.permute.xlu1 %1154  ;;  %v1285_v52 = vpop.permute.xlu0 %1284 }
 0x35a   : > { %v1165_v63 = vsel %vm8422_vm14, %v6260_v1, %v1155_v47 }
 0x35b   : > { %v1226_v61 = vsel %vm8423_vm13, %v1165_v63, %v1210_v44  ;;  %vm8429_vm13 = vcmask 211968  }
 0x35c   : > { %v1294_v45 = vsel %vm8429_vm13, %v1283_v62, %v1285_v52  ;;  %vm8430_vm14 = vmmov %vm8429_vm13 }
 0x35d   : > { %v1249_v51 = vpop.permute.xlu1 %1248  ;;  %v1253_v59 = vpop.permute.xlu0 %1252  ;;  %v1295_v14 = vsel %vm8430_vm14, %v1285_v52, %v1287_v53  ;;  %v1305_v18 = vrot.slane %v1294_v45, 4 }
 0x35e   : > { %v1259_v40 = vsel %vm8425_vm10, %v6286_v8, %v1249_v51  ;;  %v1271_v35 = vsel %vm8426_vm0, %v1253_v59, %v6310_v24  ;;  %vm8433_vm10 = vmmov %vm8428_vm1  ;;  %v1306_v33 = vrot.slane %v1295_v14, 4 }
 0x35f   : > { %v1320_v7 = vsel %vm8427_vm12, %v1259_v40, %v1304_v46  ;;  %v1323_v1 = vsel %vm8428_vm1, %v1271_v35, %v1307_v22  ;;  %vm8434_vm0 = vmmov %vm8428_vm1  ;;  %vm8435_vm1 = vcmask 220160  }
 0x360   : > { %v4434_v15 = vpack.c.bf16 %v1323_v1, %v1229_v48  ;;  %vm8436_vm12 = vmmov %vm8435_vm1  ;;  %v4406_v44 = vpack.c.bf16 %v1320_v7, %v1226_v61 }
 0x361   : > { %v1381_v38 = vpop.permute.xlu1 %1380  ;;  %v1157_v21 = vpop.permute.xlu0 %1156  ;;  %vm8437_vm13 = vmmov %vm8434_vm0 }
 0x362   : > { %v1166_v30 = vsel %vm8431_vm4, %v1155_v47, %v1157_v21  ;;  %v1167_v8 = vsel %vm8432_vm2, %v1157_v21, %v1159_v28  ;;  %4435 = vmatprep.subr.bf16.mxu1 %v4434_v15  ;;  %vm8438_vm14 = vmmov %vm8434_vm0  ;;  %vm8439_vm4 = vcmask 138240  }
 0x363   : > { %v1227_v24 = vsel %vm8433_vm10, %v1166_v30, %v1211_v16  ;;  %v1228_v29 = vsel %vm8434_vm0, %v1167_v8, %v1212_v34  ;;  %v1392_v47 = vsel %vm8439_vm4, %v1381_v38, %v6365_v19  ;;  %vm8440_vm2 = vmmov %vm8439_vm4  ;;  %vm8441_vm10 = vcmask 146432  }
 0x364   : > { %v1401_v52 = vrot.slane %v1392_v47, 4  ;;  %vm8446_vm4 = vmmov %vm8440_vm2 }
 0x365   : > { %v1377_v58 = vpop.permute.xlu1 %1376  ;;  %v1251_v23 = vpop.permute.xlu0 %1250 }
 0x366   : > { %v1260_v11 = vsel %vm8435_vm1, %v1249_v51, %v1251_v23  ;;  %v1261_v36 = vsel %vm8436_vm12, %v1251_v23, %v1253_v59  ;;  %v1387_v63 = vsel %vm8440_vm2, %v6323_v31, %v1377_v58  ;;  %vm8442_vm1 = vcmask 64512  }
 0x367   : > { %v1321_v62 = vsel %vm8437_vm13, %v1260_v11, %v1305_v18  ;;  %v1322_v53 = vsel %vm8438_vm14, %v1261_v36, %v1306_v33  ;;  %v1398_v51 = vrot.slane %v1387_v63, 4  ;;  %vm8443_vm12 = vmmov %vm8442_vm1 }
 0x368   : > { %v4404_v55 = vpack.c.bf16 %v1321_v62, %v1227_v24  ;;  %v4436_v13 = vpack.c.bf16 %v1322_v53, %v1228_v29  ;;  %vm8444_vm13 = vmmov %vm8441_vm10 }
 0x369   : > { %v1471_v28 = vpop.permute.xlu1 %1470  ;;  %v1475_v48 = vpop.permute.xlu0 %1474  ;;  %vm8445_vm14 = vmmov %vm8434_vm0 }
 0x36a   : > { %4405 = vmatprep.subr.bf16.mxu0 %v4404_v55  ;;  %4437 = vmatpush1.bf16.msra.mxu1 %v4436_v13  ;;  %v1481_v19 = vsel %vm8442_vm1, %v6334_v0, %v1471_v28  ;;  %v1486_v56 = vsel %vm8443_vm12, %v1475_v48, %v6363_v57  ;;  %vm8449_vm1 = vmmov %vm8445_vm14 }
 0x36b   : > { %4407 = vmatpush1.bf16.msra.mxu0 %v4406_v44  ;;  %v1492_v31 = vrot.slane %v1481_v19, 4  ;;  %v1495_v35 = vrot.slane %v1486_v56, 4  ;;  %vm8450_vm12 = vmmov %vm8449_vm1 }
 0x36d   : > { %v1347_v39 = vpop.permute.xlu1 %1346  ;;  %v1379_v5 = vpop.permute.xlu0 %1378 }
 0x36e   : > { %v1365_v46 = vsel %vm8441_vm10, %v1347_v39, %v6413_v54  ;;  %v1388_v1 = vsel %vm8446_vm4, %v1377_v58, %v1379_v5  ;;  %v1389_v15 = vsel %vm8440_vm2, %v1379_v5, %v1381_v38  ;;  %vm8447_vm10 = vcmask 130048  }
 0x36f   : > { %v1417_v22 = vsel %vm8434_vm0, %v1365_v46, %v1401_v52  ;;  %vm8448_vm0 = vmmov %vm8447_vm10  ;;  %v1399_v21 = vrot.slane %v1388_v1, 4  ;;  %v1400_v45 = vrot.slane %v1389_v15, 4  ;;  %vm8453_vm4 = vcmask 146432  }
 0x370   : > { %vm8454_vm2 = vmmov %vm8453_vm4 }
 0x371   : > { %v1343_v59 = vpop.permute.xlu1 %1342  ;;  %v1473_v61 = vpop.permute.xlu0 %1472 }
 0x372   : > { %v1353_v50 = vsel %vm8444_vm13, %v6348_v17, %v1343_v59  ;;  %vm8451_vm13 = vcmask 64512  }
 0x373   : > { %v1414_v40 = vsel %vm8445_vm14, %v1353_v50, %v1398_v51  ;;  %v1482_v8 = vsel %vm8451_vm13, %v1471_v28, %v1473_v61  ;;  %vm8452_vm14 = vmmov %vm8451_vm13 }
 0x374   : > { %v1483_v24 = vsel %vm8452_vm14, %v1473_v61, %v1475_v48  ;;  %v1493_v18 = vrot.slane %v1482_v8, 4 }
 0x375   : > { %v1437_v7 = vpop.permute.xlu1 %1436  ;;  %v1441_v54 = vpop.permute.xlu0 %1440  ;;  %v1494_v33 = vrot.slane %v1483_v24, 4 }
 0x376   : > { %v1447_v16 = vsel %vm8447_vm10, %v6374_v10, %v1437_v7  ;;  %v1459_v0 = vsel %vm8448_vm0, %v1441_v54, %v6398_v25  ;;  %vm8455_vm10 = vmmov %vm8449_vm1 }
 0x377   : > { %v1508_v57 = vsel %vm8449_vm1, %v1447_v16, %v1492_v31  ;;  %v1511_v17 = vsel %vm8450_vm12, %v1459_v0, %v1495_v35  ;;  %vm8456_vm0 = vmmov %vm8449_vm1  ;;  %vm8457_vm1 = vcmask 130048  }
 0x378   : > { %v4438_v34 = vpack.c.bf16 %v1511_v17, %v1417_v22  ;;  %vm8458_vm12 = vmmov %vm8457_vm1  ;;  %v4410_v44 = vpack.c.bf16 %v1508_v57, %v1414_v40 }
 0x379   : > { %v1569_v14 = vpop.permute.xlu1 %1568  ;;  %v1345_v30 = vpop.permute.xlu0 %1344  ;;  %vm8459_vm13 = vmmov %vm8456_vm0 }
 0x37a   : > { %v1354_v38 = vsel %vm8453_vm4, %v1343_v59, %v1345_v30  ;;  %v1355_v10 = vsel %vm8454_vm2, %v1345_v30, %v1347_v39  ;;  %4439 = vmatprep.subr.bf16.mxu1 %v4438_v34  ;;  %vm8460_vm14 = vmmov %vm8456_vm0  ;;  %vm8461_vm4 = vcmask 48128  }
 0x37b   : > { %v1415_v25 = vsel %vm8455_vm10, %v1354_v38, %v1399_v21  ;;  %v1416_v29 = vsel %vm8456_vm0, %v1355_v10, %v1400_v45  ;;  %v1580_v47 = vsel %vm8461_vm4, %v1569_v14, %v6455_v12  ;;  %vm8462_vm2 = vmmov %vm8461_vm4  ;;  %vm8463_vm10 = vcmask 56320  }
 0x37c   : > { %v1589_v52 = vrot.slane %v1580_v47, 4  ;;  %vm8468_vm4 = vmmov %vm8462_vm2 }
 0x37d   : > { %v1565_v58 = vpop.permute.xlu1 %1564  ;;  %v1439_v23 = vpop.permute.xlu0 %1438 }
 0x37e   : > { %v1448_v11 = vsel %vm8457_vm1, %v1437_v7, %v1439_v23  ;;  %v1449_v36 = vsel %vm8458_vm12, %v1439_v23, %v1441_v54  ;;  %v1575_v63 = vsel %vm8462_vm2, %v6411_v6, %v1565_v58  ;;  %vm8464_vm1 = vcmask 449536  }
 0x37f   : > { %v1509_v62 = vsel %vm8459_vm13, %v1448_v11, %v1493_v18  ;;  %v1510_v53 = vsel %vm8460_vm14, %v1449_v36, %v1494_v33  ;;  %v1586_v51 = vrot.slane %v1575_v63, 4  ;;  %vm8465_vm12 = vmmov %vm8464_vm1  ;;  %v8489_v63 = vld [vmem:[#allocation53_spill] sm:$0xff] }
 0x380   : > { %v4408_v55 = vpack.c.bf16 %v1509_v62, %v1415_v25  ;;  %v4440_v13 = vpack.c.bf16 %v1510_v53, %v1416_v29  ;;  %vm8466_vm13 = vmmov %vm8463_vm10 }
 0x381   : > { %v1659_v28 = vpop.permute.xlu1 %1658  ;;  %v1671_v48 = vpop.permute.xlu0 %1670  ;;  %vm8467_vm14 = vmmov %vm8456_vm0 }
 0x382   : > { %4409 = vmatprep.subr.bf16.mxu0 %v4408_v55  ;;  %4441 = vmatpush1.bf16.msra.mxu1 %v4440_v13  ;;  %v1667_v12 = vsel %vm8464_vm1, %v6424_v32, %v1659_v28  ;;  %v1672_v19 = vsel %vm8465_vm12, %v1671_v48, %v6453_v26  ;;  %vm8471_vm1 = vmmov %vm8467_vm14 }
 0x383   : > { %4411 = vmatpush1.bf16.msra.mxu0 %v4410_v44  ;;  %v1680_v6 = vrot.slane %v1667_v12, 4  ;;  %v1683_v40 = vrot.slane %v1672_v19, 4  ;;  %vm8472_vm12 = vmmov %vm8471_vm1  ;;  %v8493_v19 = vld [vmem:[#allocation54_spill] sm:$0xff] }
 0x385   : > { %v1535_v39 = vpop.permute.xlu1 %1534  ;;  %v1567_v5 = vpop.permute.xlu0 %1566 }
 0x386   : > { %v1553_v46 = vsel %vm8463_vm10, %v1535_v39, %v6503_v9  ;;  %v1576_v35 = vsel %vm8468_vm4, %v1565_v58, %v1567_v5  ;;  %v1577_v7 = vsel %vm8462_vm2, %v1567_v5, %v1569_v14  ;;  %vm8469_vm10 = vcmask 457728  }
 0x387   : > { %v1605_v22 = vsel %vm8456_vm0, %v1553_v46, %v1589_v52  ;;  %vm8470_vm0 = vmmov %vm8469_vm10  ;;  %v1587_v15 = vrot.slane %v1576_v35, 4  ;;  %v1588_v16 = vrot.slane %v1577_v7, 4  ;;  %vm8475_vm4 = vcmask 56320  }
 0x388   : > { %vm8476_vm2 = vmmov %vm8475_vm4 }
 0x389   : > { %v1531_v59 = vpop.permute.xlu1 %1530  ;;  %v1661_v61 = vpop.permute.xlu0 %1660 }
 0x38a   : > { %v1541_v56 = vsel %vm8466_vm13, %v6438_v3, %v1531_v59  ;;  %vm8473_vm13 = vcmask 449536  }
 0x38b   : > { %v1602_v50 = vsel %vm8467_vm14, %v1541_v56, %v1586_v51  ;;  %v1668_v17 = vsel %vm8473_vm13, %v1659_v28, %v1661_v61  ;;  %vm8474_vm14 = vmmov %vm8473_vm13 }
 0x38c   : > { %v1674_v34 = vsel %vm8474_vm14, %v1661_v61, %v1671_v48  ;;  %v1681_v14 = vrot.slane %v1668_v17, 4 }
 0x38d   : > { %v1625_v31 = vpop.permute.xlu1 %1624  ;;  %v1643_v9 = vpop.permute.xlu0 %1642  ;;  %v1682_v30 = vrot.slane %v1674_v34, 4 }
 0x38e   : > { %v1633_v54 = vsel %vm8469_vm10, %v6464_v49, %v1625_v31  ;;  %v1644_v32 = vsel %vm8470_vm0, %v1643_v9, %v6488_v2  ;;  %vm8477_vm10 = vmmov %vm8471_vm1 }
 0x38f   : > { %v1696_v26 = vsel %vm8471_vm1, %v1633_v54, %v1680_v6  ;;  %v1699_v3 = vsel %vm8472_vm12, %v1644_v32, %v1683_v40  ;;  %vm8478_vm0 = vmmov %vm8471_vm1  ;;  %vm8479_vm1 = vcmask 457728  }
 0x390   : > { %v4442_v1 = vpack.c.bf16 %v1699_v3, %v1605_v22  ;;  %vm8480_vm12 = vmmov %vm8479_vm1  ;;  %v4414_v11 = vpack.c.bf16 %v1696_v26, %v1602_v50 }
 0x391   : > { %v1765_v0 = vpop.permute.xlu1 %1764  ;;  %v1533_v57 = vpop.permute.xlu0 %1532  ;;  %vm8481_vm13 = vmmov %vm8478_vm0 }
 0x392   : > { %v1542_v21 = vsel %vm8475_vm4, %v1531_v59, %v1533_v57  ;;  %v1543_v49 = vsel %vm8476_vm2, %v1533_v57, %v1535_v39  ;;  %4443 = vmatprep.subr.bf16.mxu1 %v4442_v1  ;;  %vm8482_vm14 = vmmov %vm8478_vm0  ;;  %vm8483_vm4 = vcmask 375808   ;;  %v8486_v39 = vld [vmem:[#allocation52_spill] sm:$0xff] }
 0x393   : > { %v1603_v2 = vsel %vm8477_vm10, %v1542_v21, %v1587_v15  ;;  %v1604_v45 = vsel %vm8478_vm0, %v1543_v49, %v1588_v16  ;;  %v1766_v36 = vsel %vm8483_vm4, %v1765_v0, %v6543_v43  ;;  %vm8484_vm2 = vmmov %vm8483_vm4  ;;  %vm8485_vm10 = vcmask 441344  }
 0x394   : > { %v1777_v62 = vrot.slane %v1766_v36, 4  ;;  %vm8492_vm4 = vmmov %vm8484_vm2 }
 0x395   : > { %v1753_v8 = vpop.permute.xlu1 %1752  ;;  %v1627_v24 = vpop.permute.xlu0 %1626 }
 0x396   : > { %v1634_v38 = vsel %vm8479_vm1, %v1625_v31, %v1627_v24  ;;  %v1647_v10 = vsel %vm8480_vm12, %v1627_v24, %v1643_v9  ;;  %v1761_v13 = vsel %vm8484_vm2, %v6501_v20, %v1753_v8  ;;  %vm8487_vm1 = vcmask 359424   ;;  %v8508_v24 = vld [vmem:[#allocation57_spill] sm:$0xff] }
 0x397   : > { %v1697_v25 = vsel %vm8481_vm13, %v1634_v38, %v1681_v14  ;;  %v1698_v29 = vsel %vm8482_vm14, %v1647_v10, %v1682_v30  ;;  %v1774_v44 = vrot.slane %v1761_v13, 4  ;;  %vm8488_vm12 = vmmov %vm8487_vm1  ;;  %v8510_v10 = vld [vmem:[#allocation55_spill] sm:$0xff] }
 0x398   : > { %v4412_v18 = vpack.c.bf16 %v1697_v25, %v1603_v2  ;;  %v4444_v33 = vpack.c.bf16 %v1698_v29, %v1604_v45  ;;  %vm8490_vm13 = vmmov %vm8485_vm10 }
 0x399   : > { %v1847_v58 = vpop.permute.xlu1 %1846  ;;  %v1859_v23 = vpop.permute.xlu0 %1858  ;;  %vm8491_vm14 = vmmov %vm8478_vm0 }
 0x39a   : > { %4413 = vmatprep.subr.bf16.mxu0 %v4412_v18  ;;  %4445 = vmatpush1.bf16.msra.mxu1 %v4444_v33  ;;  %v1855_v43 = vsel %vm8487_vm1, %v8486_v39, %v1847_v58  ;;  %v1860_v5 = vsel %vm8488_vm12, %v1859_v23, %v6541_v27  ;;  %vm8496_vm1 = vmmov %vm8491_vm14  ;;  %v8512_v18 = vld [vmem:[#allocation56_spill] sm:$0xff] }
 0x39b   : > { %4415 = vmatpush1.bf16.msra.mxu0 %v4414_v11  ;;  %v1868_v20 = vrot.slane %v1855_v43, 4  ;;  %v1871_v51 = vrot.slane %v1860_v5, 4  ;;  %vm8497_vm12 = vmmov %vm8496_vm1 }
 0x39d   : > { %v1737_v53 = vpop.permute.xlu1 %1736  ;;  %v1755_v55 = vpop.permute.xlu0 %1754 }
 0x39e   : > { %v1738_v28 = vsel %vm8485_vm10, %v1737_v53, %v6591_v4  ;;  %v1762_v61 = vsel %vm8492_vm4, %v1753_v8, %v1755_v55  ;;  %v1768_v12 = vsel %vm8484_vm2, %v1755_v55, %v1765_v0  ;;  %vm8494_vm10 = vcmask 367616   ;;  %v8516_v55 = vld [vmem:[#allocation60_spill] sm:$0xff] }
 0x39f   : > { %v1793_v48 = vsel %vm8478_vm0, %v1738_v28, %v1777_v62  ;;  %vm8495_vm0 = vmmov %vm8494_vm10  ;;  %v1775_v31 = vrot.slane %v1762_v61, 4  ;;  %v1776_v9 = vrot.slane %v1768_v12, 4  ;;  %vm8500_vm4 = vcmask 441344   ;;  %v8518_v28 = vld [vmem:[#allocation59_spill] sm:$0xff] }
 0x3a0   : > { %vm8501_vm2 = vmmov %vm8500_vm4 }
 0x3a1   : > { %v1719_v47 = vpop.permute.xlu1 %1718  ;;  %v1849_v52 = vpop.permute.xlu0 %1848 }
 0x3a2   : > { %v1727_v46 = vsel %vm8490_vm13, %v8489_v63, %v1719_v47  ;;  %vm8498_vm13 = vcmask 359424  }
 0x3a3   : > { %v1790_v22 = vsel %vm8491_vm14, %v1727_v46, %v1774_v44  ;;  %v1856_v54 = vsel %vm8498_vm13, %v1847_v58, %v1849_v52  ;;  %vm8499_vm14 = vmmov %vm8498_vm13 }
 0x3a4   : > { %v1862_v32 = vsel %vm8499_vm14, %v1849_v52, %v1859_v23  ;;  %v1869_v15 = vrot.slane %v1856_v54, 4 }
 0x3a5   : > { %v1813_v59 = vpop.permute.xlu1 %1812  ;;  %v1831_v4 = vpop.permute.xlu0 %1830  ;;  %v1870_v16 = vrot.slane %v1862_v32, 4 }
 0x3a6   : > { %v1821_v56 = vsel %vm8494_vm10, %v8493_v19, %v1813_v59  ;;  %v1832_v50 = vsel %vm8495_vm0, %v1831_v4, %v6576_v41  ;;  %vm8502_vm10 = vmmov %vm8496_vm1 }
 0x3a7   : > { %v1884_v27 = vsel %vm8496_vm1, %v1821_v56, %v1868_v20  ;;  %v1887_v6 = vsel %vm8497_vm12, %v1832_v50, %v1871_v51  ;;  %vm8503_vm0 = vmmov %vm8496_vm1  ;;  %vm8504_vm1 = vcmask 367616  }
 0x3a8   : > { %v4446_v40 = vpack.c.bf16 %v1887_v6, %v1793_v48  ;;  %vm8505_vm12 = vmmov %vm8504_vm1  ;;  %v4418_v8 = vpack.c.bf16 %v1884_v27, %v1790_v22 }
 0x3a9   : > { %v1953_v35 = vpop.permute.xlu1 %1952  ;;  %vm8506_vm13 = vmmov %vm8503_vm0 }
 0x3aa   : > { %v1721_v7 = vpop.permute.xlu0 %1720  ;;  %4447 = vmatprep.subr.bf16.mxu1 %v4446_v40  ;;  %vm8507_vm14 = vmmov %vm8503_vm0 }
 0x3ab   : > { %v1728_v26 = vsel %vm8500_vm4, %v1719_v47, %v1721_v7  ;;  %v1741_v3 = vsel %vm8501_vm2, %v1721_v7, %v1737_v53  ;;  %vm8509_vm4 = vcmask 285696  }
 0x3ac   : > { %v1791_v41 = vsel %vm8502_vm10, %v1728_v26, %v1775_v31  ;;  %v1792_v1 = vsel %vm8503_vm0, %v1741_v3, %v1776_v9  ;;  %v1954_v38 = vsel %vm8509_vm4, %v1953_v35, %v8508_v24  ;;  %vm8511_vm2 = vmmov %vm8509_vm4  ;;  %vm8513_vm10 = vcmask 293888  }
 0x3ad   : > { %v1943_v0 = vpop.permute.xlu1 %1942  ;;  %v1965_v58 = vrot.slane %v1954_v38, 4  ;;  %vm8520_vm4 = vmmov %vm8503_vm0 }
 0x3ae   : > { %v1815_v57 = vpop.permute.xlu0 %1814 }
 0x3af   : > { %v1822_v17 = vsel %vm8504_vm1, %v1813_v59, %v1815_v57  ;;  %v1835_v34 = vsel %vm8505_vm12, %v1815_v57, %v1831_v4  ;;  %vm8514_vm1 = vmmov %vm8511_vm2  ;;  %v8525_v59 = vld [vmem:[#allocation58_spill] sm:$0xff] }
 0x3b0   : > { %v1885_v21 = vsel %vm8506_vm13, %v1822_v17, %v1869_v15  ;;  %v1886_v49 = vsel %vm8507_vm14, %v1835_v34, %v1870_v16  ;;  %v1956_v62 = vsel %vm8514_vm1, %v1943_v0, %v1953_v35  ;;  %vm8515_vm12 = vmmov %vm8514_vm1  ;;  %vm8517_vm13 = vcmask 277504  }
 0x3b1   : > { %v4416_v2 = vpack.c.bf16 %v1885_v21, %v1791_v41  ;;  %v4448_v45 = vpack.c.bf16 %v1886_v49, %v1792_v1  ;;  %v1907_v14 = vpop.permute.xlu1 %1906  ;;  %vm8519_vm14 = vmmov %vm8513_vm10  ;;  %v1964_v47 = vrot.slane %v1956_v62, 4 }
 0x3b2   : > { %v1941_v30 = vpop.permute.xlu0 %1940  ;;  %v1915_v33 = vsel %vm8513_vm10, %v8512_v18, %v1907_v14  ;;  %vm8523_vm1 = vmmov %vm8520_vm4 }
 0x3b3   : > { %v1949_v25 = vsel %vm8511_vm2, %v8510_v10, %v1941_v30  ;;  %4417 = vmatprep.subr.bf16.mxu0 %v4416_v2  ;;  %4449 = vmatpush1.bf16.msra.mxu1 %v4448_v45  ;;  %v1950_v53 = vsel %vm8515_vm12, %v1941_v30, %v1943_v0  ;;  %vm8521_vm2 = vmmov %vm8517_vm13 }
 0x3b4   : > { %v1962_v29 = vrot.slane %v1949_v25, 4  ;;  %4419 = vmatpush1.bf16.msra.mxu0 %v4418_v8  ;;  %v1963_v52 = vrot.slane %v1950_v53, 4  ;;  %vm8524_vm12 = vmmov %vm8523_vm1 }
 0x3b5   : > { %v2019_v11 = vpop.permute.xlu1 %2018 }
 0x3b6   : > { %v1978_v23 = vsel %vm8503_vm0, %v1915_v33, %v1962_v29  ;;  %v1925_v36 = vpop.permute.xlu0 %1924  ;;  %v2020_v13 = vsel %vm8517_vm13, %v2019_v11, %v8516_v55  ;;  %vm8522_vm0 = vmmov %vm8513_vm10 }
 0x3b7   : > { %v1926_v48 = vsel %vm8519_vm14, %v1925_v36, %v8518_v28  ;;  %2031 = vst [vmem:[#allocation2 + $0x378] sm:$0xf] %v2020_v13  ;;  %vm8526_vm13 = vmmov %vm8521_vm2 }
 0x3b8   : > { %v1981_v44 = vsel %vm8520_vm4, %v1926_v48, %v1965_v58  ;;  %vm8527_vm14 = vmmov %vm8521_vm2  ;;  %vm8528_vm4 = vcmask 883712  }
 0x3b9   : > { %v2003_v39 = vpop.permute.xlu1 %2002 }
 0x3ba   : > { %v1909_v43 = vpop.permute.xlu0 %1908  ;;  %v2023_v5 = vsel %vm8521_vm2, %v2003_v39, %v2019_v11  ;;  %vm8529_vm2 = vmmov %vm8528_vm4 }
 0x3bb   : > { %v1916_v63 = vsel %vm8513_vm10, %v1907_v14, %v1909_v43  ;;  %v1929_v46 = vsel %vm8522_vm0, %v1909_v43, %v1925_v36  ;;  %2030 = vst [vmem:[#allocation2 + $0x370] sm:$0xf] %v2023_v5 }
 0x3bc   : > { %v1979_v22 = vsel %vm8523_vm1, %v1916_v63, %v1963_v52  ;;  %v1980_v20 = vsel %vm8524_vm12, %v1929_v46, %v1964_v47  ;;  %v8577_v47 = vld [vmem:[#allocation23_spill] sm:$0xff] }
 0x3be   : > { %v2001_v51 = vpop.permute.xlu0 %2000  ;;  %v2144_v12 = vld [vmem:[#allocation2 + $0x378] sm:$0xf] }
 0x3bf   : > { %v2009_v4 = vsel %vm8526_vm13, %v8525_v59, %v2001_v51  ;;  %v2010_v61 = vsel %vm8527_vm14, %v2001_v51, %v2003_v39  ;;  %v4450_v19 = vpack.c.bf16 %v2144_v12, %v1981_v44 }
 0x3c0   : > { %2028 = vst [vmem:[#allocation2 + $0x360] sm:$0xf] %v2009_v4  ;;  %2029 = vst [vmem:[#allocation2 + $0x368] sm:$0xf] %v2010_v61 }
 0x3c1   : > { %4452 = vmatprep.subr.msk.bf16.mxu1 %vm6667_vm15, %v4450_v19 }
 0x3c2   : > { %v2143_v56 = vld [vmem:[#allocation2 + $0x370] sm:$0xf] }
 0x3c3   : > { %v4453_v50 = vpack.c.bf16 %v2143_v56, %v1980_v20 }
 0x3c5   : > { %4455 = vmatpush1.bf16.msk.msra.mxu1 %vm6667_vm15, %v4453_v50 }
 0x3c7   : > { %v2142_v27 = vld [vmem:[#allocation2 + $0x368] sm:$0xf]  ;;  %v2141_v6 = vld [vmem:[#allocation2 + $0x360] sm:$0xf] }
 0x3c8   : > { %v4420_v40 = vpack.c.bf16 %v2142_v27, %v1979_v22  ;;  %v4423_v31 = vpack.c.bf16 %v2141_v6, %v1978_v23  ;;  %4329 = vmatmul.mubr.msk.f32.vlgmr.msra.gmra.mrb[2].mxu1 %vm8528_vm4, %v6706_v60 }
 0x3ca   : > { %4422 = vmatprep.subr.msk.bf16.mxu0 %vm6667_vm15, %v4420_v40 }
 0x3cb   : > { %4425 = vmatpush1.bf16.msk.msra.mxu0 %vm6667_vm15, %v4423_v31 }
 0x3ce   : > { %4326 = vmatmul.mubr.msk.f32.vlgmr.msra.gmra.mrb[2].mxu0 %vm8529_vm2, %v6706_v60  ;;  %vm8532_vm2 = vcmask 7168  }
 0x3cf   : > { %v2149_v9 = vpop.permute.xlu0 %2148 }
 0x40c   : > { %v2315_v35 = vpop.f32.mrb[0].mxu1  ;;  %v2244_v7 = vpop.f32.mrb[0].mxu0 }
 0x40d   : > { %v2316_v54 = vadd.f32 %v2315_v35, %v2149_v9  ;;  %v2317_v32 = vpop.f32.mrb[1].mxu1  ;;  %v2246_v26 = vpop.f32.mrb[1].mxu0  ;;  %v2245_v3 = vadd.f32 %v2244_v7, %v2149_v9 }
 0x40e   : > { %v2247_v41 = vadd.f32 %v2246_v26, %v2149_v9  ;;  %v2318_v57 = vadd.f32 %v2317_v32, %v2149_v9 }
 0x40f   : > { %v2472_v1 = vmul.f32 0.1, %v2316_v54  ;;  %vm2462_vm10 = vcmp.gt.f32.partialorder %v2245_v3, 0.0  ;;  %v2470_v15 = vmul.f32 0.1, %v2245_v3  ;;  %vm2464_vm1 = vcmp.gt.f32.partialorder %v2316_v54, 0.0 }
 0x410   : > { %vm2463_vm0 = vcmp.gt.f32.partialorder %v2247_v41, 0.0  ;;  %v2471_v16 = vmul.f32 0.1, %v2247_v41  ;;  %v2473_v17 = vmul.f32 0.1, %v2318_v57  ;;  %vm2465_vm15 = vcmp.gt.f32.partialorder %v2318_v57, 0.0 }
 0x411   : > { %v6941_v0 = vsel %vm2462_vm10, %v2245_v3, %v2470_v15  ;;  %v2480_v60 = vsel %vm2464_vm1, %v2316_v54, %v2472_v1  ;;  %vm8533_vm10 = vcmask 15360  }
 0x412   : > { %2497 = vrot.lane.b32.xlu1 %v6941_v0, %s8530_s30  ;;  %v2479_v42 = vsel %vm2463_vm0, %v2247_v41, %v2471_v16  ;;  %v2481_v34 = vsel %vm2465_vm15, %v2318_v57, %v2473_v17  ;;  %vm8535_vm0 = vmmov %vm8532_vm2  ;;  %v8550_v41 = vld [vmem:[#allocation10_spill] sm:$0xff] }
 0x413   : > { %2499 = vrot.lane.b32.xlu0 %v2479_v42, %s8530_s30  ;;  %vm8537_vm1 = vmmov %vm8533_vm10 }
 0x414   : > { %vm8552_vm15 = vmmov %vm8537_vm1 }
 0x416   : > { %2501 = vrot.lane.b32.xlu1 %v2480_v60, %s8530_s30 }
 0x417   : > { %2532 = vrot.lane.b32.xlu0 %v2479_v42, %s8531_s10 }
 0x41a   : > { %2530 = vrot.lane.b32.xlu1 %v6941_v0, %s8531_s10 }
 0x41e   : > { %2534 = vrot.lane.b32.xlu1 %v2480_v60, %s8531_s10 }
 0x422   : > { %2503 = vrot.lane.b32.xlu1 %v2481_v34, %s8530_s30 }
 0x426   : > { %2536 = vrot.lane.b32.xlu1 %v2481_v34, %s8531_s10 }
 0x484   : > { %v6953_v21 = vpop.permute.xlu1 %2497 }
 0x485   : > { %v2500_v11 = vpop.permute.xlu0 %2499 }
 0x486   : > { %v2511_v39 = vsel %vm8535_vm0, %v6953_v21, %v2500_v11 }
 0x487   : > { %v2561_v22 = vsel %vm5342_vm5, %v2479_v42, %v2511_v39  ;;  %vm8546_vm5 = vmmov %vm8535_vm0 }
 0x488   : > { %v2502_v49 = vpop.permute.xlu1 %2501 }
 0x489   : > { %v2512_v13 = vsel %vm8532_vm2, %v2500_v11, %v2502_v49  ;;  %v2533_v28 = vpop.permute.xlu0 %2532  ;;  %vm8560_vm2 = vmmov %vm8537_vm1 }
 0x48a   : > { %v2562_v52 = vsel %vm5336_vm3, %v2480_v60, %v2512_v13  ;;  %vm8542_vm3 = vmmov %vm8535_vm0  ;;  %v8553_v60 = vld [vmem:[#allocation14_spill] sm:$0xff] }
 0x48b   : > { %v8574_v13 = vld [vmem:[#allocation18_spill] sm:$0xff] }
 0x48c   : > { %v6957_v25 = vpop.permute.xlu1 %2530 }
 0x48d   : > { %v2544_v63 = vsel %vm8537_vm1, %v6957_v25, %v2533_v28 }
 0x48e   : > { %v6991_v51 = vsel %vm5350_vm7, %v2544_v63, %v2561_v22  ;;  %vm8547_vm7 = vmmov %vm8537_vm1  ;;  %v8584_v22 = vld [vmem:[#allocation20_spill] sm:$0xff] }
 0x490   : > { %v2535_v55 = vpop.permute.xlu1 %2534 }
 0x491   : > { %v2545_v48 = vsel %vm8533_vm10, %v2533_v28, %v2535_v55 }
 0x492   : > { %v6980_v5 = vsel %vm5346_vm6, %v2545_v48, %v2562_v52  ;;  %vm8543_vm6 = vmmov %vm8537_vm1 }
 0x494   : > { %v2504_v44 = vpop.permute.xlu1 %2503 }
 0x495   : > { %v2513_v4 = vsel %vm8542_vm3, %v2502_v49, %v2504_v44  ;;  %v8557_v49 = vld [vmem:[#allocation15_spill] sm:$0xff] }
 0x496   : > { %v2563_v19 = vsel %vm5362_vm9, %v2481_v34, %v2513_v4  ;;  %vm8549_vm9 = vmmov %vm8535_vm0 }
 0x498   : > { %v2537_v59 = vpop.permute.xlu1 %2536 }
 0x499   : > { %v2546_v61 = vsel %vm8543_vm6, %v2535_v55, %v2537_v59  ;;  %vm8569_vm6 = vmmov %vm8546_vm5 }
 0x49a   : > { %v2571_v50 = vsel %vm5398_vm11, %v2546_v61, %v2563_v19  ;;  %vm8551_vm11 = vnez %v8550_v41 }
 0x49b   : > { %v2457_v2 = vpop.f32.mrb[2].mxu1 }
 0x49c   : > { %v2458_v45 = vadd.f32 %v2457_v2, %v2149_v9  ;;  %v2459_v14 = vpop.f32.mrb[3].mxu1 }
 0x49d   : > { %v2460_v30 = vadd.f32 %v2459_v14, %v2149_v9 }
 0x49e   : > { %vm2468_vm12 = vcmp.gt.f32.partialorder %v2458_v45, 0.0  ;;  %v2476_v8 = vmul.f32 0.1, %v2458_v45 }
 0x49f   : > { %vm2469_vm13 = vcmp.gt.f32.partialorder %v2460_v30, 0.0  ;;  %v2477_v24 = vmul.f32 0.1, %v2460_v30 }
 0x4a0   : > { %v6955_v10 = vsel %vm2468_vm12, %v2458_v45, %v2476_v8  ;;  %vm8554_vm12 = vnez %v8553_v60  ;;  %v8561_v8 = vld [vmem:[#allocation12_spill] sm:$0xff] }
 0x4a1   : > { %v2386_v38 = vpop.f32.mrb[2].mxu0  ;;  %2509 = vrot.lane.b32.xlu0 %v6955_v10, %s8530_s30  ;;  %v2485_v33 = vsel %vm2469_vm13, %v2460_v30, %v2477_v24  ;;  %vm8555_vm13 = vmmov %vm8535_vm0  ;;  %vm8562_vm10 = vnez %v8561_v8  ;;  %v8563_v24 = vld [vmem:[#allocation17_spill] sm:$0xff] }
 0x4a2   : > { %v2387_v29 = vadd.f32 %v2386_v38, %v2149_v9  ;;  %v2388_v18 = vpop.f32.mrb[3].mxu0  ;;  %2487 = vrot.lane.b32.xlu1 %v2485_v33, %s8530_s30 }
 0x4a3   : > { %v2389_v58 = vadd.f32 %v2388_v18, %v2149_v9 }
 0x4a4   : > { %vm2466_vm14 = vcmp.gt.f32.partialorder %v2387_v29, 0.0  ;;  %v2474_v23 = vmul.f32 0.1, %v2387_v29 }
 0x4a5   : > { %vm2467_vm4 = vcmp.gt.f32.partialorder %v2389_v58, 0.0  ;;  %v2475_v36 = vmul.f32 0.1, %v2389_v58 }
 0x4a6   : > { %v2482_v62 = vsel %vm2466_vm14, %v2387_v29, %v2474_v23  ;;  %vm8556_vm14 = vmmov %vm8535_vm0  ;;  %vm8564_vm0 = vnez %v8563_v24  ;;  %v8565_v29 = vld [vmem:[#allocation13_spill] sm:$0xff] }
 0x4a7   : > { %2505 = vrot.lane.b32.xlu0 %v2482_v62, %s8530_s30  ;;  %v6963_v53 = vsel %vm2467_vm4, %v2389_v58, %v2475_v36  ;;  %vm8559_vm4 = vmmov %vm8537_vm1  ;;  %vm8566_vm1 = vnez %v8565_v29  ;;  %v8571_v36 = vld [vmem:[#allocation16_spill] sm:$0xff] }
 0x4a8   : > { %2507 = vrot.lane.b32.xlu1 %v6963_v53, %s8530_s30  ;;  %s8538_s30 = smov 10  }
 0x4ab   : > { %2542 = vrot.lane.b32.xlu0 %v6955_v10, %s8531_s10 }
 0x4ac   : > { %2540 = vrot.lane.b32.xlu1 %v6963_v53, %s8531_s10 }
 0x4af   : > { %2538 = vrot.lane.b32.xlu0 %v2482_v62, %s8531_s10 }
 0x4b0   : > { %2591 = vrot.lane.b32.xlu1 %v6980_v5, %s8538_s30 }
 0x4b3   : > { %2527 = vrot.lane.b32.xlu0 %v2485_v33, %s8531_s10  ;;  %s8583_s10 = smov 100  }
 0x4b4   : > { %2622 = vrot.lane.b32.xlu1 %v6991_v51, %s8541_s27 }
 0x4b7   : > { %2589 = vrot.lane.b32.xlu0 %v6991_v51, %s8538_s30 }
 0x4bb   : > { %2593 = vrot.lane.b32.xlu0 %v2571_v50, %s8538_s30 }
 0x4bf   : > { %2624 = vrot.lane.b32.xlu0 %v6980_v5, %s8541_s27 }
 0x4c3   : > { %2626 = vrot.lane.b32.xlu0 %v2571_v50, %s8541_s27 }
 0x513   : > { %v2510_v27 = vpop.permute.xlu0 %2509 }
 0x514   : > { %v2488_v6 = vpop.permute.xlu1 %2487 }
 0x515   : > { %v2517_v3 = vsel %vm8549_vm9, %v2510_v27, %v2488_v6  ;;  %v2526_v17 = vsel %vm8555_vm13, %v2488_v6, %v6953_v21  ;;  %vm8573_vm9 = vcmask 80896   ;;  %v8593_v6 = vld [vmem:[#allocation24_spill] sm:$0xff] }
 0x516   : > { %v2567_v57 = vsel %vm8554_vm12, %v2485_v33, %v2517_v3  ;;  %v2560_v21 = vsel %vm8562_vm10, %v6941_v0, %v2526_v17  ;;  %v8567_v33 = vld [vmem:[#allocation19_spill] sm:$0xff]  ;;  %vm8578_vm12 = vnez %v8577_v47  ;;  %vm8579_vm13 = vmmov %vm8573_vm9 }
 0x517   : > { %vm8568_vm3 = vnez %v8567_v33  ;;  %vm8589_vm10 = vmmov %vm8573_vm9 }
 0x519   : > { %v2506_v40 = vpop.permute.xlu0 %2505 }
 0x51a   : > { %v2514_v9 = vsel %vm8546_vm5, %v2504_v44, %v2506_v40  ;;  %v2508_v35 = vpop.permute.xlu1 %2507  ;;  %vm8570_vm5 = vmmov %vm8560_vm2 }
 0x51b   : > { %v2564_v26 = vsel %vm5358_vm8, %v2482_v62, %v2514_v9  ;;  %v2516_v34 = vsel %vm8556_vm14, %v2508_v35, %v2510_v27  ;;  %vm8558_vm8 = vnez %v8557_v49  ;;  %v2515_v23 = vsel %vm8569_vm6, %v2506_v40, %v2508_v35  ;;  %vm8595_vm6 = vmmov %vm8573_vm9 }
 0x51c   : > { %v2566_v38 = vsel %vm8564_vm0, %v6955_v10, %v2516_v34 }
 0x51d   : > { %v2543_v31 = vpop.permute.xlu0 %2542 }
 0x51e   : > { %v2541_v15 = vpop.permute.xlu1 %2540 }
 0x51f   : > { %v2549_v45 = vsel %vm8559_vm4, %v2541_v15, %v2543_v31  ;;  %vm8585_vm4 = vnez %v8584_v22 }
 0x521   : > { %v2539_v7 = vpop.permute.xlu0 %2538 }
 0x522   : > { %v2547_v54 = vsel %vm8547_vm7, %v2537_v59, %v2539_v7  ;;  %v2548_v0 = vsel %vm8570_vm5, %v2539_v7, %v2541_v15  ;;  %v2592_v10 = vpop.permute.xlu1 %2591  ;;  %vm8572_vm7 = vnez %v8571_v36  ;;  %v8586_v59 = vld [vmem:[#allocation21_spill] sm:$0xff] }
 0x523   : > { %v2572_v1 = vsel %vm8551_vm11, %v2547_v54, %v2564_v26  ;;  %v2565_v62 = vsel %vm8572_vm7, %v6963_v53, %v2515_v23  ;;  %vm8575_vm11 = vnez %v8574_v13  ;;  %v8580_v53 = vld [vmem:[#allocation25_spill] sm:$0xff]  ;;  %v8597_v26 = vld [vmem:[#allocation26_spill] sm:$0xff] }
 0x524   : > { %2595 = vrot.lane.b32.xlu1 %v2572_v1, %s8538_s30  ;;  %v2573_v28 = vsel %vm8575_vm11, %v2548_v0, %v2565_v62  ;;  %vm8581_vm14 = vnez %v8580_v53  ;;  %vm8598_vm7 = vnez %v8597_v26 }
 0x525   : > { %v2528_v16 = vpop.permute.xlu0 %2527 }
 0x526   : > { %v2550_v42 = vsel %vm8552_vm15, %v2543_v31, %v2528_v16  ;;  %v2559_v14 = vsel %vm8560_vm2, %v2528_v16, %v6957_v25  ;;  %v7041_v25 = vsel %vm8568_vm3, %v2549_v45, %v2566_v38  ;;  %vm8576_vm15 = vcmask 162816   ;;  %v2623_v39 = vpop.permute.xlu1 %2622  ;;  %v8607_v45 = vld [vmem:[#allocation31_spill] sm:$0xff]  ;;  %v8613_v38 = vld [vmem:[#allocation33_spill] sm:$0xff] }
 0x527   : > { %v7023_v2 = vsel %vm8558_vm8, %v2550_v42, %v2567_v57  ;;  %v2568_v18 = vsel %vm8566_vm1, %v2559_v14, %v2560_v21  ;;  %vm8582_vm8 = vmmov %vm8576_vm15  ;;  %vm8587_vm2 = vnez %v8586_v59  ;;  %vm8594_vm3 = vnez %v8593_v6  ;;  %v8603_v57 = vld [vmem:[#allocation30_spill] sm:$0xff] }
 0x528   : > { %2628 = vrot.lane.b32.xlu1 %v2572_v1, %s8541_s27  ;;  %2577 = vrot.lane.b32.xlu0 %v7023_v2, %s8538_s30  ;;  %vm8590_vm0 = vmmov %vm8582_vm8 }
 0x529   : > { %v2590_v30 = vpop.permute.xlu0 %2589  ;;  %vm8596_vm5 = vmmov %vm8590_vm0 }
 0x52a   : > { %v2602_v43 = vsel %vm8579_vm13, %v2590_v30, %v2592_v10  ;;  %vm8605_vm13 = vmmov %vm8595_vm6 }
 0x52b   : > { %v2652_v20 = vsel %vm8585_vm4, %v6980_v5, %v2602_v43  ;;  %vm8609_vm4 = vmmov %vm8590_vm0  ;;  %v8628_v43 = vld [vmem:[#allocation48_spill] sm:$0xff] }
 0x52c   : > { %2587 = vrot.lane.b32.xlu1 %v2568_v18, %s8538_s30  ;;  %2599 = vrot.lane.b32.xlu0 %v7041_v25, %s8538_s30 }
 0x52d   : > { %v2594_v58 = vpop.permute.xlu0 %2593 }
 0x52e   : > { %v2603_v55 = vsel %vm8573_vm9, %v2592_v10, %v2594_v58  ;;  %vm8599_vm9 = vmmov %vm8595_vm6 }
 0x52f   : > { %v2653_v52 = vsel %vm8578_vm12, %v2571_v50, %v2603_v55  ;;  %v8591_v50 = vld [vmem:[#allocation22_spill] sm:$0xff]  ;;  %vm8604_vm12 = vnez %v8603_v57  ;;  %v8647_v57 = vld [vmem:[#allocation40_spill] sm:$0xff] }
 0x530   : > { %2617 = vrot.lane.b32.xlu1 %v7023_v2, %s8541_s27  ;;  %2620 = vrot.lane.b32.xlu0 %v2568_v18, %s8541_s27  ;;  %vm8592_vm1 = vnez %v8591_v50 }
 0x531   : > { %v2625_v11 = vpop.permute.xlu0 %2624 }
 0x532   : > { %v2635_v46 = vsel %vm8582_vm8, %v2623_v39, %v2625_v11  ;;  %vm8608_vm8 = vnez %v8607_v45  ;;  %v8650_v45 = vld [vmem:[#allocation36_spill] sm:$0xff] }
 0x533   : > { %v7077_v4 = vsel %vm8587_vm2, %v2635_v46, %v2652_v20  ;;  %vm8610_vm2 = vmmov %vm8590_vm0 }
 0x534   : > { %2632 = vrot.lane.b32.xlu0 %v7041_v25, %s8541_s27  ;;  %2597 = vrot.lane.b32.xlu1 %v2573_v28, %s8538_s30  ;;  %s8588_s30 = smov 72  }
 0x535   : > { %v2627_v48 = vpop.permute.xlu0 %2626 }
 0x536   : > { %v2636_v44 = vsel %vm8576_vm15, %v2625_v11, %v2627_v48  ;;  %vm8602_vm15 = vmmov %vm8590_vm0  ;;  %v8622_v11 = vld [vmem:[#allocation34_spill] sm:$0xff] }
 0x537   : > { %v7066_v63 = vsel %vm8581_vm14, %v2636_v44, %v2653_v52  ;;  %vm8606_vm14 = vmmov %vm8595_vm6  ;;  %v8626_v52 = vld [vmem:[#allocation46_spill] sm:$0xff] }
 0x538   : > { %2630 = vrot.lane.b32.xlu1 %v2573_v28, %s8541_s27  ;;  %2683 = vrot.lane.b32.xlu0 %v7066_v63, %s8583_s10  ;;  %s8656_s27 = smov 127  }
 0x53c   : > { %2718 = vrot.lane.b32.xlu0 %v7077_v4, %s8588_s30  ;;  %2681 = vrot.lane.b32.xlu1 %v7077_v4, %s8583_s10 }
 0x540   : > { %2720 = vrot.lane.b32.xlu1 %v7066_v63, %s8588_s30 }
 0x596   : > { %v2596_v61 = vpop.permute.xlu1 %2595 }
 0x597   : > { %v2604_v12 = vsel %vm8589_vm10, %v2594_v58, %v2596_v61  ;;  %v8617_v58 = vld [vmem:[#allocation35_spill] sm:$0xff] }
 0x598   : > { %v2654_v27 = vsel %vm8592_vm1, %v2572_v1, %v2604_v12  ;;  %v8600_v1 = vld [vmem:[#allocation28_spill] sm:$0xff] }
 0x599   : > { %vm8601_vm11 = vnez %v8600_v1 }
 0x59a   : > { %v2578_v19 = vpop.permute.xlu0 %2577  ;;  %v2629_v56 = vpop.permute.xlu1 %2628 }
 0x59b   : > { %v2637_v5 = vsel %vm8590_vm0, %v2627_v48, %v2629_v56  ;;  %vm8614_vm0 = vnez %v8613_v38  ;;  %v8657_v38 = vld [vmem:[#allocation37_spill] sm:$0xff] }
 0x59c   : > { %v2662_v40 = vsel %vm8594_vm3, %v2637_v5, %v2654_v27  ;;  %vm8618_vm3 = vnez %v8617_v58  ;;  %v8632_v27 = vld [vmem:[#allocation38_spill] sm:$0xff] }
 0x59d   : > { %2722 = vrot.lane.b32.xlu0 %v2662_v40, %s8588_s30  ;;  %2685 = vrot.lane.b32.xlu1 %v2662_v40, %s8583_s10  ;;  %v8661_v58 = vld [vmem:[#allocation50_spill] sm:$0xff] }
 0x59e   : > { %v2600_v31 = vpop.permute.xlu0 %2599  ;;  %v2588_v9 = vpop.permute.xlu1 %2587 }
 0x59f   : > { %v2616_v35 = vsel %vm8595_vm6, %v2578_v19, %v2588_v9  ;;  %v2607_v41 = vsel %vm8599_vm9, %v2600_v31, %v2578_v19  ;;  %v2601_v34 = vsel %vm8605_vm13, %v2588_v9, %v2590_v30  ;;  %vm8623_vm9 = vnez %v8622_v11  ;;  %v8635_v9 = vld [vmem:[#allocation42_spill] sm:$0xff] }
 0x5a0   : > { %v2650_v3 = vsel %vm8598_vm7, %v2568_v18, %v2616_v35  ;;  %v2657_v17 = vsel %vm8604_vm12, %v7023_v2, %v2607_v41  ;;  %v8611_v2 = vld [vmem:[#allocation27_spill] sm:$0xff]  ;;  %v8615_v18 = vld [vmem:[#allocation29_spill] sm:$0xff]  ;;  %vm8627_vm12 = vnez %v8626_v52  ;;  %vm8629_vm13 = vnez %v8628_v43  ;;  %v8641_v41 = vld [vmem:[#allocation44_spill] sm:$0xff] }
 0x5a1   : > { %vm8612_vm10 = vnez %v8611_v2  ;;  %vm8616_vm1 = vnez %v8615_v18 }
 0x5a2   : > { %v2621_v7 = vpop.permute.xlu0 %2620  ;;  %v2618_v54 = vpop.permute.xlu1 %2617  ;;  %v2651_v30 = vsel %vm8612_vm10, %v6991_v51, %v2601_v34  ;;  %vm8636_vm10 = vnez %v8635_v9 }
 0x5a3   : > { %v2649_v32 = vsel %vm8596_vm5, %v2618_v54, %v2621_v7  ;;  %v2634_v8 = vsel %vm8609_vm4, %v2621_v7, %v2623_v39  ;;  %vm8619_vm5 = vmmov %vm8610_vm2  ;;  %vm8633_vm4 = vnez %v8632_v27 }
 0x5a4   : > { %v7100_v15 = vsel %vm8601_vm11, %v2649_v32, %v2650_v3  ;;  %v2659_v33 = vsel %vm8616_vm1, %v2634_v8, %v2651_v30  ;;  %vm8624_vm11 = vcmask 818176  }
 0x5a5   : > { %2677 = vrot.lane.b32.xlu1 %v7100_v15, %s8583_s10 }
 0x5a6   : > { %v2633_v16 = vpop.permute.xlu0 %2632  ;;  %v2598_v42 = vpop.permute.xlu1 %2597 }
 0x5a7   : > { %v2640_v60 = vsel %vm8602_vm15, %v2633_v16, %v2618_v54  ;;  %v2606_v49 = vsel %vm8606_vm14, %v2598_v42, %v2600_v31  ;;  %v2605_v0 = vsel %vm8595_vm6, %v2596_v61, %v2598_v42  ;;  %vm8625_vm15 = vcmask 588800   ;;  %vm8630_vm14 = vmmov %vm8624_vm11 }
 0x5a8   : > { %v7112_v14 = vsel %vm8608_vm8, %v2640_v60, %v2657_v17  ;;  %v2656_v29 = vsel %vm8614_vm0, %v7041_v25, %v2606_v49  ;;  %v8620_v25 = vld [vmem:[#allocation32_spill] sm:$0xff]  ;;  %vm8631_vm8 = vmmov %vm8624_vm11 }
 0x5a9   : > { %2714 = vrot.lane.b32.xlu1 %v7100_v15, %s8588_s30  ;;  %2667 = vrot.lane.b32.xlu0 %v7112_v14, %s8583_s10  ;;  %vm8621_vm7 = vnez %v8620_v25  ;;  %vm8637_vm0 = vmmov %vm8625_vm15 }
 0x5aa   : > { %v2631_v21 = vpop.permute.xlu1 %2630  ;;  %v2655_v10 = vsel %vm8621_vm7, %v2573_v28, %v2605_v0  ;;  %v2684_v55 = vpop.permute.xlu0 %2683  ;;  %vm8638_vm1 = vmmov %vm8637_vm0 }
 0x5ab   : > { %v2639_v24 = vsel %vm8610_vm2, %v2631_v21, %v2633_v16  ;;  %v2638_v51 = vsel %vm8619_vm5, %v2629_v56, %v2631_v21  ;;  %vm8634_vm2 = vmmov %vm8631_vm8  ;;  %vm8642_vm5 = vnez %v8641_v41  ;;  %v8652_v21 = vld [vmem:[#allocation41_spill] sm:$0xff] }
 0x5ac   : > { %v7130_v23 = vsel %vm8618_vm3, %v2639_v24, %v2656_v29  ;;  %v7145_v36 = vsel %vm8623_vm9, %v2638_v51, %v2655_v10  ;;  %vm8639_vm3 = vmmov %vm8634_vm2  ;;  %v8659_v29 = vld [vmem:[#allocation47_spill] sm:$0xff]  ;;  %v8663_v51 = vld [vmem:[#allocation49_spill] sm:$0xff] }
 0x5ad   : > { %2679 = vrot.lane.b32.xlu0 %v2659_v33, %s8583_s10  ;;  %2707 = vrot.lane.b32.xlu1 %v7130_v23, %s8588_s30  ;;  %vm8640_vm6 = vmmov %vm8637_vm0  ;;  %v8665_v10 = vld [vmem:[#allocation43_spill] sm:$0xff] }
 0x5ae   : > { %v2682_v62 = vpop.permute.xlu1 %2681  ;;  %v2719_v44 = vpop.permute.xlu0 %2718  ;;  %vm8645_vm9 = vmmov %vm8637_vm0 }
 0x5af   : > { %v2693_v5 = vsel %vm8630_vm14, %v2682_v62, %v2684_v55  ;;  %vm8653_vm14 = vnez %v8652_v21 }
 0x5b0   : > { %v2743_v6 = vsel %vm8633_vm4, %v7066_v63, %v2693_v5  ;;  %v8643_v63 = vld [vmem:[#allocation39_spill] sm:$0xff]  ;;  %vm8655_vm4 = vmmov %vm8634_vm2 }
 0x5b1   : > { %2709 = vrot.lane.b32.xlu0 %v7112_v14, %s8588_s30  ;;  %2689 = vrot.lane.b32.xlu1 %v7130_v23, %s8583_s10  ;;  %vm8644_vm7 = vnez %v8643_v63 }
 0x5b2   : > { %v2721_v13 = vpop.permute.xlu1 %2720 }
 0x5b3   : > { %v2728_v28 = vsel %vm8625_vm15, %v2719_v44, %v2721_v13  ;;  %vm8648_vm15 = vnez %v8647_v57 }
 0x5b5   : > { %2716 = vrot.lane.b32.xlu0 %v2659_v33, %s8588_s30  ;;  %2724 = vrot.lane.b32.xlu1 %v7145_v36, %s8588_s30  ;;  %s8674_s30 = smov 55  }
 0x5b9   : > { %2687 = vrot.lane.b32.xlu0 %v7145_v36, %s8583_s10  ;;  %s8673_s10 = smov 17  }
 0x60f   : > { %v2686_v48 = vpop.permute.xlu1 %2685  ;;  %v2723_v46 = vpop.permute.xlu0 %2722 }
 0x610   : > { %v2694_v47 = vsel %vm8624_vm11, %v2684_v55, %v2686_v48  ;;  %vm8646_vm11 = vmmov %vm8634_vm2 }
 0x611   : > { %v2744_v39 = vsel %vm8627_vm12, %v2662_v40, %v2694_v47  ;;  %vm8649_vm12 = vmmov %vm8637_vm0 }
 0x612   : > { %v7158_v53 = vsel %vm8629_vm13, %v2728_v28, %v2744_v39  ;;  %vm8651_vm13 = vnez %v8650_v45 }
 0x613   : > { %3260 = vrot.lane.b32.xlu0 %v7158_v53, %s8141_s13 }
 0x617   : > { %3297 = vrot.lane.b32.xlu0 %v7158_v53, %s5169_s9  ;;  %v2678_v22 = vpop.permute.xlu1 %2677 }
 0x61b   : > { %v2668_v20 = vpop.permute.xlu0 %2667  ;;  %3334 = vrot.lane.b32.xlu0 %v7158_v53, %s8139_s12  ;;  %v2715_v59 = vpop.permute.xlu1 %2714 }
 0x61c   : > { %v2706_v31 = vsel %vm8634_vm2, %v2668_v20, %v2678_v22 }
 0x61d   : > { %v2740_v17 = vsel %vm8648_vm15, %v7100_v15, %v2706_v31 }
 0x61f   : > { %v2680_v61 = vpop.permute.xlu0 %2679  ;;  %3371 = vrot.lane.b32.xlu0 %v7158_v53, %s8143_s14  ;;  %v2708_v12 = vpop.permute.xlu1 %2707 }
 0x620   : > { %v2692_v50 = vsel %vm8631_vm8, %v2680_v61, %v2682_v62  ;;  %v2691_v26 = vsel %vm8639_vm3, %v2678_v22, %v2680_v61  ;;  %vm8654_vm8 = vmmov %vm8634_vm2  ;;  %vm8658_vm2 = vnez %v8657_v38  ;;  %vm8664_vm3 = vnez %v8663_v51  ;;  %v8667_v62 = vld [vmem:[#allocation51_spill] sm:$0xff] }
 0x621   : > { %v2742_v35 = vsel %vm8636_vm10, %v7077_v4, %v2692_v50  ;;  %v2741_v8 = vsel %vm8651_vm13, %v2659_v33, %v2691_v26  ;;  %vm8660_vm10 = vnez %v8659_v29 }
 0x623   : > { %v2710_v19 = vpop.permute.xlu0 %2709  ;;  %v2690_v56 = vpop.permute.xlu1 %2689 }
 0x624   : > { %v2711_v3 = vsel %vm8640_vm6, %v2708_v12, %v2710_v19  ;;  %v2739_v42 = vsel %vm8645_vm9, %v2710_v19, %v2715_v59  ;;  %v2697_v4 = vsel %vm8646_vm11, %v2690_v56, %v2668_v20  ;;  %vm8666_vm6 = vnez %v8665_v10 }
 0x625   : > { %v7205_v24 = vsel %vm8653_vm14, %v2711_v3, %v2740_v17  ;;  %v7213_v15 = vsel %vm8658_vm2, %v2739_v42, %v2741_v8  ;;  %v2747_v18 = vsel %vm8660_vm10, %v7112_v14, %v2697_v4  ;;  %vm8677_vm11 = vcmask 1039360  }
 0x626   : > { %vm8678_vm15 = vmmov %vm8677_vm11  ;;  %vm8682_vm14 = vcmask 1031168  }
 0x627   : > { %v2717_v40 = vpop.permute.xlu0 %2716  ;;  %v2725_v32 = vpop.permute.xlu1 %2724  ;;  %vm8680_vm13 = vmmov %vm8677_vm11 }
 0x628   : > { %v2726_v7 = vsel %vm8637_vm0, %v2715_v59, %v2717_v40  ;;  %v2727_v54 = vsel %vm8638_vm1, %v2717_v40, %v2719_v44  ;;  %v2731_v34 = vsel %vm8649_vm12, %v2725_v32, %v2708_v12  ;;  %v2730_v33 = vsel %vm8637_vm0, %v2723_v46, %v2725_v32  ;;  %v8670_v44 = vld [vmem:[#allocation45_spill] sm:$0xff]  ;;  %vm8679_vm12 = vmmov %vm8677_vm11 }
 0x629   : > { %v7183_v1 = vsel %vm8642_vm5, %v2726_v7, %v2742_v35  ;;  %v7187_v16 = vsel %vm8644_vm7, %v2727_v54, %v2743_v6  ;;  %vm8662_vm1 = vnez %v8661_v58  ;;  %v7224_v25 = vsel %vm8664_vm3, %v2731_v34, %v2747_v18  ;;  %vm8669_vm7 = vmmov %vm8637_vm0 }
 0x62a   : > { %3708 = vrot.lane.b32.xlu0 %v7187_v16, %s5182_s28  ;;  %v7195_v60 = vpack.i.bf16 %v7187_v16, %v7183_v1  ;;  %vm8668_vm5 = vnez %v8667_v62  ;;  %vm8671_vm9 = vnez %v8670_v44  ;;  %v4763_v28 = vpack.i.bf16 %v7187_v16, %v7205_v24 }
 0x62b   : > { %v2688_v49 = vpop.permute.xlu0 %2687 }
 0x62c   : > { %v2695_v2 = vsel %vm8654_vm8, %v2686_v48, %v2688_v49  ;;  %v2696_v30 = vsel %vm8655_vm4, %v2688_v49, %v2690_v56  ;;  %4704 = vrot.lane.b32.xlu1 %v7195_v60, %s8656_s27  ;;  %v4698_v48 = vpack.i.bf16 %v7213_v15, %v7205_v24  ;;  %vm8683_vm8 = vcmask 965632   ;;  %vm8684_vm4 = vmmov %vm8682_vm14 }
 0x62d   : > { %v2746_v0 = vsel %vm8662_vm1, %v7130_v23, %v2696_v30  ;;  %v2745_v11 = vsel %vm8666_vm6, %v7145_v36, %v2695_v2  ;;  %v2729_v23 = vsel %vm8669_vm7, %v2721_v13, %v2723_v46  ;;  %v4753_v13 = vpack.i.bf16 %v7183_v1, %v7213_v15  ;;  %vm8685_vm2 = vmmov %vm8683_vm8 }
 0x62e   : > { %v7231_v55 = vsel %vm8668_vm5, %v2730_v33, %v2746_v0  ;;  %3710 = vrot.lane.b32.xlu0 %v7158_v53, %s5182_s28  ;;  %v7244_v47 = vsel %vm8671_vm9, %v2729_v23, %v2745_v11  ;;  %v7320_v46 = vpack.i.bf16 %v7158_v53, %v7213_v15  ;;  %vm8686_vm10 = vmmov %vm8684_vm4  ;;  %vm8692_vm7 = vcmask 957440  }
 0x62f   : > { %v7237_v14 = vpack.i.bf16 %v7224_v25, %v7231_v55  ;;  %v4708_v36 = vpack.i.bf16 %v7244_v47, %v7158_v53  ;;  %vm8687_vm0 = vmmov %vm8685_vm2  ;;  %vm8693_vm9 = vcmask 949248  }
 0x630   : > { %vm8688_vm1 = vmmov %vm8684_vm4 }
 0x631   : > { %4714 = vrot.lane.b32.xlu1 %v7237_v14, %s8656_s27  ;;  %vm8689_vm3 = vmmov %vm8688_vm1 }
 0x632   : > { %4699 = vrot.lane.b32.xlu0 %v4698_v48, %s8656_s27  ;;  %vm8690_vm6 = vmmov %vm8687_vm0 }
 0x633   : > { %vm8691_vm5 = vmmov %vm8687_vm0 }
 0x635   : > { %4724 = vrot.lane.b32.xlu1 %v7195_v60, %s5158_s16 }
 0x636   : > { %4709 = vrot.lane.b32.xlu0 %v4708_v36, %s8656_s27  ;;  %s8675_s27 = smov 56  }
 0x639   : > { %4734 = vrot.lane.b32.xlu1 %v7237_v14, %s5158_s16 }
 0x63a   : > { %4719 = vrot.lane.b32.xlu0 %v4698_v48, %s5158_s16 }
 0x63d   : > { %4744 = vrot.lane.b32.xlu1 %v7195_v60, %s5159_s17 }
 0x63e   : > { %4729 = vrot.lane.b32.xlu0 %v4708_v36, %s5158_s16  ;;  %s8672_s16 = smov 18  }
 0x641   : > { %4754 = vrot.lane.b32.xlu1 %v4753_v13, %s5162_s20 }
 0x642   : > { %4739 = vrot.lane.b32.xlu0 %v4698_v48, %s5159_s17 }
 0x645   : > { %4764 = vrot.lane.b32.xlu1 %v4763_v28, %s5162_s20 }
 0x646   : > { %4749 = vrot.lane.b32.xlu0 %v4708_v36, %s5159_s17 }
 0x649   : > { %4774 = vrot.lane.b32.xlu1 %v4763_v28, %s5160_s18 }
 0x64a   : > { %4759 = vrot.lane.b32.xlu0 %v4753_v13, %s5160_s18 }
 0x64d   : > { %4784 = vrot.lane.b32.xlu1 %v4753_v13, %s5163_s23 }
 0x64e   : > { %4769 = vrot.lane.b32.xlu0 %v4708_v36, %s5162_s20 }
 0x651   : > { %4794 = vrot.lane.b32.xlu1 %v4763_v28, %s5163_s23 }
 0x652   : > { %4779 = vrot.lane.b32.xlu0 %v4708_v36, %s5160_s18 }
 0x655   : > { %4804 = vrot.lane.b32.xlu1 %v4763_v28, %s5161_s19 }
 0x656   : > { %4789 = vrot.lane.b32.xlu0 %v4753_v13, %s5161_s19 }
 0x659   : > { %4814 = vrot.lane.b32.xlu1 %v4753_v13, %s5166_s26 }
 0x65a   : > { %4799 = vrot.lane.b32.xlu0 %v4708_v36, %s5163_s23 }
 0x65d   : > { %4824 = vrot.lane.b32.xlu1 %v4763_v28, %s5166_s26 }
 0x65e   : > { %4809 = vrot.lane.b32.xlu0 %v4708_v36, %s5161_s19 }
 0x661   : > { %4834 = vrot.lane.b32.xlu1 %v4763_v28, %s5164_s24 }
 0x662   : > { %4819 = vrot.lane.b32.xlu0 %v4753_v13, %s5164_s24 }
 0x665   : > { %4844 = vrot.lane.b32.xlu1 %v4753_v13, %s8145_s29 }
 0x666   : > { %4829 = vrot.lane.b32.xlu0 %v4708_v36, %s5166_s26 }
 0x669   : > { %4854 = vrot.lane.b32.xlu1 %v4763_v28, %s8145_s29 }
 0x66a   : > { %4839 = vrot.lane.b32.xlu0 %v4708_v36, %s5164_s24 }
 0x66d   : > { %4864 = vrot.lane.b32.xlu1 %v4763_v28, %s5165_s25 }
 0x66e   : > { %4849 = vrot.lane.b32.xlu0 %v4753_v13, %s5165_s25 }
 0x671   : > { %4874 = vrot.lane.b32.xlu1 %v4753_v13, %s8672_s16 }
 0x672   : > { %4859 = vrot.lane.b32.xlu0 %v4708_v36, %s8145_s29 }
 0x675   : > { %4884 = vrot.lane.b32.xlu1 %v4763_v28, %s8672_s16 }
 0x676   : > { %4869 = vrot.lane.b32.xlu0 %v4708_v36, %s5165_s25 }
 0x679   : > { %4894 = vrot.lane.b32.xlu1 %v4763_v28, %s8673_s10 }
 0x67a   : > { %4879 = vrot.lane.b32.xlu0 %v4753_v13, %s8673_s10 }
 0x67d   : > { %4904 = vrot.lane.b32.xlu1 %v4753_v13, %s8141_s13 }
 0x67e   : > { %4889 = vrot.lane.b32.xlu0 %v4708_v36, %s8672_s16 }
 0x681   : > { %4914 = vrot.lane.b32.xlu1 %v4763_v28, %s8141_s13  ;;  %s8681_s13 = smov 36  }
 0x682   : > { %4899 = vrot.lane.b32.xlu0 %v4708_v36, %s8673_s10 }
 0x685   : > { %4919 = vrot.lane.b32.xlu1 %v4763_v28, %s5169_s9  ;;  %v7299_v52 = vpop.permute.xlu0 %3260 }
 0x686   : > { %4909 = vrot.lane.b32.xlu0 %v4753_v13, %s5169_s9 }
 0x689   : > { %4924 = vrot.lane.b32.xlu1 %v4753_v13, %s8139_s12  ;;  %v7304_v39 = vpop.permute.xlu0 %3297 }
 0x68a   : > { %4929 = vrot.lane.b32.xlu0 %v4753_v13, %s8143_s14 }
 0x68d   : > { %4934 = vrot.lane.b32.xlu1 %v4763_v28, %s8139_s12  ;;  %v7310_v43 = vpop.permute.xlu0 %3334  ;;  %s8676_s12 = smov 46  }
 0x68e   : > { %4949 = vrot.lane.b32.xlu0 %v7195_v60, %s8674_s30 }
 0x691   : > { %4939 = vrot.lane.b32.xlu1 %v4763_v28, %s8143_s14  ;;  %v7322_v22 = vpop.permute.xlu0 %3371 }
 0x692   : > { %3408 = vrot.lane.b32.xlu0 %v7244_v47, %s8675_s27 }
 0x695   : > { %4944 = vrot.lane.b32.xlu1 %v7195_v60, %s8675_s27 }
 0x696   : > { %3446 = vrot.lane.b32.xlu0 %v7244_v47, %s8674_s30 }
 0x699   : > { %4954 = vrot.lane.b32.xlu1 %v7320_v46, %s8675_s27 }
 0x69a   : > { %4969 = vrot.lane.b32.xlu0 %v7195_v60, %s8676_s12 }
 0x69c   : > { %v7328_v20 = vpop.permute.xlu0 %3708 }
 0x69d   : > { %4959 = vrot.lane.b32.xlu1 %v7320_v46, %s8674_s30 }
 0x69e   : > { %3484 = vrot.lane.b32.xlu0 %v7244_v47, %s8378_s11  ;;  %v4705_v59 = vpop.permute.xlu1 %4704 }
 0x69f   : > { %v4706_v56 = vunpack.i.l.bf16 %v4705_v59  ;;  %v4707_v27 = vunpack.i.h.bf16 %v4705_v59 }
 0x6a0   : > { %v7334_v61 = vpop.permute.xlu0 %3710 }
 0x6a1   : > { %4964 = vrot.lane.b32.xlu1 %v7195_v60, %s8378_s11  ;;  %v2789_v32 = vsel %vm8679_vm12, %v4706_v56, %v4707_v27  ;;  %vm8695_vm12 = vmmov %vm8692_vm7 }
 0x6a2   : > { %3522 = vrot.lane.b32.xlu0 %v7244_v47, %s8676_s12  ;;  %v4510_v42 = vpack.c.bf16 %v2789_v32, %v7183_v1 }
 0x6a3   : > { %v7340_v12 = vpop.permute.xlu1 %4714 }
 0x6a4   : > { %v4700_v19 = vpop.permute.xlu0 %4699 }
 0x6a5   : > { %v4702_v5 = vunpack.i.h.bf16 %v4700_v19  ;;  %v4701_v50 = vunpack.i.l.bf16 %v4700_v19  ;;  %4974 = vrot.lane.b32.xlu1 %v7320_v46, %s8378_s11 }
 0x6a6   : > { %4989 = vrot.lane.b32.xlu0 %v7195_v60, %s8372_s15 }
 0x6a7   : > { %v2787_v6 = vsel %vm8677_vm11, %v4701_v50, %v4702_v5  ;;  %v4725_v40 = vpop.permute.xlu1 %4724  ;;  %v2788_v31 = vsel %vm8678_vm15, %v4702_v5, %v4706_v56  ;;  %vm8694_vm11 = vmmov %vm8693_vm9  ;;  %vm3939_vm15 = vcmask 719872  }
 0x6a8   : > { %v7348_v9 = vpop.permute.xlu0 %4709  ;;  %v4456_v35 = vpack.c.bf16 %v2788_v31, %v7213_v15  ;;  %v4458_v7 = vpack.c.bf16 %v2787_v6, %v7205_v24  ;;  %v4727_v49 = vunpack.i.h.bf16 %v4725_v40  ;;  %v4726_v8 = vunpack.i.l.bf16 %v4725_v40 }
 0x6a9   : > { %v8158_v54 = vunpack.i.l.bf16 %v7348_v9  ;;  %4979 = vrot.lane.b32.xlu1 %v7320_v46, %s8676_s12 }
 0x6aa   : > { %3560 = vrot.lane.b32.xlu0 %v7244_v47, %s8386_s8  ;;  %4457 = vmatprep.subr.bf16.mxu0 %v4456_v35  ;;  %v2826_v48 = vsel %vm8686_vm10, %v4726_v8, %v4727_v49 }
 0x6ab   : > { %v7358_v26 = vpop.permute.xlu1 %4734  ;;  %4459 = vmatpush1.bf16.msra.mxu0 %v4458_v7  ;;  %v2790_v3 = vsel %vm8680_vm13, %v4707_v27, %v8158_v54  ;;  %vm8696_vm13 = vmmov %vm8692_vm7 }
 0x6ac   : > { %v4720_v41 = vpop.permute.xlu0 %4719  ;;  %v4508_v63 = vpack.c.bf16 %v2790_v3, %v7187_v16 }
 0x6ad   : > { %4984 = vrot.lane.b32.xlu1 %v7195_v60, %s8386_s8  ;;  %v4722_v16 = vunpack.i.h.bf16 %v4720_v41  ;;  %v4721_v17 = vunpack.i.l.bf16 %v4720_v41 }
 0x6ae   : > { %3598 = vrot.lane.b32.xlu0 %v7244_v47, %s8372_s15  ;;  %4509 = vmatprep.subr.bf16.mxu1 %v4508_v63 }
 0x6af   : > { %v4745_v4 = vpop.permute.xlu1 %4744  ;;  %4511 = vmatpush1.bf16.msra.mxu1 %v4510_v42  ;;  %v2824_v33 = vsel %vm8682_vm14, %v4721_v17, %v4722_v16  ;;  %v2825_v51 = vsel %vm8684_vm4, %v4722_v16, %v4726_v8  ;;  %v7428_v16 = vld [vmem:[%s7971_s4 + $0x8] sm:$0xff]  ;;  %vm8697_vm14 = vmmov %vm8692_vm7 }
 0x6b0   : > { %v7369_v57 = vpop.permute.xlu0 %4729  ;;  %v4746_v21 = vunpack.i.l.bf16 %v4745_v4  ;;  %v4747_v38 = vunpack.i.h.bf16 %v4745_v4  ;;  %4330 = vmatprep.mubr.msk.f32.mxu0 %vm3939_vm15, %v7428_v16  ;;  %4331 = vmatprep.mubr.msk.f32.mxu1 %vm3939_vm15, %v7428_v16 }
 0x6b1   : > { %4994 = vrot.lane.b32.xlu1 %v7320_v46, %s8386_s8  ;;  %v8155_v29 = vunpack.i.h.bf16 %v7369_v57  ;;  %v4731_v18 = vunpack.i.l.bf16 %v7369_v57 }
 0x6b2   : > { %5009 = vrot.lane.b32.xlu0 %v7195_v60, %s5180_s7  ;;  %v2863_v13 = vsel %vm8687_vm0, %v4746_v21, %v4747_v38  ;;  %vm8702_vm0 = vcmask 883712  }
 0x6b3   : > { %v7375_v34 = vpop.permute.xlu1 %4754  ;;  %v7400_v28 = vsel %vm8688_vm1, %v4731_v18, %v8155_v29  ;;  %v2827_v59 = vsel %vm8689_vm3, %v4727_v49, %v4731_v18  ;;  %v4514_v3 = vpack.c.bf16 %v2863_v13, %v2826_v48  ;;  %vm8703_vm1 = vcmask 875520  }
 0x6b4   : > { %v4740_v45 = vpop.permute.xlu0 %4739  ;;  %v4757_v19 = vunpack.i.h.bf16 %v7375_v34  ;;  %v4756_v27 = vunpack.i.l.bf16 %v7375_v34  ;;  %vm8704_vm3 = vmmov %vm8703_vm1 }
 0x6b5   : > { %v4742_v2 = vunpack.i.h.bf16 %v4740_v45  ;;  %v4741_v30 = vunpack.i.l.bf16 %v4740_v45  ;;  %4999 = vrot.lane.b32.xlu1 %v7320_v46, %s8372_s15 }
 0x6b6   : > { %3636 = vrot.lane.b32.xlu0 %v7244_v47, %s8681_s13  ;;  %v2899_v49 = vsel %vm8695_vm12, %v4756_v27, %v4757_v19  ;;  %vm8710_vm12 = vmmov %vm8702_vm0 }
 0x6b7   : > { %v2861_v58 = vsel %vm8683_vm8, %v4741_v30, %v4742_v2  ;;  %v7385_v0 = vpop.permute.xlu1 %4764  ;;  %v2862_v10 = vsel %vm8685_vm2, %v4742_v2, %v4746_v21  ;;  %vm8698_vm8 = vmmov %vm8693_vm9 }
 0x6b8   : > { %v7389_v11 = vpop.permute.xlu0 %4749  ;;  %v4460_v62 = vpack.c.bf16 %v2862_v10, %v2825_v51  ;;  %v4462_v23 = vpack.c.bf16 %v2861_v58, %v2824_v33  ;;  %v4766_v56 = vunpack.i.l.bf16 %v7385_v0  ;;  %v4767_v2 = vunpack.i.h.bf16 %v7385_v0  ;;  %vm8699_vm4 = vmmov %vm8698_vm8 }
 0x6b9   : > { %v8157_v44 = vunpack.i.h.bf16 %v7389_v11  ;;  %v4751_v36 = vunpack.i.l.bf16 %v7389_v11  ;;  %5004 = vrot.lane.b32.xlu1 %v7195_v60, %s8681_s13  ;;  %vm8700_vm2 = vmmov %vm8692_vm7 }
 0x6ba   : > { %3674 = vrot.lane.b32.xlu0 %v7244_v47, %s5180_s7  ;;  %4461 = vmatprep.subr.bf16.mxu0 %v4460_v62  ;;  %v2898_v41 = vsel %vm8692_vm7, %v4766_v56, %v4756_v27  ;;  %v2900_v0 = vsel %vm8697_vm14, %v4757_v19, %v4767_v2  ;;  %vm8701_vm10 = vmmov %vm8699_vm4  ;;  %vm8712_vm14 = vcmask 867328  }
 0x6bb   : > { %v7410_v60 = vsel %vm8690_vm6, %v4751_v36, %v8157_v44  ;;  %v4775_v5 = vpop.permute.xlu1 %4774  ;;  %4463 = vmatpush1.bf16.msra.mxu0 %v4462_v23  ;;  %v2864_v50 = vsel %vm8691_vm5, %v4747_v38, %v4751_v36  ;;  %vm8705_vm6 = vmmov %vm8702_vm0 }
 0x6bc   : > { %v4776_v6 = vunpack.i.l.bf16 %v4775_v5  ;;  %v4760_v40 = vpop.permute.xlu0 %4759  ;;  %v4512_v31 = vpack.c.bf16 %v2864_v50, %v2827_v59  ;;  %v4777_v30 = vunpack.i.h.bf16 %v4775_v5  ;;  %vm8706_vm5 = vmmov %vm8702_vm0 }
 0x6bd   : > { %v4762_v7 = vunpack.i.h.bf16 %v4760_v40  ;;  %v4761_v32 = vunpack.i.l.bf16 %v4760_v40  ;;  %5014 = vrot.lane.b32.xlu1 %v7320_v46, %s8681_s13  ;;  %vm8707_vm7 = vmmov %vm8702_vm0 }
 0x6be   : > { %5024 = vrot.lane.b32.xlu0 %v7237_v14, %s5159_s17  ;;  %4513 = vmatprep.subr.bf16.mxu1 %v4512_v31  ;;  %s8717_s17 = smov 27  }
 0x6bf   : > { %v2935_v63 = vsel %vm8693_vm9, %v4776_v6, %v4761_v32  ;;  %v7422_v42 = vpop.permute.xlu1 %4784  ;;  %4515 = vmatpush1.bf16.msra.mxu1 %v4514_v3  ;;  %v2936_v4 = vsel %vm8694_vm11, %v4761_v32, %v4762_v7  ;;  %v2937_v51 = vsel %vm8698_vm8, %v4762_v7, %v4777_v30  ;;  %vm8708_vm9 = vmmov %vm8703_vm1  ;;  %vm8713_vm8 = vcmask 228352  }
 0x6c0   : > { %v4466_v17 = vpack.c.bf16 %v2935_v63, %v2898_v41  ;;  %v7430_v34 = vpop.permute.xlu0 %4769  ;;  %v4464_v21 = vpack.c.bf16 %v2936_v4, %v2899_v49  ;;  %v4787_v10 = vunpack.i.h.bf16 %v7422_v42  ;;  %v4786_v13 = vunpack.i.l.bf16 %v7422_v42  ;;  %vm8709_vm11 = vmmov %vm8703_vm1 }
 0x6c1   : > { %v8152_v45 = vunpack.i.h.bf16 %v7430_v34  ;;  %v4771_v8 = vunpack.i.l.bf16 %v7430_v34  ;;  %5019 = vrot.lane.b32.xlu1 %v7320_v46, %s5180_s7  ;;  %v4518_v50 = vpack.c.bf16 %v2937_v51, %v2900_v0 }
 0x6c2   : > { %5034 = vrot.lane.b32.xlu0 %v7237_v14, %s5160_s18  ;;  %4465 = vmatprep.subr.bf16.mxu0 %v4464_v21  ;;  %v2973_v63 = vsel %vm8705_vm6, %v4786_v13, %v4787_v10  ;;  %s8720_s18 = smov 6  }
 0x6c3   : > { %v7447_v38 = vsel %vm8696_vm13, %v4771_v8, %v8152_v45  ;;  %v4795_v18 = vpop.permute.xlu1 %4794  ;;  %4467 = vmatpush1.bf16.msra.mxu0 %v4466_v17  ;;  %v2901_v36 = vsel %vm8700_vm2, %v4767_v2, %v4771_v8  ;;  %vm8711_vm13 = vmmov %vm8703_vm1 }
 0x6c4   : > { %v7449_v33 = vpop.permute.xlu0 %4779  ;;  %v4796_v62 = vunpack.i.l.bf16 %v4795_v18  ;;  %v4797_v17 = vunpack.i.h.bf16 %v4795_v18  ;;  %vm8715_vm2 = vmmov %vm8712_vm14 }
 0x6c5   : > { %v8151_v58 = vunpack.i.h.bf16 %v7449_v33  ;;  %v4781_v46 = vunpack.i.l.bf16 %v7449_v33  ;;  %3706 = vrot.lane.b32.xlu1 %v7183_v1, %s5182_s28 }
 0x6c6   : > { %5044 = vrot.lane.b32.xlu0 %v7237_v14, %s5161_s19  ;;  %v2972_v40 = vsel %vm8702_vm0, %v4796_v62, %v4786_v13  ;;  %v2974_v18 = vsel %vm8707_vm7, %v4787_v10, %v4797_v17  ;;  %v7506_v62 = vpack.i.bf16 %v7231_v55, %v7244_v47  ;;  %vm8718_vm0 = vmmov %vm8715_vm2  ;;  %vm8724_vm7 = vcmask 220160   ;;  %s8728_s19 = smov 16  }
 0x6c7   : > { %v7463_v23 = vsel %vm8699_vm4, %v4781_v46, %v8151_v58  ;;  %v4805_v48 = vpop.permute.xlu1 %4804  ;;  %v2938_v1 = vsel %vm8701_vm10, %v4777_v30, %v4781_v46  ;;  %vm8714_vm4 = vmmov %vm8713_vm8 }
 0x6c8   : > { %v4806_v19 = vunpack.i.l.bf16 %v4805_v48  ;;  %v4790_v56 = vpop.permute.xlu0 %4789  ;;  %v4516_v5 = vpack.c.bf16 %v2938_v1, %v2901_v36  ;;  %v4807_v49 = vunpack.i.h.bf16 %v4805_v48  ;;  %vm8716_vm10 = vmmov %vm8715_vm2 }
 0x6c9   : > { %v4792_v27 = vunpack.i.h.bf16 %v4790_v56  ;;  %v4791_v6 = vunpack.i.l.bf16 %v4790_v56  ;;  %3704 = vrot.lane.b32.xlu1 %v7213_v15, %s5182_s28  ;;  %vm8722_vm6 = vmmov %vm8718_vm0 }
 0x6ca   : > { %5054 = vrot.lane.b32.xlu0 %v7237_v14, %s5164_s24  ;;  %4517 = vmatprep.subr.bf16.mxu1 %v4516_v5 }
 0x6cb   : > { %v3009_v31 = vsel %vm8703_vm1, %v4806_v19, %v4791_v6  ;;  %v7476_v7 = vpop.permute.xlu1 %4814  ;;  %4519 = vmatpush1.bf16.msra.mxu1 %v4518_v50  ;;  %v3010_v32 = vsel %vm8704_vm3, %v4791_v6, %v4792_v27  ;;  %v3011_v0 = vsel %vm8708_vm9, %v4792_v27, %v4807_v49  ;;  %vm8719_vm1 = vmmov %vm8714_vm4  ;;  %vm8725_vm9 = vcmask 211968  }
 0x6cc   : > { %v4470_v3 = vpack.c.bf16 %v3009_v31, %v2972_v40  ;;  %v7479_v41 = vpop.permute.xlu0 %4799  ;;  %v4468_v4 = vpack.c.bf16 %v3010_v32, %v2973_v63  ;;  %v4817_v51 = vunpack.i.h.bf16 %v7476_v7  ;;  %v4816_v19 = vunpack.i.l.bf16 %v7476_v7  ;;  %vm8721_vm3 = vmmov %vm8719_vm1 }
 0x6cd   : > { %v8150_v15 = vunpack.i.h.bf16 %v7479_v41  ;;  %v4801_v42 = vunpack.i.l.bf16 %v7479_v41  ;;  %3712 = vrot.lane.b32.xlu1 %v7244_v47, %s5182_s28  ;;  %v4522_v6 = vpack.c.bf16 %v3011_v0, %v2974_v18 }
 0x6ce   : > { %5064 = vrot.lane.b32.xlu0 %v7237_v14, %s5165_s25  ;;  %4469 = vmatprep.subr.bf16.mxu0 %v4468_v4 }
 0x6cf   : > { %v7491_v8 = vsel %vm8706_vm5, %v4801_v42, %v8150_v15  ;;  %v4825_v21 = vpop.permute.xlu1 %4824  ;;  %4471 = vmatpush1.bf16.msra.mxu0 %v4470_v3  ;;  %v2975_v10 = vsel %vm8710_vm12, %v4797_v17, %v4801_v42  ;;  %v3047_v17 = vsel %vm8715_vm2, %v4816_v19, %v4817_v51  ;;  %vm8723_vm5 = vmmov %vm8719_vm1 }
 0x6d0   : > { %v7493_v2 = vpop.permute.xlu0 %4809  ;;  %v4826_v48 = vunpack.i.l.bf16 %v4825_v21  ;;  %v4827_v0 = vunpack.i.h.bf16 %v4825_v21  ;;  %vm8727_vm12 = vmmov %vm8724_vm7 }
 0x6d1   : > { %v8147_v30 = vunpack.i.h.bf16 %v7493_v2  ;;  %v4811_v46 = vunpack.i.l.bf16 %v7493_v2  ;;  %5029 = vrot.lane.b32.xlu1 %v7237_v14, %s5162_s20  ;;  %vm8733_vm2 = vmmov %vm8724_vm7  ;;  %s8735_s20 = smov 7  }
 0x6d2   : > { %5074 = vrot.lane.b32.xlu0 %v7237_v14, %s8673_s10  ;;  %v3046_v32 = vsel %vm8712_vm14, %v4826_v48, %v4816_v19  ;;  %v3048_v21 = vsel %vm8718_vm0, %v4817_v51, %v4827_v0  ;;  %vm8730_vm14 = vmmov %vm8724_vm7  ;;  %vm8736_vm0 = vcmask 146432  }
 0x6d3   : > { %v7511_v36 = vsel %vm8709_vm11, %v4811_v46, %v8147_v30  ;;  %v4835_v1 = vpop.permute.xlu1 %4834  ;;  %v3012_v13 = vsel %vm8711_vm13, %v4807_v49, %v4811_v46  ;;  %vm8726_vm11 = vmmov %vm8725_vm9 }
 0x6d4   : > { %v4836_v5 = vunpack.i.l.bf16 %v4835_v1  ;;  %v4820_v50 = vpop.permute.xlu0 %4819  ;;  %v4520_v27 = vpack.c.bf16 %v3012_v13, %v2975_v10  ;;  %v4837_v48 = vunpack.i.h.bf16 %v4835_v1  ;;  %vm8729_vm13 = vmmov %vm8724_vm7 }
 0x6d5   : > { %v4822_v40 = vunpack.i.h.bf16 %v4820_v50  ;;  %v4821_v31 = vunpack.i.l.bf16 %v4820_v50  ;;  %5039 = vrot.lane.b32.xlu1 %v7237_v14, %s5163_s23 }
 0x6d6   : > { %5084 = vrot.lane.b32.xlu0 %v7506_v62, %s5169_s9  ;;  %4521 = vmatprep.subr.bf16.mxu1 %v4520_v27 }
 0x6d7   : > { %v3083_v7 = vsel %vm8713_vm8, %v4836_v5, %v4821_v31  ;;  %v7524_v3 = vpop.permute.xlu1 %4844  ;;  %4523 = vmatpush1.bf16.msra.mxu1 %v4522_v6  ;;  %v3084_v63 = vsel %vm8714_vm4, %v4821_v31, %v4822_v40  ;;  %v3085_v1 = vsel %vm8719_vm1, %v4822_v40, %v4837_v48  ;;  %vm8731_vm8 = vmmov %vm8725_vm9  ;;  %vm8737_vm1 = vcmask 138240  }
 0x6d8   : > { %v4474_v42 = vpack.c.bf16 %v3083_v7, %v3046_v32  ;;  %v7527_v4 = vpop.permute.xlu0 %4829  ;;  %v4472_v18 = vpack.c.bf16 %v3084_v63, %v3047_v17  ;;  %v4847_v27 = vunpack.i.h.bf16 %v7524_v3  ;;  %v4846_v51 = vunpack.i.l.bf16 %v7524_v3  ;;  %vm8732_vm4 = vmmov %vm8731_vm8 }
 0x6d9   : > { %v8146_v49 = vunpack.i.h.bf16 %v7527_v4  ;;  %v4831_v46 = vunpack.i.l.bf16 %v7527_v4  ;;  %5049 = vrot.lane.b32.xlu1 %v7237_v14, %s5166_s26 }
 0x6da   : > { %3303 = vrot.lane.b32.xlu0 %v7224_v25, %s5169_s9  ;;  %4473 = vmatprep.subr.bf16.mxu0 %v4472_v18 }
 0x6db   : > { %v7539_v10 = vsel %vm8716_vm10, %v4831_v46, %v8146_v49  ;;  %v4855_v13 = vpop.permute.xlu1 %4854  ;;  %4475 = vmatpush1.bf16.msra.mxu0 %v4474_v42  ;;  %v3049_v7 = vsel %vm8722_vm6, %v4827_v0, %v4831_v46  ;;  %v4526_v49 = vpack.c.bf16 %v3085_v1, %v3048_v21  ;;  %v3121_v1 = vsel %vm8727_vm12, %v4846_v51, %v4847_v27  ;;  %vm8734_vm10 = vmmov %vm8732_vm4 }
 0x6dc   : > { %v7541_v19 = vpop.permute.xlu0 %4839  ;;  %v4856_v6 = vunpack.i.l.bf16 %v4855_v13  ;;  %vm8739_vm6 = vmmov %vm8736_vm0 }
 0x6dd   : > { %v8149_v5 = vunpack.i.h.bf16 %v7541_v19  ;;  %v4841_v50 = vunpack.i.l.bf16 %v7541_v19  ;;  %5059 = vrot.lane.b32.xlu1 %v7237_v14, %s8717_s17  ;;  %vm8744_vm12 = vmmov %vm8736_vm0 }
 0x6de   : > { %5094 = vrot.lane.b32.xlu0 %v7506_v62, %s8720_s18  ;;  %v3120_v46 = vsel %vm8724_vm7, %v4856_v6, %v4846_v51  ;;  %vm8741_vm7 = vmmov %vm8737_vm1 }
 0x6df   : > { %v7555_v31 = vsel %vm8721_vm3, %v4841_v50, %v8149_v5  ;;  %v4865_v32 = vpop.permute.xlu1 %4864  ;;  %v3086_v63 = vsel %vm8723_vm5, %v4837_v48, %v4841_v50  ;;  %vm8738_vm3 = vmmov %vm8737_vm1 }
 0x6e0   : > { %v4866_v42 = vunpack.i.l.bf16 %v4865_v32  ;;  %v4850_v17 = vpop.permute.xlu0 %4849  ;;  %v4524_v18 = vpack.c.bf16 %v3086_v63, %v3049_v7  ;;  %vm8740_vm5 = vmmov %vm8736_vm0 }
 0x6e1   : > { %v4852_v56 = vunpack.i.h.bf16 %v4850_v17  ;;  %v4851_v30 = vunpack.i.l.bf16 %v4850_v17  ;;  %5069 = vrot.lane.b32.xlu1 %v7237_v14, %s8672_s16  ;;  %v4857_v17 = vunpack.i.h.bf16 %v4855_v13 }
 0x6e2   : > { %3377 = vrot.lane.b32.xlu0 %v7224_v25, %s8720_s18  ;;  %4525 = vmatprep.subr.bf16.mxu1 %v4524_v18 }
 0x6e3   : > { %v3157_v3 = vsel %vm8725_vm9, %v4866_v42, %v4851_v30  ;;  %v7568_v0 = vpop.permute.xlu1 %4874  ;;  %4527 = vmatpush1.bf16.msra.mxu1 %v4526_v49  ;;  %v3158_v48 = vsel %vm8726_vm11, %v4851_v30, %v4852_v56  ;;  %v4867_v42 = vunpack.i.h.bf16 %v4865_v32  ;;  %v3122_v13 = vsel %vm8730_vm14, %v4847_v27, %v4857_v17  ;;  %vm8742_vm9 = vmmov %vm8736_vm0 }
 0x6e4   : > { %v4478_v50 = vpack.c.bf16 %v3157_v3, %v3120_v46  ;;  %v7571_v21 = vpop.permute.xlu0 %4859  ;;  %v4476_v6 = vpack.c.bf16 %v3158_v48, %v3121_v1  ;;  %v4877_v3 = vunpack.i.h.bf16 %v7568_v0  ;;  %v4876_v27 = vunpack.i.l.bf16 %v7568_v0  ;;  %vm8743_vm11 = vmmov %vm8737_vm1 }
 0x6e5   : > { %v8148_v7 = vunpack.i.h.bf16 %v7571_v21  ;;  %v4861_v63 = vunpack.i.l.bf16 %v7571_v21  ;;  %5079 = vrot.lane.b32.xlu1 %v7506_v62, %s8728_s19  ;;  %v3159_v32 = vsel %vm8731_vm8, %v4852_v56, %v4867_v42  ;;  %vm8746_vm14 = vcmask 130048  }
 0x6e6   : > { %5104 = vrot.lane.b32.xlu0 %v7237_v14, %s8674_s30  ;;  %4477 = vmatprep.subr.bf16.mxu0 %v4476_v6  ;;  %v4530_v59 = vpack.c.bf16 %v3159_v32, %v3122_v13  ;;  %vm8747_vm8 = vmmov %vm8746_vm14 }
 0x6e7   : > { %v7583_v30 = vsel %vm8729_vm13, %v4861_v63, %v8148_v7  ;;  %v4885_v49 = vpop.permute.xlu1 %4884  ;;  %4479 = vmatpush1.bf16.msra.mxu0 %v4478_v50  ;;  %v3123_v6 = vsel %vm8733_vm2, %v4857_v17, %v4861_v63  ;;  %vm8745_vm13 = vmmov %vm8737_vm1 }
 0x6e8   : > { %v7585_v51 = vpop.permute.xlu0 %4869  ;;  %v4886_v48 = vunpack.i.l.bf16 %v4885_v49 }
 0x6e9   : > { %v8154_v18 = vunpack.i.h.bf16 %v7585_v51  ;;  %v4871_v46 = vunpack.i.l.bf16 %v7585_v51  ;;  %3266 = vrot.lane.b32.xlu1 %v7224_v25, %s8728_s19 }
 0x6ea   : > { %3465 = vrot.lane.b32.xlu0 %v7205_v24, %s8674_s30  ;;  %v3194_v63 = vsel %vm8736_vm0, %v4886_v48, %v4876_v27  ;;  %v4887_v48 = vunpack.i.h.bf16 %v4885_v49 }
 0x6eb   : > { %v7599_v50 = vsel %vm8732_vm4, %v4871_v46, %v8154_v18  ;;  %v4895_v1 = vpop.permute.xlu1 %4894  ;;  %v3160_v7 = vsel %vm8734_vm10, %v4867_v42, %v4871_v46  ;;  %vm8748_vm4 = vmmov %vm8747_vm8  ;;  %vm8750_vm10 = vcmask 64512  }
 0x6ec   : > { %v4896_v40 = vunpack.i.l.bf16 %v4895_v1  ;;  %v4880_v5 = vpop.permute.xlu0 %4879  ;;  %v4528_v15 = vpack.c.bf16 %v3160_v7, %v3123_v6  ;;  %v4897_v46 = vunpack.i.h.bf16 %v4895_v1  ;;  %vm8749_vm2 = vmmov %vm8748_vm4 }
 0x6ed   : > { %v4882_v58 = vunpack.i.h.bf16 %v4880_v5  ;;  %v4881_v45 = vunpack.i.l.bf16 %v4880_v5  ;;  %5089 = vrot.lane.b32.xlu1 %v7506_v62, %s8735_s20  ;;  %v3195_v5 = vsel %vm8739_vm6, %v4876_v27, %v4877_v3  ;;  %vm8751_vm0 = vmmov %vm8750_vm10  ;;  %vm8754_vm6 = vcmask 56320  }
 0x6ee   : > { %5114 = vrot.lane.b32.xlu0 %v7237_v14, %s8676_s12  ;;  %4529 = vmatprep.subr.bf16.mxu1 %v4528_v15 }
 0x6ef   : > { %v3231_v0 = vsel %vm8737_vm1, %v4896_v40, %v4881_v45  ;;  %v4905_v17 = vpop.permute.xlu1 %4904  ;;  %4531 = vmatpush1.bf16.msra.mxu1 %v4530_v59  ;;  %v3232_v42 = vsel %vm8738_vm3, %v4881_v45, %v4882_v58  ;;  %v3233_v40 = vsel %vm8741_vm7, %v4882_v58, %v4897_v46  ;;  %vm8752_vm1 = vmmov %vm8751_vm0 }
 0x6f0   : > { %v4482_v7 = vpack.c.bf16 %v3231_v0, %v3194_v63  ;;  %v7613_v13 = vpop.permute.xlu0 %4889  ;;  %v4480_v15 = vpack.c.bf16 %v3232_v42, %v3195_v5  ;;  %v4907_v1 = vunpack.i.h.bf16 %v4905_v17  ;;  %v4906_v27 = vunpack.i.l.bf16 %v4905_v17  ;;  %vm8753_vm3 = vmmov %vm8751_vm0 }
 0x6f1   : > { %v8153_v62 = vunpack.i.h.bf16 %v7613_v13  ;;  %v4891_v32 = vunpack.i.l.bf16 %v7613_v13  ;;  %3340 = vrot.lane.b32.xlu1 %v7224_v25, %s8735_s20  ;;  %v3196_v42 = vsel %vm8742_vm9, %v4877_v3, %v4887_v48  ;;  %vm8757_vm7 = vmmov %vm8754_vm6 }
 0x6f2   : > { %3541 = vrot.lane.b32.xlu0 %v7205_v24, %s8676_s12  ;;  %4481 = vmatprep.subr.bf16.mxu0 %v4480_v15  ;;  %v4534_v58 = vpack.c.bf16 %v3233_v40, %v3196_v42  ;;  %vm8758_vm9 = vmmov %vm8754_vm6  ;;  %s4652_s12 = smul.u32 56, %s8895_s22 }
 0x6f3   : > { %v7625_v45 = vsel %vm8740_vm5, %v4891_v32, %v8153_v62  ;;  %v4915_v59 = vpop.permute.xlu1 %4914  ;;  %4483 = vmatpush1.bf16.msra.mxu0 %v4482_v7  ;;  %v3197_v15 = vsel %vm8744_vm12, %v4887_v48, %v4891_v32  ;;  %vm8755_vm5 = vcmask 48128  }
 0x6f4   : > { %v7628_v6 = vpop.permute.xlu0 %4899  ;;  %v4916_v63 = vunpack.i.l.bf16 %v4915_v59  ;;  %v4917_v5 = vunpack.i.h.bf16 %v4915_v59  ;;  %vm8760_vm12 = vmmov %vm8755_vm5  ;;  %s7955_s24 = scalar_lea.vmem %s7973_s6, %s4652_s12 }
 0x6f5   : > { %v8156_v49 = vunpack.i.h.bf16 %v7628_v6  ;;  %v4901_v0 = vunpack.i.l.bf16 %v7628_v6  ;;  %5099 = vrot.lane.b32.xlu1 %v7237_v14, %s8675_s27 }
 0x6f6   : > { %5124 = vrot.lane.b32.xlu0 %v7237_v14, %s8372_s15  ;;  %v3268_v29 = vsel %vm8746_vm14, %v4916_v63, %v4906_v27  ;;  %v3270_v32 = vsel %vm8748_vm4, %v4907_v1, %v4917_v5  ;;  %vm8762_vm14 = vmmov %vm8755_vm5  ;;  %vm8764_vm4 = vcmask 449536  }
 0x6f7   : > { %v7640_v7 = vsel %vm8743_vm11, %v4901_v0, %v8156_v49  ;;  %v4920_v17 = vpop.permute.xlu1 %4919  ;;  %v3234_v62 = vsel %vm8745_vm13, %v4897_v46, %v4901_v0  ;;  %v3269_v49 = vsel %vm8747_vm8, %v4906_v27, %v4907_v1  ;;  %v3271_v46 = vsel %vm8749_vm2, %v4917_v5, %v7299_v52  ;;  %vm8759_vm11 = vmmov %vm8755_vm5 }
 0x6f8   : > { %v4922_v18 = vunpack.i.h.bf16 %v4920_v17  ;;  %v4921_v3 = vunpack.i.l.bf16 %v4920_v17  ;;  %v4910_v59 = vpop.permute.xlu0 %4909  ;;  %v4532_v35 = vpack.c.bf16 %v3234_v62, %v3197_v15  ;;  %vm8761_vm13 = vmmov %vm8754_vm6  ;;  %vm8763_vm8 = vcmask 457728  }
 0x6f9   : > { %v4912_v40 = vunpack.i.h.bf16 %v4910_v59  ;;  %v4911_v42 = vunpack.i.l.bf16 %v4910_v59  ;;  %3427 = vrot.lane.b32.xlu1 %v7205_v24, %s8675_s27  ;;  %vm8766_vm2 = vmmov %vm8763_vm8 }
 0x6fa   : > { %3617 = vrot.lane.b32.xlu0 %v7205_v24, %s8372_s15  ;;  %4533 = vmatprep.subr.bf16.mxu1 %v4532_v35  ;;  %v3308_v62 = vsel %vm8750_vm10, %v4922_v18, %v7304_v39  ;;  %vm8767_vm10 = vmmov %vm8766_vm2 }
 0x6fb   : > { %v3305_v48 = vsel %vm8751_vm0, %v4921_v3, %v4911_v42  ;;  %v3307_v63 = vsel %vm8752_vm1, %v4912_v40, %v4922_v18  ;;  %v4925_v0 = vpop.permute.xlu1 %4924  ;;  %4535 = vmatpush1.bf16.msra.mxu1 %v4534_v58  ;;  %v4536_v17 = vpack.c.bf16 %v3308_v62, %v3271_v46  ;;  %v3306_v27 = vsel %vm8753_vm3, %v4911_v42, %v4912_v40  ;;  %vm8768_vm0 = vmmov %vm8764_vm4 }
 0x6fc   : > { %v4486_v1 = vpack.c.bf16 %v3305_v48, %v3268_v29  ;;  %v4538_v15 = vpack.c.bf16 %v3307_v63, %v3270_v32  ;;  %v4927_v59 = vunpack.i.h.bf16 %v4925_v0  ;;  %v4926_v56 = vunpack.i.l.bf16 %v4925_v0  ;;  %v4930_v35 = vpop.permute.xlu0 %4929  ;;  %vm8769_vm1 = vmmov %vm8768_vm0 }
 0x6fd   : > { %v4932_v44 = vunpack.i.h.bf16 %v4930_v35  ;;  %v4931_v54 = vunpack.i.l.bf16 %v4930_v35  ;;  %5109 = vrot.lane.b32.xlu1 %v7237_v14, %s8378_s11  ;;  %4537 = vmatprep.subr.bf16.mxu1 %v4536_v17  ;;  %v4484_v5 = vpack.c.bf16 %v3306_v27, %v3269_v49  ;;  %vm8770_vm3 = vmmov %vm8766_vm2 }
 0x6fe   : > { %5134 = vrot.lane.b32.xlu0 %v7237_v14, %s5180_s7  ;;  %v3343_v18 = vsel %vm8754_vm6, %v4926_v56, %v4927_v59  ;;  %vm8771_vm6 = vmmov %vm8768_vm0 }
 0x6ff   : > { %4485 = vmatprep.subr.bf16.mxu0 %v4484_v5  ;;  %v4935_v58 = vpop.permute.xlu1 %4934  ;;  %4539 = vmatpush1.bf16.msra.mxu1 %v4538_v15  ;;  %v3380_v29 = vsel %vm8755_vm5, %v4931_v54, %v4932_v44  ;;  %vm8773_vm5 = vcmask 441344  }
 0x700   : > { %4487 = vmatpush1.bf16.msra.mxu0 %v4486_v1  ;;  %v4950_v3 = vpop.permute.xlu0 %4949  ;;  %v4488_v40 = vpack.c.bf16 %v3380_v29, %v3343_v18  ;;  %v4937_v42 = vunpack.i.h.bf16 %v4935_v58  ;;  %v4936_v32 = vunpack.i.l.bf16 %v4935_v58  ;;  %v3933_v29 = vld [vmem:[%s7972_s5] sm:$0xff] }
 0x701   : > { %3503 = vrot.lane.b32.xlu1 %v7205_v24, %s8378_s11  ;;  %v4952_v17 = vunpack.i.h.bf16 %v4950_v3  ;;  %v4951_v27 = vunpack.i.l.bf16 %v4950_v3 }
 0x702   : > { %3693 = vrot.lane.b32.xlu0 %v7205_v24, %s5180_s7  ;;  %4489 = vmatprep.subr.bf16.mxu0 %v4488_v40  ;;  %v3342_v63 = vsel %vm8757_vm7, %v4936_v32, %v4926_v56  ;;  %v3344_v0 = vsel %vm8758_vm9, %v4927_v59, %v4937_v42  ;;  %v3345_v35 = vsel %vm8761_vm13, %v4937_v42, %v7310_v43  ;;  %vm8774_vm7 = vcmask 375808   ;;  %vm8776_vm9 = vmmov %vm8773_vm5 }
 0x703   : > { %v4940_v49 = vpop.permute.xlu1 %4939  ;;  %v3453_v40 = vsel %vm8764_vm4, %v4951_v27, %v4952_v17  ;;  %vm8779_vm13 = vmmov %vm8774_vm7  ;;  %vm8783_vm4 = vcmask 367616  }
 0x704   : > { %v4942_v46 = vunpack.i.h.bf16 %v4940_v49  ;;  %v4941_v62 = vunpack.i.l.bf16 %v4940_v49  ;;  %v7670_v48 = vpop.permute.xlu0 %3408 }
 0x705   : > { %8756 = vst [vmem:[#allocation52_spill] sm:$0xff] %v7670_v48  ;;  %5119 = vrot.lane.b32.xlu1 %v7237_v14, %s8386_s8 }
 0x706   : > { %v3381_v1 = vsel %vm8759_vm11, %v4932_v44, %v4942_v46  ;;  %v3379_v15 = vsel %vm8760_vm12, %v4941_v62, %v4931_v54  ;;  %3716 = vrot.lane.b32.xlu0 %v7224_v25, %s5182_s28  ;;  %v3382_v56 = vsel %vm8762_vm14, %v4942_v46, %v7322_v22  ;;  %vm8777_vm11 = vmmov %vm8773_vm5 }
 0x707   : > { %v4490_v5 = vpack.c.bf16 %v3379_v15, %v3342_v63  ;;  %v4542_v59 = vpack.c.bf16 %v3381_v1, %v3344_v0  ;;  %v4945_v18 = vpop.permute.xlu1 %4944  ;;  %v4540_v58 = vpack.c.bf16 %v3382_v56, %v3345_v35  ;;  %vm8778_vm12 = vmmov %vm8774_vm7 }
 0x708   : > { %v4947_v44 = vunpack.i.h.bf16 %v4945_v18  ;;  %v4946_v3 = vunpack.i.l.bf16 %v4945_v18  ;;  %v7687_v54 = vpop.permute.xlu0 %3446  ;;  %vm8780_vm14 = vmmov %vm8773_vm5 }
 0x709   : > { %3579 = vrot.lane.b32.xlu1 %v7205_v24, %s8386_s8  ;;  %4491 = vmatpush1.bf16.msra.mxu0 %v4490_v5 }
 0x70a   : > { %4541 = vmatprep.subr.bf16.mxu1 %v4540_v58  ;;  %3936 = vperm.xlu0 %4697, %v3933_v29   ;;  %v3415_v25 = vsel %vm8763_vm8, %v4946_v3, %v4947_v44  ;;  %vm8781_vm8 = vmmov %vm8774_vm7 }
 0x70b   : > { %4543 = vmatpush1.bf16.msra.mxu1 %v4542_v59  ;;  %v4955_v42 = vpop.permute.xlu1 %4954  ;;  %v4492_v32 = vpack.c.bf16 %v3453_v40, %v3415_v25 }
 0x70c   : > { %v4970_v49 = vpop.permute.xlu0 %4969  ;;  %v4957_v46 = vunpack.i.h.bf16 %v4955_v42  ;;  %v4956_v62 = vunpack.i.l.bf16 %v4955_v42 }
 0x70d   : > { %5129 = vrot.lane.b32.xlu1 %v7237_v14, %s8681_s13  ;;  %4493 = vmatprep.subr.bf16.mxu0 %v4492_v32  ;;  %v4972_v5 = vunpack.i.h.bf16 %v4970_v49  ;;  %v4971_v59 = vunpack.i.l.bf16 %v4970_v49 }
 0x70e   : > { %v3414_v35 = vsel %vm8766_vm2, %v4956_v62, %v4946_v3  ;;  %v3416_v56 = vsel %vm8767_vm10, %v4947_v44, %v4957_v46  ;;  %v3417_v14 = vsel %vm8770_vm3, %v4957_v46, %v7670_v48  ;;  %vm8784_vm2 = vcmask 359424   ;;  %vm8785_vm10 = vmmov %vm8783_vm4 }
 0x70f   : > { %v4960_v63 = vpop.permute.xlu1 %4959 }
 0x710   : > { %v4962_v0 = vunpack.i.h.bf16 %v4960_v63  ;;  %v4961_v1 = vunpack.i.l.bf16 %v4960_v63  ;;  %v7695_v15 = vpop.permute.xlu0 %3484 }
 0x711   : > { %8765 = vst [vmem:[#allocation53_spill] sm:$0xff] %v7695_v15  ;;  %3655 = vrot.lane.b32.xlu1 %v7205_v24, %s8681_s13 }
 0x712   : > { %v3454_v18 = vsel %vm8768_vm0, %v4952_v17, %v4962_v0  ;;  %v3452_v58 = vsel %vm8769_vm1, %v4961_v1, %v4951_v27  ;;  %v3455_v29 = vsel %vm8771_vm6, %v4962_v0, %v7687_v54  ;;  %v3529_v27 = vsel %vm8774_vm7, %v4971_v59, %v4972_v5  ;;  %vm8786_vm0 = vmmov %vm8783_vm4 }
 0x713   : > { %v4494_v25 = vpack.c.bf16 %v3452_v58, %v3414_v35  ;;  %v4546_v40 = vpack.c.bf16 %v3454_v18, %v3416_v56  ;;  %v4965_v3 = vpop.permute.xlu1 %4964  ;;  %v4544_v42 = vpack.c.bf16 %v3455_v29, %v3417_v14  ;;  %vm8787_vm1 = vmmov %vm8784_vm2  ;;  %vm8791_vm7 = vcmask 293888  }
 0x714   : > { %v4967_v44 = vunpack.i.h.bf16 %v4965_v3  ;;  %v4966_v32 = vunpack.i.l.bf16 %v4965_v3  ;;  %v7707_v49 = vpop.permute.xlu0 %3522  ;;  %vm8788_vm3 = vmmov %vm8787_vm1 }
 0x715   : > { %8772 = vst [vmem:[#allocation54_spill] sm:$0xff] %v7707_v49  ;;  %3714 = vrot.lane.b32.xlu1 %v7231_v55, %s5182_s28  ;;  %4495 = vmatpush1.bf16.msra.mxu0 %v4494_v25  ;;  %vm8789_vm6 = vmmov %vm8786_vm0 }
 0x716   : > { %4545 = vmatprep.subr.bf16.mxu1 %v4544_v42  ;;  %v3491_v17 = vsel %vm8773_vm5, %v4966_v32, %v4967_v44  ;;  %vm8790_vm5 = vmmov %vm8787_vm1 }
 0x717   : > { %4547 = vmatpush1.bf16.msra.mxu1 %v4546_v40  ;;  %v4975_v46 = vpop.permute.xlu1 %4974  ;;  %v4496_v62 = vpack.c.bf16 %v3529_v27, %v3491_v17 }
 0x718   : > { %v4990_v63 = vpop.permute.xlu0 %4989  ;;  %v4977_v0 = vunpack.i.h.bf16 %v4975_v46  ;;  %v4976_v1 = vunpack.i.l.bf16 %v4975_v46 }
 0x719   : > { %3731 = vrot.lane.b32.xlu1 %v7205_v24, %s5182_s28  ;;  %4497 = vmatprep.subr.bf16.mxu0 %v4496_v62  ;;  %v4992_v25 = vunpack.i.h.bf16 %v4990_v63  ;;  %v4991_v40 = vunpack.i.l.bf16 %v4990_v63 }
 0x71a   : > { %v3490_v14 = vsel %vm8776_vm9, %v4976_v1, %v4966_v32  ;;  %v3492_v29 = vsel %vm8777_vm11, %v4967_v44, %v4977_v0  ;;  %v3493_v17 = vsel %vm8780_vm14, %v4977_v0, %v7695_v15  ;;  %vm8792_vm9 = vcmask 285696   ;;  %vm8793_vm11 = vmmov %vm8791_vm7 }
 0x71b   : > { %v4980_v35 = vpop.permute.xlu1 %4979  ;;  %vm8796_vm14 = vmmov %vm8792_vm9 }
 0x71c   : > { %v4982_v56 = vunpack.i.h.bf16 %v4980_v35  ;;  %v4981_v18 = vunpack.i.l.bf16 %v4980_v35  ;;  %v7715_v58 = vpop.permute.xlu0 %3560 }
 0x71d   : > { %8775 = vst [vmem:[#allocation57_spill] sm:$0xff] %v7715_v58 }
 0x71e   : > { %v3530_v3 = vsel %vm8778_vm12, %v4972_v5, %v4982_v56  ;;  %v3528_v42 = vsel %vm8779_vm13, %v4981_v18, %v4971_v59  ;;  %v3531_v24 = vsel %vm8781_vm8, %v4982_v56, %v7707_v49  ;;  %v3605_v59 = vsel %vm8784_vm2, %v4991_v40, %v4992_v25  ;;  %vm8794_vm12 = vmmov %vm8791_vm7 }
 0x71f   : > { %v4498_v27 = vpack.c.bf16 %v3528_v42, %v3490_v14  ;;  %v4550_v46 = vpack.c.bf16 %v3530_v3, %v3492_v29  ;;  %v4985_v62 = vpop.permute.xlu1 %4984  ;;  %v4548_v35 = vpack.c.bf16 %v3531_v24, %v3493_v17  ;;  %vm8795_vm13 = vmmov %vm8792_vm9  ;;  %vm8799_vm2 = vcmask 277504  }
 0x720   : > { %v4987_v37 = vunpack.i.h.bf16 %v4985_v62  ;;  %v4986_v32 = vunpack.i.l.bf16 %v4985_v62  ;;  %v7725_v1 = vpop.permute.xlu0 %3598  ;;  %vm8797_vm8 = vmmov %vm8791_vm7 }
 0x721   : > { %8782 = vst [vmem:[#allocation55_spill] sm:$0xff] %v7725_v1  ;;  %4499 = vmatpush1.bf16.msra.mxu0 %v4498_v27  ;;  %4549 = vmatprep.subr.bf16.mxu1 %v4548_v35 }
 0x722   : > { %4551 = vmatpush1.bf16.msra.mxu1 %v4550_v46  ;;  %v3567_v5 = vsel %vm8783_vm4, %v4986_v32, %v4987_v37  ;;  %vm8798_vm4 = vmmov %vm8792_vm9 }
 0x723   : > { %v4995_v44 = vpop.permute.xlu1 %4994  ;;  %v4500_v63 = vpack.c.bf16 %v3605_v59, %v3567_v5 }
 0x724   : > { %v5010_v0 = vpop.permute.xlu0 %5009  ;;  %v4997_v18 = vunpack.i.h.bf16 %v4995_v44  ;;  %v4996_v56 = vunpack.i.l.bf16 %v4995_v44 }
 0x725   : > { %4501 = vmatprep.subr.bf16.mxu0 %v4500_v63  ;;  %v5012_v27 = vunpack.i.h.bf16 %v5010_v0  ;;  %v5011_v46 = vunpack.i.l.bf16 %v5010_v0 }
 0x726   : > { %v3566_v17 = vsel %vm8785_vm10, %v4996_v56, %v4986_v32  ;;  %v3568_v24 = vsel %vm8786_vm0, %v4987_v37, %v4997_v18  ;;  %v3569_v5 = vsel %vm8789_vm6, %v4997_v18, %v7715_v58  ;;  %vm8800_vm10 = vcmask 1039360  }
 0x727   : > { %v5000_v14 = vpop.permute.xlu1 %4999  ;;  %vm8802_vm0 = vmmov %vm8800_vm10  ;;  %vm8807_vm6 = vcmask 1031168  }
 0x728   : > { %v5002_v29 = vunpack.i.h.bf16 %v5000_v14  ;;  %v5001_v3 = vunpack.i.l.bf16 %v5000_v14  ;;  %v7729_v42 = vpop.permute.xlu0 %3636 }
 0x72a   : > { %v3606_v62 = vsel %vm8787_vm1, %v4992_v25, %v5002_v29  ;;  %v3604_v35 = vsel %vm8788_vm3, %v5001_v3, %v4991_v40  ;;  %v3607_v59 = vsel %vm8790_vm5, %v5002_v29, %v7725_v1  ;;  %v3681_v25 = vsel %vm8792_vm9, %v5011_v46, %v5012_v27  ;;  %vm8805_vm3 = vmmov %vm8799_vm2 }
 0x72b   : > { %v4502_v44 = vpack.c.bf16 %v3604_v35, %v3566_v17  ;;  %v4554_v63 = vpack.c.bf16 %v3606_v62, %v3568_v24  ;;  %v5005_v14 = vpop.permute.xlu1 %5004  ;;  %v4552_v15 = vpack.c.bf16 %v3607_v59, %v3569_v5  ;;  %v4716_v5 = vunpack.i.l.bf16 %v7340_v12  ;;  %vm8808_vm5 = vmmov %vm8802_vm0 }
 0x72c   : > { %v5007_v49 = vunpack.i.h.bf16 %v5005_v14  ;;  %v5006_v32 = vunpack.i.l.bf16 %v5005_v14  ;;  %v7739_v56 = vpop.permute.xlu0 %3674  ;;  %vm8804_vm1 = vcmask 965632   ;;  %vm8810_vm9 = vmmov %vm8799_vm2 }
 0x72d   : > { %4503 = vmatpush1.bf16.msra.mxu0 %v4502_v44  ;;  %4553 = vmatprep.subr.bf16.mxu1 %v4552_v15  ;;  %v4712_v15 = vunpack.i.h.bf16 %v7348_v9 }
 0x72e   : > { %4555 = vmatpush1.bf16.msra.mxu1 %v4554_v63  ;;  %v3643_v37 = vsel %vm8791_vm7, %v5006_v32, %v5007_v49  ;;  %vm8809_vm7 = vmmov %vm8799_vm2 }
 0x72f   : > { %v5015_v40 = vpop.permute.xlu1 %5014  ;;  %v4504_v0 = vpack.c.bf16 %v3681_v25, %v3643_v37 }
 0x730   : > { %v5025_v18 = vpop.permute.xlu0 %5024  ;;  %v5017_v3 = vunpack.i.h.bf16 %v5015_v40  ;;  %v5016_v29 = vunpack.i.l.bf16 %v5015_v40 }
 0x731   : > { %4505 = vmatprep.subr.bf16.mxu0 %v4504_v0  ;;  %v5026_v40 = vunpack.i.l.bf16 %v5025_v18 }
 0x732   : > { %v3642_v59 = vsel %vm8793_vm11, %v5016_v29, %v5006_v32  ;;  %v3644_v44 = vsel %vm8794_vm12, %v5007_v49, %v5017_v3  ;;  %v3645_v37 = vsel %vm8797_vm8, %v5017_v3, %v7729_v42  ;;  %v4736_v3 = vunpack.i.l.bf16 %v7358_v26  ;;  %vm8812_vm11 = vmmov %vm8804_vm1 }
 0x733   : > { %v5020_v17 = vpop.permute.xlu1 %5019  ;;  %vm8813_vm12 = vmmov %vm8807_vm6 }
 0x734   : > { %v5022_v24 = vunpack.i.h.bf16 %v5020_v17  ;;  %v5021_v62 = vunpack.i.l.bf16 %v5020_v17  ;;  %v7743_v35 = vpop.permute.xlu0 %5034 }
 0x736   : > { %v3682_v63 = vsel %vm8795_vm13, %v5012_v27, %v5022_v24  ;;  %v3680_v14 = vsel %vm8796_vm14, %v5021_v62, %v5011_v46  ;;  %v3683_v25 = vsel %vm8798_vm4, %v5022_v24, %v7739_v56  ;;  %v2792_v27 = vsel %vm8800_vm10, %v4712_v15, %v4716_v5  ;;  %v7767_v24 = vld [vmem:[%s7971_s4] sm:$0xff] }
 0x737   : > { %v4506_v0 = vpack.c.bf16 %v3680_v14, %v3642_v59  ;;  %v4558_v17 = vpack.c.bf16 %v3682_v63, %v3644_v44  ;;  %v3707_v58 = vpop.permute.xlu1 %3706  ;;  %v4556_v1 = vpack.c.bf16 %v3683_v25, %v3645_v37  ;;  %v8801_v46 = vunpack.i.l.bf16 %v7348_v9 }
 0x738   : > { %v7755_v48 = vpop.permute.xlu0 %5044  ;;  %v3719_v49 = vsel %vm8799_vm2, %v3707_v58, %v7328_v20  ;;  %v8803_v62 = vunpack.i.h.bf16 %v7389_v11  ;;  %v4717_v59 = vunpack.i.h.bf16 %v7340_v12  ;;  %v8806_v14 = vunpack.i.h.bf16 %v7369_v57 }
 0x739   : > { %4507 = vmatpush1.bf16.msra.mxu0 %v4506_v0  ;;  %4557 = vmatprep.subr.bf16.mxu1 %v4556_v1  ;;  %v2791_v32 = vsel %vm8802_vm0, %v8801_v46, %v4712_v15  ;;  %v4560_v15 = vpack.c.bf16 %v2792_v27, %v7244_v47  ;;  %v5027_v47 = vunpack.i.h.bf16 %v5025_v18  ;;  %v3720_v57 = vsel %vm8810_vm9, %v7328_v20, %v7334_v61 }
 0x73a   : > { %3995 = vmatprep.subr.mxu0 %v3719_v49  ;;  %4559 = vmatpush1.bf16.msra.mxu1 %v4558_v17  ;;  %v2866_v1 = vsel %vm8804_vm1, %v8803_v62, %v5026_v40  ;;  %v4562_v63 = vpack.c.bf16 %v2791_v32, %v7158_v53  ;;  %v2829_v37 = vsel %vm8807_vm6, %v8806_v14, %v4736_v3  ;;  %v4737_v0 = vunpack.i.h.bf16 %v7358_v26 }
 0x73b   : > { %v3705_v29 = vpop.permute.xlu1 %3704  ;;  %v4564_v11 = vpack.c.bf16 %v2866_v1, %v2829_v37  ;;  %v2793_v12 = vsel %vm8808_vm5, %v4716_v5, %v4717_v59  ;;  %v5036_v17 = vunpack.i.l.bf16 %v7743_v35  ;;  %v8811_v18 = vpack.c.bf16 %v7410_v60, %v7400_v28 }
 0x73c   : > { %v3718_v9 = vsel %vm8805_vm3, %v3705_v29, %v3707_v58  ;;  %v7774_v44 = vpop.permute.xlu0 %5054  ;;  %v4613_v5 = vpack.c.bf16 %v2793_v12, %v7231_v55  ;;  %v2867_v27 = vsel %vm8812_vm11, %v5026_v40, %v5027_v47  ;;  %v5185_v29 = vmov 0.0|0.0  }
 0x73d   : > { %3996 = vmatpush1.msra.mxu0 %v3718_v9  ;;  %v2830_v26 = vsel %vm8813_vm12, %v4736_v3, %v4737_v0  ;;  %v5046_v28 = vunpack.i.l.bf16 %v7755_v48  ;;  %v8814_v55 = vunpack.i.h.bf16 %v7430_v34  ;;  %vm8815_vm13 = vcmask 957440  }
 0x73e   : > { %4008 = vmatmul.mubr.f32.vlgmr.msra.gmra.mrb[4].mxu0 %v7767_v24  ;;  %4561 = vmatprep.subr.bf16.mxu0 %v4560_v15  ;;  %v8816_v40 = vunpack.i.h.bf16 %v7449_v33  ;;  %vm8817_vm14 = vcmask 949248   ;;  %v4616_v1 = vpack.c.bf16 %v2867_v27, %v2830_v26  ;;  %v5047_v34 = vunpack.i.h.bf16 %v7755_v48 }
 0x73f   : > { %v7782_v25 = vpop.permute.xlu1 %3712  ;;  %4563 = vmatpush1.bf16.msra.mxu0 %v4562_v63  ;;  %4332 = vmatprep.mubr.msk.f32.mxu0 %vm3939_vm15, %v7428_v16  ;;  %vm8819_vm8 = vmmov %vm8817_vm14  ;;  %v5056_v14 = vunpack.i.l.bf16 %v7774_v44  ;;  %v8820_v33 = vpack.c.bf16 %v7463_v23, %v7447_v38  ;;  %v8821_v37 = vunpack.i.h.bf16 %v7479_v41  ;;  %vm8822_vm4 = vcmask 883712  }
 0x740   : > { %v7787_v58 = vpop.permute.xlu0 %5064  ;;  %4565 = vmatprep.subr.bf16.mxu0 %v4564_v11  ;;  %v3721_v53 = vsel %vm8809_vm7, %v7334_v61, %v7782_v25  ;;  %v5037_v61 = vunpack.i.h.bf16 %v7743_v35  ;;  %v2940_v62 = vsel %vm8817_vm14, %v8816_v40, %v5036_v17  ;;  %v8823_v12 = vunpack.i.h.bf16 %v7493_v2  ;;  %vm8825_vm10 = vmmov %vm8822_vm4 }
 0x741   : > { %4066 = vmatprep.subr.mxu1 %v3721_v53  ;;  %vm8824_vm2 = vcmask 875520   ;;  %v5057_v38 = vunpack.i.h.bf16 %v7774_v44  ;;  %v5066_v41 = vunpack.i.l.bf16 %v7787_v58  ;;  %v8827_v2 = vpack.c.bf16 %v7511_v36, %v7491_v8 }
 0x742   : > { %4067 = vmatpush1.msra.mxu1 %v3720_v57  ;;  %v2941_v63 = vsel %vm8819_vm8, %v5036_v17, %v5037_v61  ;;  %v3014_v47 = vsel %vm8824_vm2, %v8823_v12, %v5046_v28  ;;  %vm8826_vm0 = vmmov %vm8824_vm2  ;;  %vm8829_vm1 = vcmask 867328   ;;  %vm8831_vm3 = vcmask 228352  }
 0x743   : > { %v5030_v49 = vpop.permute.xlu1 %5029  ;;  %4079 = vmatmul.mubr.f32.vlgmr.msra.gmra.mrb[4].mxu1 %v7767_v24  ;;  %4567 = vmatpush1.bf16.msra.mxu0 %v8811_v18  ;;  %v3015_v23 = vsel %vm8826_vm0, %v5046_v28, %v5047_v34  ;;  %vm8832_vm6 = vmmov %vm8829_vm1  ;;  %v5067_v36 = vunpack.i.h.bf16 %v7787_v58  ;;  %vm8836_vm7 = vcmask 220160   ;;  %vm8838_vm9 = vcmask 211968  }
 0x744   : > { %v5032_v46 = vunpack.i.h.bf16 %v5030_v49  ;;  %v5031_v32 = vunpack.i.l.bf16 %v5030_v49  ;;  %4612 = vmatprep.subr.bf16.mxu1 %v5185_v29  ;;  %v7804_v20 = vpop.permute.xlu0 %5074  ;;  %4333 = vmatprep.mubr.msk.f32.mxu1 %vm3939_vm15, %v7428_v16  ;;  %vm8818_vm15 = vmmov %vm8815_vm13  ;;  %vm8845_vm14 = vcmask 138240   ;;  %vm8849_vm2 = vcmask 130048  }
 0x745   : > { %4614 = vmatpush1.bf16.msra.mxu1 %v4613_v5  ;;  %v8828_v5 = vunpack.i.h.bf16 %v7527_v4  ;;  %vm8833_vm5 = vmmov %vm8831_vm3  ;;  %v5076_v4 = vunpack.i.l.bf16 %v7804_v20 }
 0x746   : > { %4615 = vmatprep.subr.bf16.mxu1 %v5185_v29  ;;  %v2903_v60 = vsel %vm8815_vm13, %v8814_v55, %v5031_v32  ;;  %v2904_v35 = vsel %vm8818_vm15, %v5031_v32, %v5032_v46  ;;  %v8830_v46 = vunpack.i.h.bf16 %v7541_v19  ;;  %v3089_v8 = vsel %vm8833_vm5, %v5056_v14, %v5057_v38  ;;  %vm8839_vm11 = vmmov %vm8836_vm7 }
 0x747   : > { %v5040_v59 = vpop.permute.xlu1 %5039  ;;  %v4568_v16 = vpack.c.bf16 %v2940_v62, %v2903_v60  ;;  %v4619_v53 = vpack.c.bf16 %v2941_v63, %v2904_v35  ;;  %v8834_v19 = vpack.c.bf16 %v7555_v31, %v7539_v10  ;;  %v8835_v62 = vunpack.i.h.bf16 %v7571_v21  ;;  %vm8840_vm12 = vmmov %vm8838_vm9 }
 0x748   : > { %v5042_v9 = vunpack.i.h.bf16 %v5040_v59  ;;  %v5041_v15 = vunpack.i.l.bf16 %v5040_v59  ;;  %v7819_v3 = vpop.permute.xlu0 %5084  ;;  %v3088_v44 = vsel %vm8831_vm3, %v8830_v46, %v5056_v14  ;;  %v8837_v59 = vunpack.i.h.bf16 %v7585_v51  ;;  %vm8847_vm8 = vmmov %vm8845_vm14 }
 0x749   : > { %4617 = vmatpush1.bf16.msra.mxu1 %v4616_v1  ;;  %4569 = vmatprep.subr.bf16.mxu0 %v4568_v16  ;;  %v5077_v10 = vunpack.i.h.bf16 %v7804_v20  ;;  %v5086_v31 = vunpack.i.l.bf16 %v7819_v3  ;;  %v3163_v21 = vsel %vm8840_vm12, %v5066_v41, %v5067_v36  ;;  %v5087_v51 = vunpack.i.h.bf16 %v7819_v3  ;;  %vm8854_vm3 = vmmov %vm8849_vm2 }
 0x74a   : > { %4571 = vmatpush1.bf16.msra.mxu0 %v8820_v33  ;;  %4618 = vmatprep.subr.bf16.mxu1 %v5185_v29  ;;  %v2977_v11 = vsel %vm8822_vm4, %v8821_v37, %v5041_v15  ;;  %v2978_v48 = vsel %vm8825_vm10, %v5041_v15, %v5042_v9  ;;  %v3162_v16 = vsel %vm8838_vm9, %v8837_v59, %v5066_v41  ;;  %v8842_v37 = vunpack.i.h.bf16 %v7613_v13  ;;  %vm8851_vm10 = vmmov %vm8849_vm2 }
 0x74b   : > { %v5050_v57 = vpop.permute.xlu1 %5049  ;;  %v4572_v0 = vpack.c.bf16 %v3014_v47, %v2977_v11  ;;  %v4622_v32 = vpack.c.bf16 %v3015_v23, %v2978_v48  ;;  %v8841_v33 = vpack.c.bf16 %v7599_v50, %v7583_v30  ;;  %vm8843_vm13 = vcmask 146432  }
 0x74c   : > { %v5052_v17 = vunpack.i.h.bf16 %v5050_v57  ;;  %v5051_v49 = vunpack.i.l.bf16 %v5050_v57  ;;  %v7835_v18 = vpop.permute.xlu0 %3303  ;;  %v8844_v20 = vunpack.i.h.bf16 %v7628_v6  ;;  %vm8846_vm15 = vmmov %vm8843_vm13  ;;  %v3237_v30 = vsel %vm8847_vm8, %v5076_v4, %v5077_v10 }
 0x74d   : > { %4620 = vmatpush1.bf16.msra.mxu1 %v4619_v53  ;;  %4573 = vmatprep.subr.bf16.mxu0 %v4572_v0  ;;  %vm8848_vm4 = vcmask 64512   ;;  %v8850_v6 = vpack.c.bf16 %v7640_v7, %v7625_v45  ;;  %vm8856_vm5 = vcmask 56320  }
 0x74e   : > { %4575 = vmatpush1.bf16.msra.mxu0 %v8827_v2  ;;  %4621 = vmatprep.subr.bf16.mxu1 %v5185_v29  ;;  %v3051_v27 = vsel %vm8829_vm1, %v8828_v5, %v5051_v49  ;;  %v3052_v28 = vsel %vm8832_vm6, %v5051_v49, %v5052_v17  ;;  %v3236_v12 = vsel %vm8845_vm14, %v8844_v20, %v5076_v4  ;;  %vm8852_vm0 = vmmov %vm8848_vm4  ;;  %vm8855_vm6 = vcmask 48128  }
 0x74f   : > { %v5060_v61 = vpop.permute.xlu1 %5059  ;;  %v4576_v26 = vpack.c.bf16 %v3088_v44, %v3051_v27  ;;  %v4625_v35 = vpack.c.bf16 %v3089_v8, %v3052_v28  ;;  %v3309_v50 = vsel %vm8848_vm4, %v7304_v39, %v5086_v31  ;;  %v3310_v38 = vsel %vm8852_vm0, %v5086_v31, %v5087_v51  ;;  %vm8853_vm1 = vmmov %vm8852_vm0 }
 0x750   : > { %v5062_v55 = vunpack.i.h.bf16 %v5060_v61  ;;  %v5061_v60 = vunpack.i.l.bf16 %v5060_v61  ;;  %v7851_v40 = vpop.permute.xlu0 %5094  ;;  %v3311_v39 = vsel %vm8853_vm1, %v5087_v51, %v7835_v18  ;;  %vm8858_vm9 = vmmov %vm8855_vm6  ;;  %vm8863_vm14 = vcmask 457728  }
 0x751   : > { %4623 = vmatpush1.bf16.msra.mxu1 %v4622_v32  ;;  %4577 = vmatprep.subr.bf16.mxu0 %v4576_v26  ;;  %v5097_v45 = vunpack.i.h.bf16 %v7851_v40  ;;  %v5096_v7 = vunpack.i.l.bf16 %v7851_v40  ;;  %vm8860_vm12 = vmmov %vm8856_vm5  ;;  %vm8871_vm0 = vcmask 441344  }
 0x752   : > { %4579 = vmatpush1.bf16.msra.mxu0 %v8834_v19  ;;  %4624 = vmatprep.subr.bf16.mxu1 %v5185_v29  ;;  %v3125_v1 = vsel %vm8836_vm7, %v8835_v62, %v5061_v60  ;;  %v3126_v58 = vsel %vm8839_vm11, %v5061_v60, %v5062_v55  ;;  %vm8857_vm7 = vmmov %vm8856_vm5 }
 0x753   : > { %v5070_v9 = vpop.permute.xlu1 %5069  ;;  %v4580_v15 = vpack.c.bf16 %v3162_v16, %v3125_v1  ;;  %v4628_v47 = vpack.c.bf16 %v3163_v21, %v3126_v58  ;;  %v3383_v18 = vsel %vm8855_vm6, %v7322_v22, %v5096_v7  ;;  %v3384_v55 = vsel %vm8858_vm9, %v5096_v7, %v5097_v45  ;;  %vm8859_vm11 = vmmov %vm8855_vm6 }
 0x754   : > { %v5072_v63 = vunpack.i.h.bf16 %v5070_v9  ;;  %v5071_v34 = vunpack.i.l.bf16 %v5070_v9  ;;  %v3378_v14 = vpop.permute.xlu0 %3377  ;;  %vm8872_vm1 = vmmov %vm8871_vm0  ;;  %vm8879_vm9 = vcmask 367616  }
 0x755   : > { %4626 = vmatpush1.bf16.msra.mxu1 %v4625_v35  ;;  %4581 = vmatprep.subr.bf16.mxu0 %v4580_v15  ;;  %v3385_v4 = vsel %vm8859_vm11, %v5097_v45, %v3378_v14  ;;  %v8862_v15 = vld [vmem:[#allocation52_spill] sm:$0xff]  ;;  %v8878_v45 = vld [vmem:[#allocation57_spill] sm:$0xff]  ;;  %vm8880_vm11 = vmmov %vm8879_vm9 }
 0x756   : > { %4583 = vmatpush1.bf16.msra.mxu0 %v8841_v33  ;;  %4627 = vmatprep.subr.bf16.mxu1 %v5185_v29  ;;  %v3199_v11 = vsel %vm8843_vm13, %v8842_v37, %v5071_v34  ;;  %v3200_v0 = vsel %vm8846_vm15, %v5071_v34, %v5072_v63  ;;  %vm8861_vm13 = vcmask 449536   ;;  %vm8864_vm15 = vmmov %vm8863_vm14 }
 0x757   : > { %v5080_v53 = vpop.permute.xlu1 %5079  ;;  %v4584_v57 = vpack.c.bf16 %v3236_v12, %v3199_v11  ;;  %v4631_v23 = vpack.c.bf16 %v3237_v30, %v3200_v0  ;;  %vm8865_vm8 = vmmov %vm8861_vm13  ;;  %v8870_v0 = vld [vmem:[#allocation53_spill] sm:$0xff] }
 0x758   : > { %v5082_v3 = vunpack.i.h.bf16 %v5080_v53  ;;  %v5081_v48 = vunpack.i.l.bf16 %v5080_v53  ;;  %v5105_v17 = vpop.permute.xlu0 %5104  ;;  %vm8866_vm4 = vmmov %vm8865_vm8  ;;  %v8868_v53 = vld [vmem:[#allocation54_spill] sm:$0xff] }
 0x759   : > { %4629 = vmatpush1.bf16.msra.mxu1 %v4628_v47  ;;  %4585 = vmatprep.subr.bf16.mxu0 %v4584_v57  ;;  %v5107_v22 = vunpack.i.h.bf16 %v5105_v17  ;;  %v5106_v1 = vunpack.i.l.bf16 %v5105_v17 }
 0x75a   : > { %v3272_v13 = vsel %vm8849_vm2, %v7299_v52, %v5081_v48  ;;  %4587 = vmatpush1.bf16.msra.mxu0 %v8850_v6  ;;  %4630 = vmatprep.subr.bf16.mxu1 %v5185_v29  ;;  %v3273_v49 = vsel %vm8851_vm10, %v5081_v48, %v5082_v3  ;;  %vm8867_vm2 = vmmov %vm8863_vm14  ;;  %vm8869_vm10 = vcmask 375808  }
 0x75b   : > { %v4590_v41 = vpack.c.bf16 %v3309_v50, %v3272_v13  ;;  %v3267_v2 = vpop.permute.xlu1 %3266  ;;  %v4588_v5 = vpack.c.bf16 %v3310_v38, %v3273_v49  ;;  %v3456_v9 = vsel %vm8861_vm13, %v7687_v54, %v5106_v1  ;;  %v3457_v34 = vsel %vm8865_vm8, %v5106_v1, %v5107_v22 }
 0x75c   : > { %v3274_v27 = vsel %vm8854_vm3, %v5082_v3, %v3267_v2  ;;  %v3466_v46 = vpop.permute.xlu0 %3465  ;;  %vm8873_vm3 = vmmov %vm8869_vm10  ;;  %vm8885_vm8 = vcmask 293888  }
 0x75d   : > { %v4634_v52 = vpack.c.bf16 %v3311_v39, %v3274_v27  ;;  %4632 = vmatpush1.bf16.msra.mxu1 %v4631_v23  ;;  %4589 = vmatprep.subr.bf16.mxu0 %v4588_v5  ;;  %v3468_v21 = vsel %vm8866_vm4, %v5107_v22, %v3466_v46  ;;  %vm8874_vm6 = vmmov %vm8873_vm3 }
 0x75e   : > { %4591 = vmatpush1.bf16.msra.mxu0 %v4590_v41  ;;  %4633 = vmatprep.subr.bf16.mxu1 %v5185_v29  ;;  %vm8886_vm4 = vmmov %vm8885_vm8 }
 0x75f   : > { %v5090_v44 = vpop.permute.xlu1 %5089 }
 0x760   : > { %v5092_v32 = vunpack.i.h.bf16 %v5090_v44  ;;  %v5091_v61 = vunpack.i.l.bf16 %v5090_v44  ;;  %v5115_v40 = vpop.permute.xlu0 %5114 }
 0x761   : > { %4635 = vmatpush1.bf16.msra.mxu1 %v4634_v52  ;;  %v5117_v37 = vunpack.i.h.bf16 %v5115_v40  ;;  %v5116_v11 = vunpack.i.l.bf16 %v5115_v40  ;;  %v8876_v52 = vld [vmem:[#allocation55_spill] sm:$0xff] }
 0x762   : > { %v3346_v26 = vsel %vm8856_vm5, %v7310_v43, %v5091_v61  ;;  %v3347_v28 = vsel %vm8857_vm7, %v5091_v61, %v5092_v32  ;;  %4636 = vmatprep.subr.bf16.mxu1 %v5185_v29  ;;  %vm8875_vm5 = vmmov %vm8871_vm0  ;;  %vm8877_vm7 = vcmask 359424  }
 0x763   : > { %v4594_v60 = vpack.c.bf16 %v3383_v18, %v3346_v26  ;;  %v3341_v8 = vpop.permute.xlu1 %3340  ;;  %v4592_v36 = vpack.c.bf16 %v3384_v55, %v3347_v28  ;;  %v3532_v57 = vsel %vm8869_vm10, %v8868_v53, %v5116_v11  ;;  %v3533_v17 = vsel %vm8873_vm3, %v5116_v11, %v5117_v37  ;;  %vm8882_vm13 = vmmov %vm8877_vm7 }
 0x764   : > { %v3348_v19 = vsel %vm8860_vm12, %v5092_v32, %v3341_v8  ;;  %v3542_v35 = vpop.permute.xlu0 %3541  ;;  %vm8881_vm12 = vmmov %vm8877_vm7 }
 0x765   : > { %v4637_v62 = vpack.c.bf16 %v3385_v4, %v3348_v19  ;;  %4593 = vmatprep.subr.bf16.mxu0 %v4592_v36  ;;  %v3544_v6 = vsel %vm8874_vm6, %v5117_v37, %v3542_v35 }
 0x766   : > { %4595 = vmatpush1.bf16.msra.mxu0 %v4594_v60 }
 0x767   : > { %v5100_v43 = vpop.permute.xlu1 %5099  ;;  %4638 = vmatpush1.bf16.msra.mxu1 %v4637_v62 }
 0x768   : > { %v5102_v59 = vunpack.i.h.bf16 %v5100_v43  ;;  %v5101_v16 = vunpack.i.l.bf16 %v5100_v43  ;;  %4639 = vmatprep.subr.bf16.mxu1 %v5185_v29  ;;  %v5125_v54 = vpop.permute.xlu0 %5124 }
 0x769   : > { %v5127_v41 = vunpack.i.h.bf16 %v5125_v54  ;;  %v5126_v2 = vunpack.i.l.bf16 %v5125_v54 }
 0x76a   : > { %v3418_v58 = vsel %vm8863_vm14, %v8862_v15, %v5101_v16  ;;  %v3419_v63 = vsel %vm8864_vm15, %v5101_v16, %v5102_v59  ;;  %vm8883_vm14 = vmmov %vm8879_vm9  ;;  %vm8884_vm15 = vcmask 285696  }
 0x76b   : > { %v4598_v14 = vpack.c.bf16 %v3456_v9, %v3418_v58  ;;  %v3428_v10 = vpop.permute.xlu1 %3427  ;;  %v4596_v31 = vpack.c.bf16 %v3457_v34, %v3419_v63  ;;  %v3608_v46 = vsel %vm8877_vm7, %v8876_v52, %v5126_v2  ;;  %v3609_v32 = vsel %vm8881_vm12, %v5126_v2, %v5127_v41 }
 0x76c   : > { %v3430_v51 = vsel %vm8867_vm2, %v5102_v59, %v3428_v10  ;;  %v3618_v38 = vpop.permute.xlu0 %3617  ;;  %vm8887_vm2 = vmmov %vm8884_vm15  ;;  %v8892_v10 = vmov 0.0  }
 0x76d   : > { %v4640_v33 = vpack.c.bf16 %v3468_v21, %v3430_v51  ;;  %4597 = vmatprep.subr.bf16.mxu0 %v4596_v31  ;;  %v3620_v55 = vsel %vm8882_vm13, %v5127_v41, %v3618_v38  ;;  %vm8888_vm10 = vmmov %vm8887_vm2 }
 0x76e   : > { %4599 = vmatpush1.bf16.msra.mxu0 %v4598_v14 }
 0x76f   : > { %v5110_v20 = vpop.permute.xlu1 %5109  ;;  %4641 = vmatpush1.bf16.msra.mxu1 %v4640_v33 }
 0x770   : > { %v5112_v12 = vunpack.i.h.bf16 %v5110_v20  ;;  %v5111_v47 = vunpack.i.l.bf16 %v5110_v20  ;;  %4642 = vmatprep.subr.bf16.mxu1 %v5185_v29  ;;  %v5135_v61 = vpop.permute.xlu0 %5134 }
 0x771   : > { %v5137_v8 = vunpack.i.h.bf16 %v5135_v61  ;;  %v5136_v36 = vunpack.i.l.bf16 %v5135_v61 }
 0x772   : > { %v3494_v3 = vsel %vm8871_vm0, %v8870_v0, %v5111_v47  ;;  %v3495_v48 = vsel %vm8872_vm1, %v5111_v47, %v5112_v12  ;;  %vm8889_vm0 = vmmov %vm8886_vm4  ;;  %vm8890_vm1 = vcmask 277504  }
 0x773   : > { %v4602_v30 = vpack.c.bf16 %v3532_v57, %v3494_v3  ;;  %v3504_v50 = vpop.permute.xlu1 %3503  ;;  %v4600_v13 = vpack.c.bf16 %v3533_v17, %v3495_v48  ;;  %v3684_v1 = vsel %vm8884_vm15, %v7739_v56, %v5136_v36  ;;  %v3685_v16 = vsel %vm8887_vm2, %v5136_v36, %v5137_v8  ;;  %vm8891_vm3 = vmmov %vm8890_vm1 }
 0x774   : > { %v3506_v49 = vsel %vm8875_vm5, %v5112_v12, %v3504_v50  ;;  %v3694_v22 = vpop.permute.xlu0 %3693  ;;  %vm8893_vm6 = vmmov %vm8890_vm1 }
 0x775   : > { %v4643_v23 = vpack.c.bf16 %v3544_v6, %v3506_v49  ;;  %4601 = vmatprep.subr.bf16.mxu0 %v4600_v13  ;;  %v3696_v58 = vsel %vm8888_vm10, %v5137_v8, %v3694_v22 }
 0x776   : > { %4603 = vmatpush1.bf16.msra.mxu0 %v4602_v30 }
 0x777   : > { %v5120_v5 = vpop.permute.xlu1 %5119  ;;  %4644 = vmatpush1.bf16.msra.mxu1 %v4643_v23 }
 0x778   : > { %v5122_v39 = vunpack.i.h.bf16 %v5120_v5  ;;  %v5121_v27 = vunpack.i.l.bf16 %v5120_v5  ;;  %4645 = vmatprep.subr.bf16.mxu1 %v5185_v29 }
 0x77a   : > { %v3570_v7 = vsel %vm8879_vm9, %v8878_v45, %v5121_v27  ;;  %v3571_v44 = vsel %vm8880_vm11, %v5121_v27, %v5122_v39 }
 0x77b   : > { %v4606_v18 = vpack.c.bf16 %v3608_v46, %v3570_v7  ;;  %v3580_v26 = vpop.permute.xlu1 %3579  ;;  %v4604_v28 = vpack.c.bf16 %v3609_v32, %v3571_v44 }
 0x77c   : > { %v3582_v60 = vsel %vm8883_vm14, %v5122_v39, %v3580_v26 }
 0x77d   : > { %v4646_v40 = vpack.c.bf16 %v3620_v55, %v3582_v60  ;;  %4605 = vmatprep.subr.bf16.mxu0 %v4604_v28 }
 0x77e   : > { %4607 = vmatpush1.bf16.msra.mxu0 %v4606_v18 }
 0x77f   : > { %v5130_v4 = vpop.permute.xlu1 %5129  ;;  %4647 = vmatpush1.bf16.msra.mxu1 %v4646_v40 }
 0x780   : > { %v5132_v19 = vunpack.i.h.bf16 %v5130_v4  ;;  %v5131_v62 = vunpack.i.l.bf16 %v5130_v4  ;;  %4648 = vmatprep.subr.bf16.mxu1 %v5185_v29  ;;  %v3717_v29 = vpop.permute.xlu0 %3716 }
 0x782   : > { %v3646_v43 = vsel %vm8885_vm8, %v7729_v42, %v5131_v62  ;;  %v3647_v59 = vsel %vm8886_vm4, %v5131_v62, %v5132_v19 }
 0x783   : > { %v4610_v35 = vpack.c.bf16 %v3684_v1, %v3646_v43  ;;  %v3656_v9 = vpop.permute.xlu1 %3655  ;;  %v4608_v15 = vpack.c.bf16 %v3685_v16, %v3647_v59 }
 0x784   : > { %v3658_v63 = vsel %vm8889_vm0, %v5132_v19, %v3656_v9 }
 0x785   : > { %v4649_v34 = vpack.c.bf16 %v3696_v58, %v3658_v63  ;;  %4609 = vmatprep.subr.bf16.mxu0 %v4608_v15 }
 0x786   : > { %4611 = vmatpush1.bf16.msra.mxu0 %v4610_v35 }
 0x787   : > { %v3715_v56 = vpop.permute.xlu1 %3714  ;;  %4650 = vmatpush1.bf16.msra.mxu1 %v4649_v34 }
 0x788   : > { %v3722_v42 = vsel %vm8890_vm1, %v7782_v25, %v3715_v56  ;;  %v3723_v14 = vsel %vm8891_vm3, %v3715_v56, %v3717_v29  ;;  %4208 = vmatprep.subr.mxu1 %v8892_v10 }
 0x789   : > { %4137 = vmatprep.subr.mxu0 %v3723_v14  ;;  %v3937_v51 = vpop.permute.xlu0 %3936 }
 0x78a   : > { %4138 = vmatpush1.msra.mxu0 %v3722_v42 }
 0x78b   : > { %v3732_v31 = vpop.permute.xlu1 %3731  ;;  %4150 = vmatmul.mubr.f32.vlgmr.msra.gmra.mrb[6].mxu0 %v7767_v24 }
 0x78c   : > { %v3734_v21 = vsel %vm8893_vm6, %v3717_v29, %v3732_v31 }
 0x78d   : > { %4209 = vmatpush1.msra.mxu1 %v3734_v21 }
 0x78e   : > { %4221 = vmatmul.mubr.f32.vlgmr.msra.gmra.mrb[6].mxu1 %v7767_v24 }
 0x811   : > { %v4009_v33 = vpop.f32.mrb[4].mxu0 }
 0x812   : > { %v4010_v37 = vadd.f32 %v4009_v33, %v3937_v51  ;;  %v4011_v11 = vpop.f32.mrb[5].mxu0 }
 0x813   : > { %v4012_v25 = vadd.f32 %v4011_v11, %v3937_v51 }
 0x814   : > { %vm4226_vm5 = vcmp.gt.f32.partialorder %v4010_v37, 0.0  ;;  %v4233_v54 = vmul.f32 0.1, %v4010_v37 }
 0x815   : > { %vm4227_vm7 = vcmp.gt.f32.partialorder %v4012_v25, 0.0  ;;  %v4234_v20 = vmul.f32 0.1, %v4012_v25 }
 0x816   : > { %v4240_v24 = vsel %vm4226_vm5, %v4010_v37, %v4233_v54  ;;  %v4080_v12 = vpop.f32.mrb[4].mxu1 }
 0x817   : > { %4247 = vst [vmem:[%s7955_s24] sm:$0xff] %v4240_v24  ;;  %v4241_v47 = vsel %vm4227_vm7, %v4012_v25, %v4234_v20  ;;  %v4081_v53 = vadd.f32 %v4080_v12, %v3937_v51  ;;  %v4082_v57 = vpop.f32.mrb[5].mxu1 }
 0x818   : > { %4248 = vst [vmem:[%s7955_s24 + $0x8] sm:$0xff] %v4241_v47  ;;  %v4083_v0 = vadd.f32 %v4082_v57, %v3937_v51 }
 0x819   : > { %vm4228_vm9 = vcmp.gt.f32.partialorder %v4081_v53, 0.0  ;;  %v4235_v3 = vmul.f32 0.1, %v4081_v53 }
 0x81a   : > { %vm4229_vm11 = vcmp.gt.f32.partialorder %v4083_v0, 0.0  ;;  %v4236_v48 = vmul.f32 0.1, %v4083_v0 }
 0x81b   : > { %v4242_v17 = vsel %vm4228_vm9, %v4081_v53, %v4235_v3 }
 0x81c   : > { %4249 = vst [vmem:[%s7955_s24 + $0x10] sm:$0xff] %v4242_v17  ;;  %v4243_v30 = vsel %vm4229_vm11, %v4083_v0, %v4236_v48 }
 0x81d   : > { %4250 = vst [vmem:[%s7955_s24 + $0x18] sm:$0xff] %v4243_v30 }
 0x85e   : > { %v4151_v50 = vpop.f32.mrb[6].mxu0 }
 0x85f   : > { %v4152_v13 = vadd.f32 %v4151_v50, %v3937_v51  ;;  %v4153_v6 = vpop.f32.mrb[7].mxu0 }
 0x860   : > { %v4154_v49 = vadd.f32 %v4153_v6, %v3937_v51 }
 0x861   : > { %vm4230_vm12 = vcmp.gt.f32.partialorder %v4152_v13, 0.0  ;;  %v4237_v38 = vmul.f32 0.1, %v4152_v13  ;;  %v4222_v23 = vpop.f32.mrb[6].mxu1 }
 0x862   : > { %vm4231_vm13 = vcmp.gt.f32.partialorder %v4154_v49, 0.0  ;;  %v4238_v41 = vmul.f32 0.1, %v4154_v49  ;;  %v4223_v2 = vadd.f32 %v4222_v23, %v3937_v51  ;;  %v4224_v5 = vpop.f32.mrb[7].mxu1 }
 0x863   : > { %v4244_v39 = vsel %vm4230_vm12, %v4152_v13, %v4237_v38 }
 0x864   : > { %4251 = vst [vmem:[%s7955_s24 + $0x20] sm:$0xff] %v4244_v39  ;;  %v4245_v27 = vsel %vm4231_vm13, %v4154_v49, %v4238_v41  ;;  %vm4232_vm14 = vcmp.gt.f32.partialorder %v4223_v2, 0.0  ;;  %v4239_v52 = vmul.f32 0.1, %v4223_v2 }
 0x865   : > { %4252 = vst [vmem:[%s7955_s24 + $0x28] sm:$0xff] %v4245_v27 }
 0x866   : > { %v4246_v46 = vsel %vm4232_vm14, %v4223_v2, %v4239_v52 }
 0x867   : > { %4253 = vst [vmem:[%s7955_s24 + $0x30] sm:$0xff] %v4246_v46 }
 0x868 PF: > { %s16_s21 = sadd.s32 1, %s5148_s21  }
 0x869   : > { %p13_p4 = scmp.ge.s32.totalorder %s16_s21, 4  }
 0x86b   :  { %15 = sbr.rel (!%p13_p4) target bundleno = 1 (0x1), region = 76 }

</bundles_post_ra>
